<compile_context>
chip_gen: v5e
topology: v5e:2x2
jax: 0.10.0
libtpu: 0.0.40
codegen_flags: <defaults>
</compile_context>

<pallas_src>
import functools

import jax
import jax.numpy as jnp
from jax.experimental import pallas as pl
from jax.experimental.pallas import tpu as pltpu


def _gated_conv_kernel(xp_ref, w_ref, b_ref, o_ref, col_ref, *,
                       k, tile_h, w, c_in, cp, kkc, kpad):
    """One (batch, row-tile) grid step.

    xp_ref : [Hp, Wp, C_in]      whole spatially padded NHWC image (batch squeezed)
    w_ref  : [Kpad, 3*Cp]        fused weight, rows tap-major (tap*C_in + c),
                                 columns = [main | gate | shortcut]
    b_ref  : [1, 3*Cp]           fused bias (f32)
    o_ref  : [tile_h*W, Cp]      gated output rows for this tile (lane-dense)
    col_ref: [tile_h, W, Kpad]   im2col scratch = lane-dense matmul LHS
    """
    j = pl.program_id(1)
    row0 = j * tile_h                     # first output row of this tile
    rows = tile_h * w

    # ---- build the lane-dense im2col LHS in VMEM (one shift-copy per tap) ----
    # TODO(synk): these K*K shifted copies could be fused further via strided
    #             copies / pltpu.roll; kept as plain static slices for clarity.
    for kh in range(k):
        for kw in range(k):
            t = kh * k + kw
            col_ref[:, :, t * c_in:(t + 1) * c_in] = (
                xp_ref[pl.ds(row0 + kh, tile_h), kw:kw + w, :])
    if kpad > kkc:
        # Zero the contraction pad lanes (scratch may hold stale/NaN bits).
        col_ref[:, :, kkc:] = jnp.zeros((tile_h, w, kpad - kkc), col_ref.dtype)

    # ---- one fat MXU matmul: [rows, Kpad] x [Kpad, 3*Cp], f32 accumulation ----
    lhs = col_ref[...].reshape(rows, kpad)          # lane dim kept -> cheap merge
    acc = jnp.dot(lhs, w_ref[...], preferred_element_type=jnp.float32)
    acc = acc + b_ref[...]                          # single lane-broadcast bias add

    # ---- epilogue on vreg-aligned 128-lane segments (f32, cast at the store) ----
    main = jnp.maximum(acc[:, :cp], 0.0)            # ReLU(conv)
    gate = jax.nn.sigmoid(acc[:, cp:2 * cp])        # Sigmoid(gate_conv)
    shortcut = acc[:, 2 * cp:]                      # 1x1 shortcut projection
    o_ref[...] = (main * gate + shortcut).astype(o_ref.dtype)


def _pick_tile_h(h, w, cp, kpad, in_bytes, out_bytes, budget_bytes):
    """Largest divisor of h whose per-tile VMEM live set fits the budget."""
    divisors = sorted({d for d in range(1, h + 1) if h % d == 0}, reverse=True)
    for th in divisors:
        rows = th * w
        if th != h and (rows % 8) != 0:     # keep output block sublane-aligned
            continue
        est = rows * (kpad * in_bytes          # im2col scratch
                      + 2 * 3 * cp * 4         # f32 acc + epilogue temps
                      + 2 * cp * out_bytes)    # double-buffered output tile
        if est <= budget_bytes:
            return th
    return divisors[-1]


@functools.partial(jax.jit,
                   static_argnames=("kernel_size", "compute_dtype", "out_dtype"))
def gated_conv_node(x, w_main, b_main, w_gate, b_gate, w_sc=None, b_sc=None,
                    kernel_size=3, compute_dtype=jnp.bfloat16, out_dtype=None):
    """Forward pass of PyTorchGatedConvNode (stride=1, padding='same').

    x:       [N, C_in, H, W] (NCHW, like PyTorch)
    w_main:  [C_out, C_in, K, K], b_main: [C_out]
    w_gate:  [C_out, C_in, K, K], b_gate: [C_out]
    w_sc:    [C_out, C_in, 1, 1] or None (identity shortcut), b_sc: [C_out] or None
    returns: [N, C_out, H, W] in `out_dtype` (defaults to compute_dtype)
    """
    n, c_in, h, w = x.shape
    c_out = w_main.shape[0]
    k = kernel_size
    if k % 2 != 1:
        raise NotImplementedError("even kernel sizes not implemented")
    if w_sc is None and c_in != c_out:
        raise ValueError("identity shortcut requires in_channels == out_channels")
    out_dtype = compute_dtype if out_dtype is None else out_dtype

    pad = k // 2
    cp = ((c_out + 127) // 128) * 128          # lane-dense output segment width
    kkc = k * k * c_in                         # true contraction width
    kpad = ((kkc + 127) // 128) * 128          # contraction padded to 128 lanes
    hp, wp = h + 2 * pad, w + 2 * pad

    # NHWC + 'same' spatial padding (no im2col materialised in HBM).
    x_nhwc = jnp.transpose(x, (0, 2, 3, 1))
    xp = jnp.pad(x_nhwc, ((0, 0), (pad, pad), (pad, pad), (0, 0)))
    xp = xp.astype(compute_dtype)

    # Fused weight [Kpad, 3*Cp]: rows tap-major, columns = [main | gate | shortcut].
    wm = jnp.transpose(w_main, (2, 3, 1, 0)).reshape(kkc, c_out)
    wg = jnp.transpose(w_gate, (2, 3, 1, 0)).reshape(kkc, c_out)
    if w_sc is None:                           # in==out, stride==1 -> identity
        ws = jnp.eye(c_in, dtype=jnp.float32)
        bs = jnp.zeros((c_out,), jnp.float32)
    else:
        ws = jnp.transpose(w_sc[:, :, 0, 0], (1, 0))            # [C_in, C_out]
        bs = b_sc
    center = pad * k + pad                     # 1x1 shortcut sits on the centre tap
    w_fused = jnp.zeros((kpad, 3 * cp), jnp.float32)
    w_fused = w_fused.at[:kkc, 0:c_out].set(wm)
    w_fused = w_fused.at[:kkc, cp:cp + c_out].set(wg)
    w_fused = w_fused.at[center * c_in:(center + 1) * c_in,
                         2 * cp:2 * cp + c_out].set(ws)
    w_fused = w_fused.astype(compute_dtype)

    b_fused = jnp.zeros((1, 3 * cp), jnp.float32)
    b_fused = b_fused.at[0, 0:c_out].set(b_main)
    b_fused = b_fused.at[0, cp:cp + c_out].set(b_gate)
    b_fused = b_fused.at[0, 2 * cp:2 * cp + c_out].set(bs)

    # Row tile sized against a ~24 MiB per-tile budget; explicit VMEM limit.
    in_b = jnp.dtype(compute_dtype).itemsize
    out_b = jnp.dtype(out_dtype).itemsize
    tile_h = _pick_tile_h(h, w, cp, kpad, in_b, out_b, 24 * 1024 * 1024)
    n_tiles = h // tile_h
    rows = tile_h * w

    est = (2 * hp * wp * c_in * in_b           # double-buffered padded image
           + kpad * 3 * cp * in_b              # single-buffered fused weight
           + 3 * cp * 4                        # bias
           + rows * kpad * in_b                # im2col scratch
           + 2 * rows * 3 * cp * 4             # f32 acc + epilogue temps
           + 2 * rows * cp * out_b)            # double-buffered output tile
    vmem_limit = int(min(max(2 * est, 32 * 1024 * 1024), 48 * 1024 * 1024))

    kern = functools.partial(_gated_conv_kernel, k=k, tile_h=tile_h, w=w,
                             c_in=c_in, cp=cp, kkc=kkc, kpad=kpad)

    # TODO(synk): for C_out << 128 measure a masked C_out-lane store vs this
    #             padded unmasked 128-lane store and pick per shape.
    out = pl.pallas_call(
        kern,
        out_shape=jax.ShapeDtypeStruct((n, h * w, cp), out_dtype),
        grid_spec=pltpu.PrefetchScalarGridSpec(
            num_scalar_prefetch=0,
            grid=(n, n_tiles),
            in_specs=[
                # padded NHWC image for batch element i (batch dim squeezed);
                # constant index along the row-tile axis -> stays resident.
                pl.BlockSpec((None, hp, wp, c_in), lambda i, j: (i, 0, 0, 0)),
                # grid-invariant fused weight / bias: single-buffered.
                pl.BlockSpec((kpad, 3 * cp), lambda i, j: (0, 0),
                             pipeline_mode=pl.Buffered(1)),
                pl.BlockSpec((1, 3 * cp), lambda i, j: (0, 0),
                             pipeline_mode=pl.Buffered(1)),
            ],
            out_specs=pl.BlockSpec((None, rows, cp), lambda i, j: (i, j, 0)),
            scratch_shapes=[pltpu.VMEM((tile_h, w, kpad), compute_dtype)],
        ),
        compiler_params=pltpu.CompilerParams(
            dimension_semantics=("parallel", "parallel"),
            vmem_limit_bytes=vmem_limit),
    )(xp, w_fused, b_fused)

    # [N, H*W, Cp] -> strip lane pad -> [N, H, W, C_out] -> NCHW
    out = out[:, :, :c_out].reshape(n, h, w, c_out)
    return jnp.transpose(out, (0, 3, 1, 2))


def _reference(x, w_main, b_main, w_gate, b_gate, w_sc, b_sc, k):
    """Plain-JAX reference mirroring the PyTorch forward (stride=1, 'same')."""
    pad = k // 2
    dn = jax.lax.conv_dimension_numbers(x.shape, w_main.shape,
                                        ("NCHW", "OIHW", "NCHW"))
    conv = jax.lax.conv_general_dilated(
        x, w_main, (1, 1), [(pad, pad), (pad, pad)], dimension_numbers=dn
    ) + b_main[None, :, None, None]
    gate = jax.lax.conv_general_dilated(
        x, w_gate, (1, 1), [(pad, pad), (pad, pad)], dimension_numbers=dn
    ) + b_gate[None, :, None, None]
    sc = jax.lax.conv_general_dilated(
        x, w_sc, (1, 1), [(0, 0), (0, 0)], dimension_numbers=dn
    ) + b_sc[None, :, None, None]
    return jnp.maximum(conv, 0.0) * jax.nn.sigmoid(gate) + sc


if __name__ == "__main__":
    # Small shapes consistent with the module.
    N, C_IN, C_OUT, H, W, K = 2, 4, 8, 16, 16, 3

    key = jax.random.PRNGKey(0)
    kx, k1, k2, k3, k4, k5, k6 = jax.random.split(key, 7)

    x = jax.random.normal(kx, (N, C_IN, H, W), dtype=jnp.float32)
    # Deterministic "PyTorch-like" parameter init (uniform, fan-in scaled).
    fan_conv = C_IN * K * K
    bound = 1.0 / (fan_conv ** 0.5)
    w_main = jax.random.uniform(k1, (C_OUT, C_IN, K, K), minval=-bound, maxval=bound)
    b_main = jax.random.uniform(k2, (C_OUT,), minval=-bound, maxval=bound)
    w_gate = jax.random.uniform(k3, (C_OUT, C_IN, K, K), minval=-bound, maxval=bound)
    b_gate = jax.random.uniform(k4, (C_OUT,), minval=-bound, maxval=bound)
    bound_sc = 1.0 / (C_IN ** 0.5)
    w_sc = jax.random.uniform(k5, (C_OUT, C_IN, 1, 1), minval=-bound_sc, maxval=bound_sc)
    b_sc = jax.random.uniform(k6, (C_OUT,), minval=-bound_sc, maxval=bound_sc)

    ref = _reference(x, w_main, b_main, w_gate, b_gate, w_sc, b_sc, K)

    # Default path: bf16 operands + bf16 store, f32 accumulation/epilogue.
    out_bf16 = gated_conv_node(x, w_main, b_main, w_gate, b_gate, w_sc, b_sc,
                               kernel_size=K, compute_dtype=jnp.bfloat16)
    out_bf16 = jax.block_until_ready(out_bf16)
    assert out_bf16.shape == (N, C_OUT, H, W)
    assert jnp.allclose(out_bf16.astype(jnp.float32), ref, atol=5e-2, rtol=5e-2), \
        "bf16-path mismatch vs reference"

    # f32 operand path: tight check that the kernel math is exact.
    out_f32 = gated_conv_node(x, w_main, b_main, w_gate, b_gate, w_sc, b_sc,
                              kernel_size=K, compute_dtype=jnp.float32)
    out_f32 = jax.block_until_ready(out_f32)
    assert jnp.allclose(out_f32, ref, atol=5e-3, rtol=5e-3), \
        "f32-path mismatch vs reference"

    print("KERNEL_OK")
</pallas_src>

<mosaic_0001>
module attributes {stable_mosaic.version = 11 : i64} {
  func.func @_gated_conv_kernel(%arg0: i32, %arg1: i32, %arg2: memref<1x18x18x4xbf16, #tpu.memory_space<vmem>>, %arg3: memref<128x384xbf16, #tpu.memory_space<vmem>>, %arg4: memref<1x384xf32, #tpu.memory_space<vmem>>, %arg5: memref<1x256x128xbf16, #tpu.memory_space<vmem>>, %arg6: memref<16x16x128xbf16, #tpu.memory_space<vmem>>) attributes {dimension_semantics = [#tpu.dimension_semantics<parallel>, #tpu.dimension_semantics<parallel>], iteration_bounds = array<i64: 2, 1>, scalar_prefetch = 0 : i64, scratch_operands = 1 : i64, tpu.core_type = #tpu.core_type<tc>, window_params = [{transform_indices = @transform_0, window_bounds = array<i64: 1, 18, 18, 4>}, {pipeline_mode = #tpu.pipeline_mode<synchronous>, transform_indices = @transform_1, window_bounds = array<i64: 128, 384>}, {pipeline_mode = #tpu.pipeline_mode<synchronous>, transform_indices = @transform_2, window_bounds = array<i64: 1, 384>}, {transform_indices = @transform_3, window_bounds = array<i64: 1, 256, 128>}]} {
    %c16_i32 = arith.constant 16 : i32
    %0 = arith.muli %arg1, %c16_i32 : i32
    %c0_i32 = arith.constant 0 : i32
    %1 = arith.addi %0, %c0_i32 : i32
    %c0 = arith.constant 0 : index
    %2 = arith.index_cast %1 : i32 to index
    %c0_0 = arith.constant 0 : index
    %c0_1 = arith.constant 0 : index
    %3 = vector.load %arg2[%c0, %2, %c0_0, %c0_1] : memref<1x18x18x4xbf16, #tpu.memory_space<vmem>>, vector<1x16x16x4xbf16>
    %4 = vector.shape_cast %3 : vector<1x16x16x4xbf16> to vector<16x16x4xbf16>
    %c0_2 = arith.constant 0 : index
    %c0_3 = arith.constant 0 : index
    %c0_4 = arith.constant 0 : index
    %5 = vector.load %arg6[%c0_2, %c0_3, %c0_4] : memref<16x16x128xbf16, #tpu.memory_space<vmem>>, vector<16x16x4xbf16>
    tpu.vector_store %arg6[%c0_2, %c0_3, %c0_4], %4 {strides = array<i32>} : memref<16x16x128xbf16, #tpu.memory_space<vmem>>, vector<16x16x4xbf16>,
    %c0_i32_5 = arith.constant 0 : i32
    %6 = arith.addi %0, %c0_i32_5 : i32
    %c0_6 = arith.constant 0 : index
    %7 = arith.index_cast %6 : i32 to index
    %c1 = arith.constant 1 : index
    %c0_7 = arith.constant 0 : index
    %8 = vector.load %arg2[%c0_6, %7, %c1, %c0_7] : memref<1x18x18x4xbf16, #tpu.memory_space<vmem>>, vector<1x16x16x4xbf16>
    %9 = vector.shape_cast %8 : vector<1x16x16x4xbf16> to vector<16x16x4xbf16>
    %c0_8 = arith.constant 0 : index
    %c0_9 = arith.constant 0 : index
    %c4 = arith.constant 4 : index
    %10 = vector.load %arg6[%c0_8, %c0_9, %c4] : memref<16x16x128xbf16, #tpu.memory_space<vmem>>, vector<16x16x4xbf16>
    tpu.vector_store %arg6[%c0_8, %c0_9, %c4], %9 {strides = array<i32>} : memref<16x16x128xbf16, #tpu.memory_space<vmem>>, vector<16x16x4xbf16>,
    %c0_i32_10 = arith.constant 0 : i32
    %11 = arith.addi %0, %c0_i32_10 : i32
    %c0_11 = arith.constant 0 : index
    %12 = arith.index_cast %11 : i32 to index
    %c2 = arith.constant 2 : index
    %c0_12 = arith.constant 0 : index
    %13 = vector.load %arg2[%c0_11, %12, %c2, %c0_12] : memref<1x18x18x4xbf16, #tpu.memory_space<vmem>>, vector<1x16x16x4xbf16>
    %14 = vector.shape_cast %13 : vector<1x16x16x4xbf16> to vector<16x16x4xbf16>
    %c0_13 = arith.constant 0 : index
    %c0_14 = arith.constant 0 : index
    %c8 = arith.constant 8 : index
    %15 = vector.load %arg6[%c0_13, %c0_14, %c8] : memref<16x16x128xbf16, #tpu.memory_space<vmem>>, vector<16x16x4xbf16>
    tpu.vector_store %arg6[%c0_13, %c0_14, %c8], %14 {strides = array<i32>} : memref<16x16x128xbf16, #tpu.memory_space<vmem>>, vector<16x16x4xbf16>,
    %c1_i32 = arith.constant 1 : i32
    %16 = arith.addi %0, %c1_i32 : i32
    %c0_15 = arith.constant 0 : index
    %17 = arith.index_cast %16 : i32 to index
    %c0_16 = arith.constant 0 : index
    %c0_17 = arith.constant 0 : index
    %18 = vector.load %arg2[%c0_15, %17, %c0_16, %c0_17] : memref<1x18x18x4xbf16, #tpu.memory_space<vmem>>, vector<1x16x16x4xbf16>
    %19 = vector.shape_cast %18 : vector<1x16x16x4xbf16> to vector<16x16x4xbf16>
    %c0_18 = arith.constant 0 : index
    %c0_19 = arith.constant 0 : index
    %c12 = arith.constant 12 : index
    %20 = vector.load %arg6[%c0_18, %c0_19, %c12] : memref<16x16x128xbf16, #tpu.memory_space<vmem>>, vector<16x16x4xbf16>
    tpu.vector_store %arg6[%c0_18, %c0_19, %c12], %19 {strides = array<i32>} : memref<16x16x128xbf16, #tpu.memory_space<vmem>>, vector<16x16x4xbf16>,
    %c1_i32_20 = arith.constant 1 : i32
    %21 = arith.addi %0, %c1_i32_20 : i32
    %c0_21 = arith.constant 0 : index
    %22 = arith.index_cast %21 : i32 to index
    %c1_22 = arith.constant 1 : index
    %c0_23 = arith.constant 0 : index
    %23 = vector.load %arg2[%c0_21, %22, %c1_22, %c0_23] : memref<1x18x18x4xbf16, #tpu.memory_space<vmem>>, vector<1x16x16x4xbf16>
    %24 = vector.shape_cast %23 : vector<1x16x16x4xbf16> to vector<16x16x4xbf16>
    %c0_24 = arith.constant 0 : index
    %c0_25 = arith.constant 0 : index
    %c16 = arith.constant 16 : index
    %25 = vector.load %arg6[%c0_24, %c0_25, %c16] : memref<16x16x128xbf16, #tpu.memory_space<vmem>>, vector<16x16x4xbf16>
    tpu.vector_store %arg6[%c0_24, %c0_25, %c16], %24 {strides = array<i32>} : memref<16x16x128xbf16, #tpu.memory_space<vmem>>, vector<16x16x4xbf16>,
    %c1_i32_26 = arith.constant 1 : i32
    %26 = arith.addi %0, %c1_i32_26 : i32
    %c0_27 = arith.constant 0 : index
    %27 = arith.index_cast %26 : i32 to index
    %c2_28 = arith.constant 2 : index
    %c0_29 = arith.constant 0 : index
    %28 = vector.load %arg2[%c0_27, %27, %c2_28, %c0_29] : memref<1x18x18x4xbf16, #tpu.memory_space<vmem>>, vector<1x16x16x4xbf16>
    %29 = vector.shape_cast %28 : vector<1x16x16x4xbf16> to vector<16x16x4xbf16>
    %c0_30 = arith.constant 0 : index
    %c0_31 = arith.constant 0 : index
    %c20 = arith.constant 20 : index
    %30 = vector.load %arg6[%c0_30, %c0_31, %c20] : memref<16x16x128xbf16, #tpu.memory_space<vmem>>, vector<16x16x4xbf16>
    tpu.vector_store %arg6[%c0_30, %c0_31, %c20], %29 {strides = array<i32>} : memref<16x16x128xbf16, #tpu.memory_space<vmem>>, vector<16x16x4xbf16>,
    %c2_i32 = arith.constant 2 : i32
    %31 = arith.addi %0, %c2_i32 : i32
    %c0_32 = arith.constant 0 : index
    %32 = arith.index_cast %31 : i32 to index
    %c0_33 = arith.constant 0 : index
    %c0_34 = arith.constant 0 : index
    %33 = vector.load %arg2[%c0_32, %32, %c0_33, %c0_34] : memref<1x18x18x4xbf16, #tpu.memory_space<vmem>>, vector<1x16x16x4xbf16>
    %34 = vector.shape_cast %33 : vector<1x16x16x4xbf16> to vector<16x16x4xbf16>
    %c0_35 = arith.constant 0 : index
    %c0_36 = arith.constant 0 : index
    %c24 = arith.constant 24 : index
    %35 = vector.load %arg6[%c0_35, %c0_36, %c24] : memref<16x16x128xbf16, #tpu.memory_space<vmem>>, vector<16x16x4xbf16>
    tpu.vector_store %arg6[%c0_35, %c0_36, %c24], %34 {strides = array<i32>} : memref<16x16x128xbf16, #tpu.memory_space<vmem>>, vector<16x16x4xbf16>,
    %c2_i32_37 = arith.constant 2 : i32
    %36 = arith.addi %0, %c2_i32_37 : i32
    %c0_38 = arith.constant 0 : index
    %37 = arith.index_cast %36 : i32 to index
    %c1_39 = arith.constant 1 : index
    %c0_40 = arith.constant 0 : index
    %38 = vector.load %arg2[%c0_38, %37, %c1_39, %c0_40] : memref<1x18x18x4xbf16, #tpu.memory_space<vmem>>, vector<1x16x16x4xbf16>
    %39 = vector.shape_cast %38 : vector<1x16x16x4xbf16> to vector<16x16x4xbf16>
    %c0_41 = arith.constant 0 : index
    %c0_42 = arith.constant 0 : index
    %c28 = arith.constant 28 : index
    %40 = vector.load %arg6[%c0_41, %c0_42, %c28] : memref<16x16x128xbf16, #tpu.memory_space<vmem>>, vector<16x16x4xbf16>
    tpu.vector_store %arg6[%c0_41, %c0_42, %c28], %39 {strides = array<i32>} : memref<16x16x128xbf16, #tpu.memory_space<vmem>>, vector<16x16x4xbf16>,
    %c2_i32_43 = arith.constant 2 : i32
    %41 = arith.addi %0, %c2_i32_43 : i32
    %c0_44 = arith.constant 0 : index
    %42 = arith.index_cast %41 : i32 to index
    %c2_45 = arith.constant 2 : index
    %c0_46 = arith.constant 0 : index
    %43 = vector.load %arg2[%c0_44, %42, %c2_45, %c0_46] : memref<1x18x18x4xbf16, #tpu.memory_space<vmem>>, vector<1x16x16x4xbf16>
    %44 = vector.shape_cast %43 : vector<1x16x16x4xbf16> to vector<16x16x4xbf16>
    %c0_47 = arith.constant 0 : index
    %c0_48 = arith.constant 0 : index
    %c32 = arith.constant 32 : index
    %45 = vector.load %arg6[%c0_47, %c0_48, %c32] : memref<16x16x128xbf16, #tpu.memory_space<vmem>>, vector<16x16x4xbf16>
    tpu.vector_store %arg6[%c0_47, %c0_48, %c32], %44 {strides = array<i32>} : memref<16x16x128xbf16, #tpu.memory_space<vmem>>, vector<16x16x4xbf16>,
    %cst = arith.constant 0.000000e+00 : bf16
    %46 = vector.broadcast %cst : bf16 to vector<16x16x92xbf16>
    %c0_49 = arith.constant 0 : index
    %c0_50 = arith.constant 0 : index
    %c36 = arith.constant 36 : index
    %47 = vector.load %arg6[%c0_49, %c0_50, %c36] : memref<16x16x128xbf16, #tpu.memory_space<vmem>>, vector<16x16x92xbf16>
    tpu.vector_store %arg6[%c0_49, %c0_50, %c36], %46 {strides = array<i32>} : memref<16x16x128xbf16, #tpu.memory_space<vmem>>, vector<16x16x92xbf16>,
    %c0_51 = arith.constant 0 : index
    %c0_52 = arith.constant 0 : index
    %c0_53 = arith.constant 0 : index
    %48 = vector.load %arg6[%c0_51, %c0_52, %c0_53] : memref<16x16x128xbf16, #tpu.memory_space<vmem>>, vector<16x16x128xbf16>
    %49 = vector.shape_cast %48 : vector<16x16x128xbf16> to vector<256x128xbf16>
    %c0_54 = arith.constant 0 : index
    %c0_55 = arith.constant 0 : index
    %50 = vector.load %arg3[%c0_54, %c0_55] : memref<128x384xbf16, #tpu.memory_space<vmem>>, vector<128x384xbf16>
    %cst_56 = arith.constant dense<0.000000e+00> : vector<256x384xf32>
    %51 = tpu.matmul %49, %50, %cst_56 {dimension_numbers = #tpu.dot_dimension_numbers<[1], [0], [0], [1], [0, 0, 1, 1], [], []>} : vector<256x128xbf16>, vector<128x384xbf16>, vector<256x384xf32> -> vector<256x384xf32>
    %c0_57 = arith.constant 0 : index
    %c0_58 = arith.constant 0 : index
    %52 = vector.load %arg4[%c0_57, %c0_58] : memref<1x384xf32, #tpu.memory_space<vmem>>, vector<1x384xf32>
    %53 = vector.broadcast %52 : vector<1x384xf32> to vector<256x384xf32>
    %54 = arith.addf %51, %53 : vector<256x384xf32>
    %55 = vector.extract_strided_slice %54 {offsets = [0, 0], sizes = [256, 128], strides = [1, 1]} : vector<256x384xf32> to vector<256x128xf32>
    %cst_59 = arith.constant 0.000000e+00 : f32
    %56 = vector.broadcast %cst_59 : f32 to vector<256x128xf32>
    %57 = arith.maximumf %55, %56 : vector<256x128xf32>
    %58 = vector.extract_strided_slice %54 {offsets = [0, 128], sizes = [256, 128], strides = [1, 1]} : vector<256x384xf32> to vector<256x128xf32>
    %59 = arith.negf %58 : vector<256x128xf32>
    %60 = math.exp %59 : vector<256x128xf32>
    %cst_60 = arith.constant 1.000000e+00 : f32
    %61 = vector.broadcast %cst_60 : f32 to vector<256x128xf32>
    %62 = arith.addf %61, %60 : vector<256x128xf32>
    %63 = arith.divf %61, %62 : vector<256x128xf32>
    %64 = vector.extract_strided_slice %54 {offsets = [0, 256], sizes = [256, 128], strides = [1, 1]} : vector<256x384xf32> to vector<256x128xf32>
    %65 = arith.mulf %57, %63 : vector<256x128xf32>
    %66 = arith.addf %65, %64 : vector<256x128xf32>
    %67 = arith.truncf %66 : vector<256x128xf32> to vector<256x128xbf16>
    %c0_61 = arith.constant 0 : index
    %c0_62 = arith.constant 0 : index
    %c0_63 = arith.constant 0 : index
    %68 = vector.load %arg5[%c0_61, %c0_62, %c0_63] : memref<1x256x128xbf16, #tpu.memory_space<vmem>>, vector<1x256x128xbf16>
    %69 = vector.shape_cast %68 : vector<1x256x128xbf16> to vector<256x128xbf16>
    %70 = vector.shape_cast %67 : vector<256x128xbf16> to vector<1x256x128xbf16>
    tpu.vector_store %arg5[%c0_61, %c0_62, %c0_63], %70 {strides = array<i32>} : memref<1x256x128xbf16, #tpu.memory_space<vmem>>, vector<1x256x128xbf16>,
    return
  }
  func.func @transform_0(%arg0: i32, %arg1: i32) -> (i32, i32, i32, i32) {
    %c0_i32 = arith.constant 0 : i32
    %c0_i32_0 = arith.constant 0 : i32
    %c0_i32_1 = arith.constant 0 : i32
    %c0_i32_2 = arith.constant 0 : i32
    return %arg0, %c0_i32, %c0_i32_0, %c0_i32_1 : i32, i32, i32, i32
  }
  func.func @transform_1(%arg0: i32, %arg1: i32) -> (i32, i32) {
    %c0_i32 = arith.constant 0 : i32
    %c0_i32_0 = arith.constant 0 : i32
    %c0_i32_1 = arith.constant 0 : i32
    return %c0_i32, %c0_i32_0 : i32, i32
  }
  func.func @transform_2(%arg0: i32, %arg1: i32) -> (i32, i32) {
    %c0_i32 = arith.constant 0 : i32
    %c0_i32_0 = arith.constant 0 : i32
    %c0_i32_1 = arith.constant 0 : i32
    return %c0_i32, %c0_i32_0 : i32, i32
  }
  func.func @transform_3(%arg0: i32, %arg1: i32) -> (i32, i32, i32) {
    %c0_i32 = arith.constant 0 : i32
    %c0_i32_0 = arith.constant 0 : i32
    return %arg0, %arg1, %c0_i32 : i32, i32, i32
  }
}

</mosaic_0001>

<bundles_post_ra>
// kernel: gated_conv_node.1
= control target key start
LH: loop header
LB: loop body
LE: loop exit
PB: predicated region body
PF: predicated region fallthrough
CT: control target
= control target key end

     0   :  { %s5694_s12 = smov 0   ;;  %s5696_s13 = smov 0   ;;  %s8346_s0 = inlined_call_operand.vmem [shape: bf16[2,18,18,4], index: 0, kind: input, shape index: {}]   ;;  %s8347_s1 = inlined_call_operand.vmem [shape: bf16[128,384], index: 1, kind: input, shape index: {}]   ;;  %s8348_s2 = inlined_call_operand.vmem [shape: f32[1,384], index: 2, kind: input, shape index: {}]   ;;  %s8349_s3 = inlined_call_operand.vmem [shape: bf16[2,256,128], index: 3, kind: output, shape index: {}]  }
   0x1   :  { %s5698_s14 = smov 0  }
   0x2 LB: > { %s25_s15 = sadd.s32 1, %s5659_s13  ;;  %p4817_p0 = scmp.ge.s32.totalorder %s5663_s14, 1  ;;  %s5663_s14 = sphi %s5698_s14, %s13_s14   ;;  %s5659_s13 = sphi %s5696_s13, %s8425_s13   ;;  %s5655_s12 = sphi %s5694_s12, %s8424_s12  }
   0x3   : > { %p27_p1 = scmp.ge.s32.totalorder %s25_s15, 2  ;;  %p151_p2 = scmp.lt.s32.totalorder %s5663_s14, 3 }
   0x5   : > { %s8427_s15 = smov (%p27_p1, %s25_s15), 0  ;;  %p152_p3 = pnand %p4817_p0, %p151_p2 }
   0x6   : > { %p179_p4 = scmp.lt.s32.totalorder (!%p152_p3), %s5655_s12, 1  ;;  %s5665_s20 = smov (!%p152_p3), 4  }
   0x7   : > { %155 = sbr.rel (%p152_p3) target bundleno = 1002 (0x3ea), region = 32  ;;  %s5666_s21 = smov (!%p152_p3), 8  }
   0x8   : > { %s5667_s22 = smov (!%p152_p3), 12   ;;  %s5668_s23 = smov (!%p152_p3), 16  }
   0x9   : > { %s5669_s24 = smov (!%p152_p3), 20   ;;  %s5670_s25 = smov (!%p152_p3), 28  }
   0xa   : > { %s5671_s26 = smov (!%p152_p3), 24   ;;  %s5672_s27 = smov (!%p152_p3), 32  }
   0xc   : > { %s8429_s12 = smov (!%p179_p4, %s5655_s12), 1  ;;  %vm312_vm0 = vsmask.f32 3328  ;;  %vm313_vm1 = vsmask.f32 7440  ;;  %vm924_vm3 = vcmask 1042432  }
   0xd   : > { %s5479_s16 = smul.u32 216, %s8429_s12  ;;  %vm5729_vm2 = vmor %vm312_vm0, %vm313_vm1  ;;  %vm925_vm4 = vcmask 1046532   ;;  %vm231_vm6 = vcmask 27648   ;;  %vm795_vm7 = vcmask 60448   ;;  %vm1135_vm8 = vcmask 93248  }
   0xe   : > { %vm5919_vm5 = vmor %vm924_vm3, %vm925_vm4  ;;  %vm1332_vm9 = vcmask 126048   ;;  %vm1893_vm10 = vcmask 158848   ;;  %vm2230_vm11 = vcmask 191648   ;;  %vm2427_vm12 = vcmask 224448  }
   0xf   : > { %s5718_s19 = scalar_lea.vmem %s8346_s0, %s5479_s16  ;;  %vm2988_vm13 = vcmask 257248   ;;  %vm3325_vm14 = vcmask 290048   ;;  %vm3358_vm15 = vcmask 1043744  }
  0x10   : > { %v267_v0 = vld [vmem:[%s5718_s19 + $0xc] sm:$0xf]  ;;  %v268_v1 = vld [vmem:[%s5718_s19 + $0x10] sm:$0xf]  ;;  %v264_v2 = vld [vmem:[%s5718_s19] sm:$0xf] }
  0x11   : > { %v340_v3 = vshrl.u32 %v267_v0, 16  ;;  %v343_v4 = vshll.u32 %v267_v0, 16  ;;  %v349_v5 = vshll.u32 %v268_v1, 16  ;;  %v353_v6 = vshrl.u32 %v268_v1, 16  ;;  %v265_v7 = vld [vmem:[%s5718_s19 + $0x4] sm:$0xf] }
  0x12   : > { %v316_v8 = vshrl.u32 %v264_v2, 16  ;;  %v319_v9 = vshll.u32 %v264_v2, 16  ;;  %v325_v10 = vshll.u32 %v265_v7, 16  ;;  %v329_v11 = vshrl.u32 %v265_v7, 16  ;;  %v269_v16 = vld [vmem:[%s5718_s19 + $0x14] sm:$0x1] }
  0x13   : > { %v342_v12 = vrot.slane %v340_v3, 4  ;;  %v345_v13 = vrot.slane %v343_v4, 5  ;;  %v351_v14 = vrot.slane %v349_v5, 5  ;;  %v355_v15 = vrot.slane %v353_v6, 4  ;;  %v274_v20 = vld [vmem:[%s5718_s19 + $0x28] sm:$0xf] }
  0x14   : > { %v318_v17 = vrot.slane %v316_v8, 4  ;;  %v321_v18 = vrot.slane %v319_v9, 5  ;;  %v331_v19 = vrot.slane %v329_v11, 4  ;;  %v327_v22 = vrot.slane %v325_v10, 5  ;;  %v266_v24 = vld [vmem:[%s5718_s19 + $0x8] sm:$0x1] }
  0x15   : > { %v346_v21 = vor.u32 %v345_v13, %v342_v12  ;;  %v356_v23 = vor.u32 %v355_v15, %v351_v14  ;;  %v359_v27 = vshll.u32 %v269_v16, 16  ;;  %v397_v28 = vshll.u32 %v274_v20, 16  ;;  %v273_v30 = vld [vmem:[%s5718_s19 + $0x24] sm:$0xf]  ;;  %v275_v42 = vld [vmem:[%s5718_s19 + $0x2c] sm:$0x1] }
  0x16   : > { %v322_v26 = vor.u32 %v321_v18, %v318_v17  ;;  %v401_v29 = vshrl.u32 %v274_v20, 16  ;;  %v332_v33 = vor.u32 %v331_v19, %v327_v22  ;;  %v335_v34 = vshll.u32 %v266_v24, 16  ;;  %v279_v44 = vld [vmem:[%s5718_s19 + $0x3c] sm:$0xf]  ;;  %v277_v45 = vld [vmem:[%s5718_s19 + $0x34] sm:$0xf] }
  0x17   : > { %v347_v31 = vrot.slane %v346_v21, 4  ;;  %v5736_v36 = vrot.slane %v397_v28, 5  ;;  %v388_v38 = vshrl.u32 %v273_v30, 16  ;;  %v357_v40 = vrot.slane %v356_v23, 4  ;;  %v270_v50 = vld [vmem:[%s5718_s19 + $0x18] sm:$0xf] }
  0x18   : > { %v323_v32 = vrot.slane %v322_v26, 4  ;;  %v403_v37 = vrot.slane %v401_v29, 4  ;;  %v361_v41 = vrot.slane %v359_v27, 5  ;;  %v391_v43 = vshll.u32 %v273_v30, 16  ;;  %v271_v53 = vld [vmem:[%s5718_s19 + $0x1c] sm:$0xf] }
  0x19   : > { %v352_v35 = vsel %vm5729_vm2, %v347_v31, %v351_v14  ;;  %v333_v46 = vrot.slane %v332_v33, 4  ;;  %v337_v47 = vrot.slane %v335_v34, 5  ;;  %v390_v48 = vrot.slane %v388_v38, 4  ;;  %v5754_v4 = vld [vmem:[%s5718_s19 + $0x40] sm:$0xf] }
  0x1a   : > { %703 = vrot.lane.b32.xlu1 %v352_v35, %s5665_s20  ;;  %v328_v39 = vsel %vm5729_vm2, %v323_v32, %v327_v22  ;;  %v393_v49 = vrot.slane %v391_v43, 5  ;;  %v404_v51 = vor.u32 %v403_v37, %v5736_v36  ;;  %v407_v52 = vshll.u32 %v275_v42, 16  ;;  %v278_v6 = vld [vmem:[%s5718_s19 + $0x38] sm:$0x1]  ;;  %v272_v12 = vld [vmem:[%s5718_s19 + $0x20] sm:$0x1] }
  0x1b   : > { %699 = vrot.lane.b32.xlu0 %v328_v39, %s5665_s20  ;;  %v362_v54 = vsel %vm5729_vm2, %v357_v40, %v361_v41  ;;  %v436_v55 = vshrl.u32 %v279_v44, 16  ;;  %v439_v56 = vshll.u32 %v279_v44, 16  ;;  %v421_v57 = vshll.u32 %v277_v45, 16  ;;  %v283_v16 = vld [vmem:[%s5718_s19 + $0x4c] sm:$0xf] }
  0x1c   : > { %v425_v58 = vshrl.u32 %v277_v45, 16  ;;  %v364_v59 = vshrl.u32 %v270_v50, 16  ;;  %v338_v60 = vsel %vm5729_vm2, %v333_v46, %v337_v47  ;;  %v394_v61 = vor.u32 %v393_v49, %v390_v48  ;;  %v282_v19 = vld [vmem:[%s5718_s19 + $0x48] sm:$0xf]  ;;  %v276_v33 = vld [vmem:[%s5718_s19 + $0x30] sm:$0xf] }
  0x1d   : > { %v367_v62 = vshll.u32 %v270_v50, 16  ;;  %v373_v63 = vshll.u32 %v271_v53, 16  ;;  %v405_v0 = vrot.slane %v404_v51, 4  ;;  %v409_v1 = vrot.slane %v407_v52, 5  ;;  %v288_v39 = vld [vmem:[%s5718_s19 + $0x60] sm:$0xf] }
  0x1e   : > { %v366_v2 = vrot.slane %v364_v59, 4  ;;  %v377_v3 = vshrl.u32 %v271_v53, 16  ;;  %v438_v5 = vrot.slane %v436_v55, 4  ;;  %v441_v8 = vrot.slane %v439_v56, 5  ;;  %v284_v43 = vld [vmem:[%s5718_s19 + $0x50] sm:$0x1] }
  0x1f   : > { %v369_v7 = vrot.slane %v367_v62, 5  ;;  %v5758_v9 = vrot.slane %v421_v57, 5  ;;  %v427_v10 = vrot.slane %v425_v58, 4  ;;  %v395_v13 = vrot.slane %v394_v61, 4  ;;  %v286_v50 = vld [vmem:[%s5718_s19 + $0x58] sm:$0xf] }
  0x20   : > { %v379_v11 = vrot.slane %v377_v3, 4  ;;  %v375_v15 = vrot.slane %v373_v63, 5  ;;  %v410_v17 = vsel %vm5729_vm2, %v405_v0, %v409_v1  ;;  %v445_v18 = vshll.u32 %v5754_v4, 16  ;;  %v5795_v1 = vld [vmem:[%s5718_s19 + $0x64] sm:$0xf] }
  0x21   : > { %v370_v14 = vor.u32 %v369_v7, %v366_v2  ;;  %v431_v20 = vshll.u32 %v278_v6, 16  ;;  %v383_v23 = vshll.u32 %v272_v12, 16  ;;  %v442_v24 = vor.u32 %v441_v8, %v438_v5  ;;  %v292_v6 = vld [vmem:[%s5718_s19 + $0x70] sm:$0xf]  ;;  %v281_v7 = vld [vmem:[%s5718_s19 + $0x44] sm:$0x1] }
  0x22   : > { %705 = vrot.lane.b32.xlu1 %v362_v54, %s5665_s20  ;;  %v380_v22 = vor.u32 %v379_v11, %v375_v15  ;;  %v428_v26 = vor.u32 %v427_v10, %v5758_v9  ;;  %v469_v27 = vshll.u32 %v283_v16, 16  ;;  %v473_v28 = vshrl.u32 %v283_v16, 16  ;;  %v291_v12 = vld [vmem:[%s5718_s19 + $0x6c] sm:$0xf]  ;;  %v285_v16 = vld [vmem:[%s5718_s19 + $0x54] sm:$0xf] }
  0x23   : > { %701 = vrot.lane.b32.xlu0 %v338_v60, %s5665_s20  ;;  %v371_v21 = vrot.slane %v370_v14, 4  ;;  %v400_v29 = vsel %vm5729_vm2, %v395_v13, %v5736_v36  ;;  %v460_v31 = vshrl.u32 %v282_v19, 16  ;;  %v463_v32 = vshll.u32 %v282_v19, 16 }
  0x24   : > { %v5775_v34 = vrot.slane %v445_v18, 5  ;;  %v433_v35 = vrot.slane %v431_v20, 5  ;;  %v381_v37 = vrot.slane %v380_v22, 4  ;;  %v385_v38 = vrot.slane %v383_v23, 5 }
  0x25   : > { %v376_v30 = vsel %vm5729_vm2, %v371_v21, %v375_v15  ;;  %v443_v36 = vrot.slane %v442_v24, 4  ;;  %v429_v40 = vrot.slane %v428_v26, 4  ;;  %v5779_v41 = vrot.slane %v469_v27, 5  ;;  %v287_v15 = vld [vmem:[%s5718_s19 + $0x5c] sm:$0x1] }
  0x26   : > { %707 = vrot.lane.b32.xlu2 %v376_v30, %s5665_s20  ;;  %v475_v42 = vrot.slane %v473_v28, 4  ;;  %v462_v44 = vrot.slane %v460_v31, 4  ;;  %v465_v45 = vrot.slane %v463_v32, 5  ;;  %v412_v46 = vshrl.u32 %v276_v33, 16  ;;  %v293_v32 = vld [vmem:[%s5718_s19 + $0x74] sm:$0x1] }
  0x27   : > { %v415_v47 = vshll.u32 %v276_v33, 16  ;;  %v508_v48 = vshrl.u32 %v288_v39, 16  ;;  %v511_v49 = vshll.u32 %v288_v39, 16  ;;  %v449_v51 = vshrl.u32 %v5754_v4, 16 }
  0x28   : > { %v386_v52 = vsel %vm5729_vm2, %v381_v37, %v385_v38  ;;  %v414_v53 = vrot.slane %v412_v46, 4  ;;  %v448_v55 = vsel %vm5729_vm2, %v443_v36, %v5775_v34  ;;  %v434_v56 = vsel %vm5729_vm2, %v429_v40, %v433_v35 }
  0x29   : > { %v417_v54 = vrot.slane %v415_v47, 5  ;;  %v476_v57 = vor.u32 %v475_v42, %v5779_v41  ;;  %v479_v58 = vshll.u32 %v284_v43, 16  ;;  %v466_v59 = vor.u32 %v465_v45, %v462_v44  ;;  %v297_v43 = vld [vmem:[%s5718_s19 + $0x84] sm:$0xf]  ;;  %v295_v45 = vld [vmem:[%s5718_s19 + $0x7c] sm:$0xf] }
  0x2a   : > { %713 = vrot.lane.b32.xlu1 %v410_v17, %s5665_s20  ;;  %v493_v60 = vshll.u32 %v286_v50, 16  ;;  %v497_v61 = vshrl.u32 %v286_v50, 16  ;;  %v510_v63 = vrot.slane %v508_v48, 4  ;;  %v513_v0 = vrot.slane %v511_v49, 5 }
  0x2b   : > { %711 = vrot.lane.b32.xlu0 %v400_v29, %s5665_s20  ;;  %v418_v62 = vor.u32 %v417_v54, %v414_v53  ;;  %v451_v3 = vrot.slane %v449_v51, 4  ;;  %v477_v4 = vrot.slane %v476_v57, 4  ;;  %v481_v5 = vrot.slane %v479_v58, 5 }
  0x2c   : > { %v467_v8 = vrot.slane %v466_v59, 4  ;;  %v5800_v10 = vrot.slane %v493_v60, 5  ;;  %v499_v11 = vrot.slane %v497_v61, 4  ;;  %v514_v13 = vor.u32 %v513_v0, %v510_v63  ;;  %v301_v59 = vld [vmem:[%s5718_s19 + $0x94] sm:$0xf] }
  0x2d   : > { %v419_v2 = vrot.slane %v418_v62, 4  ;;  %v517_v14 = vshll.u32 %v5795_v1, 16  ;;  %v541_v18 = vshll.u32 %v292_v6, 16  ;;  %v452_v19 = vor.u32 %v451_v3, %v5775_v34  ;;  %v290_v60 = vld [vmem:[%s5718_s19 + $0x68] sm:$0x1] }
  0x2e   : > { %709 = vrot.lane.b32.xlu2 %v386_v52, %s5665_s20  ;;  %v455_v20 = vshll.u32 %v281_v7, 16  ;;  %v482_v21 = vsel %vm5729_vm2, %v477_v4, %v481_v5  ;;  %v545_v22 = vshrl.u32 %v292_v6, 16  ;;  %v532_v23 = vshrl.u32 %v291_v12, 16  ;;  %v298_v3 = vld [vmem:[%s5718_s19 + $0x88] sm:$0xf] }
  0x2f   : > { %v424_v17 = vsel %vm5729_vm2, %v419_v2, %v5758_v9  ;;  %v535_v24 = vshll.u32 %v291_v12, 16  ;;  %v472_v26 = vsel %vm5729_vm2, %v467_v8, %v5779_v41  ;;  %v500_v27 = vor.u32 %v499_v11, %v5800_v10  ;;  %v294_v2 = vld [vmem:[%s5718_s19 + $0x78] sm:$0xf]  ;;  %v296_v4 = vld [vmem:[%s5718_s19 + $0x80] sm:$0x1] }
  0x30   : > { %v503_v28 = vshll.u32 %v287_v15, 16  ;;  %v484_v29 = vshrl.u32 %v285_v16, 16  ;;  %v515_v9 = vrot.slane %v514_v13, 4  ;;  %v5816_v30 = vrot.slane %v517_v14, 5  ;;  %v300_v11 = vld [vmem:[%s5718_s19 + $0x90] sm:$0xf] }
  0x31   : > { %v487_v31 = vshll.u32 %v285_v16, 16  ;;  %v5821_v33 = vrot.slane %v541_v18, 5  ;;  %v453_v34 = vrot.slane %v452_v19, 4  ;;  %v457_v35 = vrot.slane %v455_v20, 5 }
  0x32   : > { %719 = vrot.lane.b32.xlu1 %v448_v55, %s5665_s20  ;;  %v486_v37 = vrot.slane %v484_v29, 4  ;;  %v547_v38 = vrot.slane %v545_v22, 4  ;;  %v534_v39 = vrot.slane %v532_v23, 4  ;;  %v537_v36 = vrot.slane %v535_v24, 5 }
  0x33   : > { %717 = vrot.lane.b32.xlu0 %v434_v56, %s5665_s20  ;;  %v489_v40 = vrot.slane %v487_v31, 5  ;;  %v501_v41 = vrot.slane %v500_v27, 4  ;;  %v505_v42 = vrot.slane %v503_v28, 5  ;;  %v551_v44 = vshll.u32 %v293_v32, 16  ;;  %v302_v27 = vld [vmem:[%s5718_s19 + $0x98] sm:$0x1] }
  0x34   : > { %v520_v46 = vsel %vm5729_vm2, %v515_v9, %v5816_v30  ;;  %v521_v47 = vshrl.u32 %v5795_v1, 16  ;;  %v458_v48 = vsel %vm5729_vm2, %v453_v34, %v457_v35  ;;  %v548_v50 = vor.u32 %v547_v38, %v5821_v33  ;;  %v306_v38 = vld [vmem:[%s5718_s19 + $0xa8] sm:$0xf] }
  0x35   : > { %v490_v49 = vor.u32 %v489_v40, %v486_v37  ;;  %v538_v51 = vor.u32 %v537_v36, %v534_v39  ;;  %v580_v52 = vshrl.u32 %v297_v43, 16  ;;  %v583_v53 = vshll.u32 %v297_v43, 16  ;;  %v304_v40 = vld [vmem:[%s5718_s19 + $0xa0] sm:$0xf] }
  0x36   : > { %715 = vrot.lane.b32.xlu2 %v424_v17, %s5665_s20  ;;  %v506_v54 = vsel %vm5729_vm2, %v501_v41, %v505_v42  ;;  %v565_v55 = vshll.u32 %v295_v45, 16  ;;  %v569_v56 = vshrl.u32 %v295_v45, 16  ;;  %v553_v57 = vrot.slane %v551_v44, 5 }
  0x37   : > { %v491_v58 = vrot.slane %v490_v49, 4  ;;  %v523_v61 = vrot.slane %v521_v47, 4  ;;  %v549_v62 = vrot.slane %v548_v50, 4  ;;  %v539_v63 = vrot.slane %v538_v51, 4 }
  0x38   : > { %v582_v0 = vrot.slane %v580_v52, 4  ;;  %v585_v1 = vrot.slane %v583_v53, 5  ;;  %v5843_v5 = vrot.slane %v565_v55, 5  ;;  %v571_v6 = vrot.slane %v569_v56, 4  ;;  %v307_v53 = vld [vmem:[%s5718_s19 + $0xac] sm:$0xf] }
  0x39   : > { %v613_v7 = vshll.u32 %v301_v59, 16  ;;  %v617_v8 = vshrl.u32 %v301_v59, 16  ;;  %v527_v12 = vshll.u32 %v290_v60, 16  ;;  %v496_v13 = vsel %vm5729_vm2, %v491_v58, %v5800_v10  ;;  %v299_v55 = vld [vmem:[%s5718_s19 + $0x8c] sm:$0x1] }
  0x3a   : > { %725 = vrot.lane.b32.xlu1 %v482_v21, %s5665_s20  ;;  %v524_v14 = vor.u32 %v523_v61, %v5816_v30  ;;  %v556_v15 = vshrl.u32 %v294_v2, 16  ;;  %v559_v16 = vshll.u32 %v294_v2, 16  ;;  %v554_v17 = vsel %vm5729_vm2, %v549_v62, %v553_v57  ;;  %v305_v59 = vld [vmem:[%s5718_s19 + $0xa4] sm:$0x1]  ;;  %v303_v60 = vld [vmem:[%s5718_s19 + $0x9c] sm:$0xf] }
  0x3b   : > { %723 = vrot.lane.b32.xlu0 %v472_v26, %s5665_s20  ;;  %v544_v18 = vsel %vm5729_vm2, %v539_v63, %v5821_v33  ;;  %v586_v19 = vor.u32 %v585_v1, %v582_v0  ;;  %v589_v20 = vshll.u32 %v298_v3, 16  ;;  %v572_v21 = vor.u32 %v571_v6, %v5843_v5  ;;  %v310_v0 = vld [vmem:[%s5718_s19 + $0xb8] sm:$0xf] }
  0x3c   : > { %v575_v22 = vshll.u32 %v296_v4, 16  ;;  %v604_v23 = vshrl.u32 %v300_v11, 16  ;;  %v607_v24 = vshll.u32 %v300_v11, 16  ;;  %v5857_v10 = vrot.slane %v613_v7, 5 }
  0x3d   : > { %v619_v26 = vrot.slane %v617_v8, 4  ;;  %v525_v28 = vrot.slane %v524_v14, 4  ;;  %v529_v29 = vrot.slane %v527_v12, 5  ;;  %v558_v9 = vrot.slane %v556_v15, 4 }
  0x3e   : > { %721 = vrot.lane.b32.xlu2 %v458_v48, %s5665_s20  ;;  %v561_v30 = vrot.slane %v559_v16, 5  ;;  %v587_v31 = vrot.slane %v586_v19, 4  ;;  %v591_v32 = vrot.slane %v589_v20, 5  ;;  %v573_v33 = vrot.slane %v572_v21, 4 }
  0x3f   : > { %v577_v34 = vrot.slane %v575_v22, 5  ;;  %v606_v35 = vrot.slane %v604_v23, 4  ;;  %v609_v37 = vrot.slane %v607_v24, 5  ;;  %v620_v39 = vor.u32 %v619_v26, %v5857_v10 }
  0x40   : > { %v623_v36 = vshll.u32 %v302_v27, 16  ;;  %v593_v41 = vshrl.u32 %v298_v3, 16  ;;  %v530_v42 = vsel %vm5729_vm2, %v525_v28, %v529_v29  ;;  %v562_v43 = vor.u32 %v561_v30, %v558_v9  ;;  %v309_v3 = vld [vmem:[%s5718_s19 + $0xb4] sm:$0xf]  ;;  %v311_v29 = vld [vmem:[%s5718_s19 + $0xbc] sm:$0x1] }
  0x41   : > { %v592_v44 = vsel %vm5729_vm2, %v587_v31, %v591_v32  ;;  %v652_v45 = vshrl.u32 %v306_v38, 16  ;;  %v578_v47 = vsel %vm5729_vm2, %v573_v33, %v577_v34  ;;  %v610_v48 = vor.u32 %v609_v37, %v606_v35 }
  0x42   : > { %731 = vrot.lane.b32.xlu1 %v520_v46, %s5665_s20  ;;  %v655_v46 = vshll.u32 %v306_v38, 16  ;;  %v637_v49 = vshll.u32 %v304_v40, 16  ;;  %v641_v50 = vshrl.u32 %v304_v40, 16  ;;  %v621_v51 = vrot.slane %v620_v39, 4 }
  0x43   : > { %729 = vrot.lane.b32.xlu0 %v506_v54, %s5665_s20  ;;  %v625_v52 = vrot.slane %v623_v36, 5  ;;  %v563_v54 = vrot.slane %v562_v43, 4  ;;  %v595_v56 = vrot.slane %v593_v41, 4  ;;  %v654_v57 = vrot.slane %v652_v45, 4  ;;  %v308_v43 = vld [vmem:[%s5718_s19 + $0xb0] sm:$0x1] }
  0x44   : > { %v657_v58 = vrot.slane %v655_v46, 5  ;;  %v611_v61 = vrot.slane %v610_v48, 4  ;;  %v5878_v62 = vrot.slane %v637_v49, 5  ;;  %v643_v63 = vrot.slane %v641_v50, 4  ;;  %v829_v45 = vld [vmem:[%s5718_s19 + $0x4] sm:$0xf] }
  0x45   : > { %v626_v1 = vsel %vm5729_vm2, %v621_v51, %v625_v52  ;;  %v661_v2 = vshll.u32 %v307_v53, 16  ;;  %v599_v4 = vshll.u32 %v299_v55, 16  ;;  %v568_v6 = vsel %vm5729_vm2, %v563_v54, %v5843_v5  ;;  %v831_v50 = vld [vmem:[%s5718_s19 + $0xc] sm:$0xe]  ;;  %v830_v54 = vld [vmem:[%s5718_s19 + $0x8] sm:$0x1] }
  0x46   : > { %727 = vrot.lane.b32.xlu2 %v496_v13, %s5665_s20  ;;  %v596_v7 = vor.u32 %v595_v56, %v591_v32  ;;  %v628_v8 = vshrl.u32 %v303_v60, 16  ;;  %v631_v11 = vshll.u32 %v303_v60, 16  ;;  %v658_v12 = vor.u32 %v657_v58, %v654_v57 }
  0x47   : > { %v647_v13 = vshll.u32 %v305_v59, 16  ;;  %v685_v14 = vshll.u32 %v310_v0, 16  ;;  %v689_v15 = vshrl.u32 %v310_v0, 16  ;;  %v616_v16 = vsel %vm5729_vm2, %v611_v61, %v5857_v10  ;;  %v199_v0 = vld [vmem:[%s5718_s19] sm:$0xf] }
  0x48   : > { %v679_v19 = vshll.u32 %v309_v3, 16  ;;  %v597_v5 = vrot.slane %v596_v7, 4  ;;  %v601_v20 = vrot.slane %v599_v4, 5  ;;  %v630_v21 = vrot.slane %v628_v8, 4  ;;  %232 = vst.msk [vmem:[#allocation2] sm:$0xf] %vm231_vm6, %v199_v0 }
  0x49   : > { %v633_v22 = vrot.slane %v631_v11, 5  ;;  %v659_v23 = vrot.slane %v658_v12, 4  ;;  %v663_v24 = vrot.slane %v661_v2, 5  ;;  %v687_v26 = vrot.slane %v685_v14, 5  ;;  %v203_v2 = vld [vmem:[%s5718_s19 + $0x18] sm:$0xf] }
  0x4a   : > { %737 = vrot.lane.b32.xlu1 %v554_v17, %s5665_s20  ;;  %v644_v17 = vor.u32 %v643_v63, %v5878_v62  ;;  %v691_v27 = vrot.slane %v689_v15, 4  ;;  %v649_v28 = vrot.slane %v647_v13, 5  ;;  %v681_v30 = vrot.slane %v679_v19, 5  ;;  %v201_v63 = vld [vmem:[%s5718_s19 + $0xc] sm:$0xf] }
  0x4b   : > { %735 = vrot.lane.b32.xlu0 %v544_v18, %s5665_s20  ;;  %v676_v18 = vshrl.u32 %v309_v3, 16  ;;  %v665_v31 = vshrl.u32 %v307_v53, 16  ;;  %v602_v32 = vsel %vm5729_vm2, %v597_v5, %v601_v20  ;;  %v634_v33 = vor.u32 %v633_v22, %v630_v21  ;;  %v832_v53 = vld [vmem:[%s5718_s19 + $0x10] sm:$0xf]  ;;  %234 = vst.msk [vmem:[#allocation2 + $0x8] sm:$0xf] %vm231_vm6, %v201_v63 }
  0x4c   : > { %v645_v10 = vrot.slane %v644_v17, 4  ;;  %v664_v34 = vsel %vm5729_vm2, %v659_v23, %v663_v24  ;;  %v692_v35 = vor.u32 %v691_v27, %v687_v26  ;;  %v695_v37 = vshll.u32 %v311_v29, 16  ;;  %236 = vst.msk [vmem:[#allocation2 + $0x10] sm:$0xf] %vm231_vm6, %v203_v2  ;;  %v836_v8 = vld [vmem:[%s5718_s19 + $0x20] sm:$0x1] }
  0x4d   : > { %v678_v9 = vrot.slane %v676_v18, 4  ;;  %v635_v36 = vrot.slane %v634_v33, 4  ;;  %v667_v40 = vrot.slane %v665_v31, 4  ;;  %v671_v48 = vshll.u32 %v308_v43, 16  ;;  %v834_v11 = vld [vmem:[%s5718_s19 + $0x18] sm:$0xe] }
  0x4e   : > { %733 = vrot.lane.b32.xlu2 %v530_v42, %s5665_s20  ;;  %v650_v38 = vsel %vm5729_vm2, %v645_v10, %v649_v28  ;;  %v693_v41 = vrot.slane %v692_v35, 4  ;;  %v697_v42 = vrot.slane %v695_v37, 5  ;;  %v929_v51 = vrot.slane %v829_v45, 5  ;;  %v202_v17 = vld [vmem:[%s5718_s19 + $0x10] sm:$0xf] }
  0x4f   : > { %v682_v39 = vor.u32 %v681_v30, %v678_v9  ;;  %v640_v46 = vsel %vm5729_vm2, %v635_v36, %v5878_v62  ;;  %v4822_v55 = vrot.slane %v831_v50, 9  ;;  %v673_v57 = vrot.slane %v671_v48, 5  ;;  %v835_v62 = vld [vmem:[%s5718_s19 + $0x1c] sm:$0xf]  ;;  %v200_v18 = vld [vmem:[%s5718_s19 + $0x4] sm:$0xf] }
  0x50   : > { %v698_v49 = vsel %vm5729_vm2, %v693_v41, %v697_v42  ;;  %v936_v59 = vrot.slane %v832_v53, 5  ;;  %v931_v60 = vrot.slane %v929_v51, 4  ;;  %v932_v61 = vrot.slane %v830_v54, 5  ;;  %235 = vst.msk [vmem:[#allocation2 + $0xc] sm:$0xf] %vm231_vm6, %v202_v17 }
  0x51   : > { %v943_v4 = vrot.slane %v835_v62, 5  ;;  %v946_v14 = vrot.slane %v836_v8, 5  ;;  %v4823_v15 = vrot.slane %v834_v11, 9  ;;  %233 = vst.msk [vmem:[#allocation2 + $0x4] sm:$0xf] %vm231_vm6, %v200_v18 }
  0x52   : > { %743 = vrot.lane.b32.xlu1 %v592_v44, %s5665_s20  ;;  %v683_v44 = vrot.slane %v682_v39, 4  ;;  %v937_v3 = vsel %vm5919_vm5, %v4822_v55, %v936_v59  ;;  %v933_v7 = vsel %vm5919_vm5, %v931_v60, %v932_v61  ;;  %v204_v5 = vld [vmem:[%s5718_s19 + $0x1c] sm:$0xf]  ;;  %v833_v22 = vld [vmem:[%s5718_s19 + $0x14] sm:$0x1]  ;;  %v938_v10 = vrot.slane %v936_v59, 4 }
  0x53   : > { %741 = vrot.lane.b32.xlu0 %v578_v47, %s5665_s20  ;;  %v668_v47 = vor.u32 %v667_v40, %v663_v24  ;;  %v945_v13 = vrot.slane %v943_v4, 4  ;;  %237 = vst.msk [vmem:[#allocation2 + $0x14] sm:$0xf] %vm231_vm6, %v204_v5  ;;  %v944_v23 = vsel %vm5919_vm5, %v4823_v15, %v943_v4  ;;  %v840_v24 = vld [vmem:[%s5718_s19 + $0x30] sm:$0xe]  ;;  %v939_v28 = vrot.slane %v833_v22, 5 }
  0x54   : > { %v688_v52 = vsel %vm5729_vm2, %v683_v44, %v687_v26  ;;  %v841_v26 = vld [vmem:[%s5718_s19 + $0x34] sm:$0xf]  ;;  %v839_v27 = vld [vmem:[%s5718_s19 + $0x2c] sm:$0x1]  ;;  %v4825_v29 = vrot.slane %v840_v24, 9 }
  0x55   : > { %v669_v56 = vrot.slane %v668_v47, 4  ;;  %v947_v20 = vsel %vm5919_vm5, %v945_v13, %v946_v14  ;;  %v957_v9 = vrot.slane %v841_v26, 5  ;;  %v953_v31 = vrot.slane %v839_v27, 5  ;;  %v206_v33 = vld [vmem:[%s5718_s19 + $0x28] sm:$0xf] }
  0x56   : > { %739 = vrot.lane.b32.xlu2 %v568_v6, %s5665_s20  ;;  %v828_v6 = vld [vmem:[%s5718_s19] sm:$0xe]  ;;  %239 = vst.msk [vmem:[#allocation2 + $0x1c] sm:$0xf] %vm231_vm6, %v206_v33  ;;  %v940_v35 = vsel %vm5919_vm5, %v938_v10, %v939_v28  ;;  %v207_v37 = vld [vmem:[%s5718_s19 + $0x30] sm:$0xf] }
  0x57   : > { %v4821_v12 = vrot.slane %v828_v6, 9  ;;  %v837_v36 = vld [vmem:[%s5718_s19 + $0x24] sm:$0xe]  ;;  %240 = vst.msk [vmem:[#allocation2 + $0x20] sm:$0xf] %vm231_vm6, %v207_v37  ;;  %v959_v61 = vrot.slane %v957_v9, 4 }
  0x58   : > { %v845_v41 = vld [vmem:[%s5718_s19 + $0x44] sm:$0x1]  ;;  %v843_v42 = vld [vmem:[%s5718_s19 + $0x3c] sm:$0xe]  ;;  %v4824_v43 = vrot.slane %v837_v36, 9 }
  0x59   : > { %v930_v19 = vsel %vm5919_vm5, %v4821_v12, %v929_v51  ;;  %v967_v45 = vrot.slane %v845_v41, 5  ;;  %v5982_v48 = vld [vmem:[%s5718_s19 + $0x4c] sm:$0xf]  ;;  %v208_v50 = vld [vmem:[%s5718_s19 + $0x34] sm:$0xf] }
  0x5a   : > { %749 = vrot.lane.b32.xlu1 %v626_v1, %s5665_s20  ;;  %v674_v1 = vsel %vm5729_vm2, %v669_v56, %v673_v57  ;;  %241 = vst.msk [vmem:[#allocation2 + $0x24] sm:$0xf] %vm231_vm6, %v208_v50  ;;  %v971_v54 = vrot.slane %v5982_v48, 5  ;;  %v842_v55 = vld [vmem:[%s5718_s19 + $0x38] sm:$0x1] }
  0x5b   : > { %747 = vrot.lane.b32.xlu0 %v616_v16, %s5665_s20  ;;  %v838_v16 = vld [vmem:[%s5718_s19 + $0x28] sm:$0xf]  ;;  %v849_v57 = vld [vmem:[%s5718_s19 + $0x54] sm:$0xe]  ;;  %v850_v59 = vld [vmem:[%s5718_s19 + $0x58] sm:$0xf] }
  0x5c   : > { %v950_v21 = vrot.slane %v838_v16, 5  ;;  %v848_v60 = vld [vmem:[%s5718_s19 + $0x50] sm:$0x1]  ;;  %v960_v62 = vrot.slane %v842_v55, 5  ;;  %v4828_v63 = vrot.slane %v849_v57, 9  ;;  %v978_v0 = vrot.slane %v850_v59, 5 }
  0x5d   : > { %v974_v2 = vrot.slane %v848_v60, 5  ;;  %v853_v6 = vld [vmem:[%s5718_s19 + $0x64] sm:$0xf]  ;;  %v211_v11 = vld [vmem:[%s5718_s19 + $0x48] sm:$0xf] }
  0x5e   : > { %745 = vrot.lane.b32.xlu2 %v602_v32, %s5665_s20  ;;  %v952_v30 = vrot.slane %v950_v21, 4  ;;  %v844_v32 = vld [vmem:[%s5718_s19 + $0x40] sm:$0xf]  ;;  %v951_v51 = vsel %vm5919_vm5, %v4824_v43, %v950_v21  ;;  %v961_v12 = vsel %vm5919_vm5, %v959_v61, %v960_v62  ;;  %v213_v13 = vld [vmem:[%s5718_s19 + $0x54] sm:$0xf]  ;;  %v979_v14 = vsel %vm5919_vm5, %v4828_v63, %v978_v0 }
  0x5f   : > { %v964_v39 = vrot.slane %v844_v32, 5  ;;  %v985_v15 = vrot.slane %v853_v6, 5  ;;  %v846_v16 = vld [vmem:[%s5718_s19 + $0x48] sm:$0xe]  ;;  %v854_v18 = vld [vmem:[%s5718_s19 + $0x68] sm:$0x1] }
  0x60   : > { %v954_v40 = vsel %vm5919_vm5, %v952_v30, %v953_v31  ;;  %244 = vst.msk [vmem:[#allocation2 + $0x30] sm:$0xf] %vm231_vm6, %v211_v11  ;;  %v4827_v5 = vrot.slane %v846_v16, 9  ;;  %v988_v21 = vrot.slane %v854_v18, 5  ;;  %v6029_v26 = vld [vmem:[%s5718_s19 + $0x70] sm:$0xf] }
  0x61   : > { %v966_v44 = vrot.slane %v964_v39, 4  ;;  %246 = vst.msk [vmem:[#allocation2 + $0x38] sm:$0xf] %vm231_vm6, %v213_v13  ;;  %v215_v27 = vld [vmem:[%s5718_s19 + $0x60] sm:$0xf]  ;;  %v992_v32 = vrot.slane %v6029_v26, 5 }
  0x62   : > { %755 = vrot.lane.b32.xlu1 %v664_v34, %s5665_s20  ;;  %v205_v34 = vld [vmem:[%s5718_s19 + $0x24] sm:$0xf]  ;;  %v214_v28 = vld [vmem:[%s5718_s19 + $0x58] sm:$0xf]  ;;  %v851_v33 = vld [vmem:[%s5718_s19 + $0x5c] sm:$0x1] }
  0x63   : > { %753 = vrot.lane.b32.xlu0 %v650_v38, %s5665_s20  ;;  %238 = vst.msk [vmem:[#allocation2 + $0x18] sm:$0xf] %vm231_vm6, %v205_v34  ;;  %v958_v38 = vsel %vm5919_vm5, %v4825_v29, %v957_v9  ;;  %v968_v53 = vsel %vm5919_vm5, %v966_v44, %v967_v45  ;;  %v858_v29 = vld [vmem:[%s5718_s19 + $0x78] sm:$0xe]  ;;  %v972_v9 = vsel %vm5919_vm5, %v4827_v5, %v971_v54  ;;  %v216_v30 = vld [vmem:[%s5718_s19 + $0x64] sm:$0xf] }
  0x64   : > { %248 = vst.msk [vmem:[#allocation2 + $0x40] sm:$0xf] %vm231_vm6, %v215_v27  ;;  %v857_v37 = vld [vmem:[%s5718_s19 + $0x74] sm:$0x1]  ;;  %v4831_v36 = vrot.slane %v858_v29, 9  ;;  %v994_v41 = vrot.slane %v992_v32, 4 }
  0x65   : > { %247 = vst.msk [vmem:[#allocation2 + $0x3c] sm:$0xf] %vm231_vm6, %v214_v28  ;;  %v862_v45 = vld [vmem:[%s5718_s19 + $0x88] sm:$0xf]  ;;  %v217_v48 = vld [vmem:[%s5718_s19 + $0x6c] sm:$0xf] }
  0x66   : > { %751 = vrot.lane.b32.xlu2 %v640_v46, %s5665_s20  ;;  %v4826_v46 = vrot.slane %v843_v42, 9  ;;  %249 = vst.msk [vmem:[#allocation2 + $0x44] sm:$0xf] %vm231_vm6, %v216_v30  ;;  %v995_v42 = vrot.slane %v857_v37, 5  ;;  %v219_v50 = vld [vmem:[%s5718_s19 + $0x78] sm:$0xf] }
  0x67   : > { %v863_v55 = vld [vmem:[%s5718_s19 + $0x8c] sm:$0x1]  ;;  %250 = vst.msk [vmem:[#allocation2 + $0x48] sm:$0xf] %vm231_vm6, %v217_v48  ;;  %v223_v27 = vld [vmem:[%s5718_s19 + $0x90] sm:$0xf] }
  0x68   : > { %v965_v56 = vsel %vm5919_vm5, %v4826_v46, %v964_v39  ;;  %v981_v39 = vrot.slane %v851_v33, 5  ;;  %v218_v46 = vld [vmem:[%s5718_s19 + $0x70] sm:$0xf]  ;;  %252 = vst.msk [vmem:[#allocation2 + $0x50] sm:$0xf] %vm231_vm6, %v219_v50  ;;  %v1009_v60 = vrot.slane %v863_v55, 5 }
  0x69   : > { %251 = vst.msk [vmem:[#allocation2 + $0x4c] sm:$0xf] %vm231_vm6, %v218_v46  ;;  %v225_v28 = vld [vmem:[%s5718_s19 + $0x9c] sm:$0xf]  ;;  %v864_v30 = vld [vmem:[%s5718_s19 + $0x90] sm:$0xe] }
  0x6a   : > { %761 = vrot.lane.b32.xlu1 %v698_v49, %s5665_s20  ;;  %v209_v49 = vld [vmem:[%s5718_s19 + $0x3c] sm:$0xf]  ;;  %256 = vst.msk [vmem:[#allocation2 + $0x60] sm:$0xf] %vm231_vm6, %v223_v27  ;;  %v870_v33 = vld [vmem:[%s5718_s19 + $0xa8] sm:$0xe] }
  0x6b   : > { %759 = vrot.lane.b32.xlu0 %v688_v52, %s5665_s20  ;;  %242 = vst.msk [vmem:[#allocation2 + $0x28] sm:$0xf] %vm231_vm6, %v209_v49  ;;  %v210_v52 = vld [vmem:[%s5718_s19 + $0x40] sm:$0xf]  ;;  %v875_v50 = vld [vmem:[%s5718_s19 + $0xbc] sm:$0x1] }
  0x6c   : > { %243 = vst.msk [vmem:[#allocation2 + $0x2c] sm:$0xf] %vm231_vm6, %v210_v52  ;;  %v1006_v52 = vrot.slane %v862_v45, 5  ;;  %v228_v45 = vld [vmem:[%s5718_s19 + $0xac] sm:$0xf] }
  0x6d   : > { %258 = vst.msk [vmem:[#allocation2 + $0x68] sm:$0xf] %vm231_vm6, %v225_v28  ;;  %v4849_v27 = vld [vmem:[%s5718_s19 + $0x54] sm:$0xf] }
  0x6e   : > { %757 = vrot.lane.b32.xlu2 %v674_v1, %s5665_s20  ;;  %v973_v1 = vrot.slane %v971_v54, 4  ;;  %v996_v54 = vsel %vm5919_vm5, %v994_v41, %v995_v42  ;;  %v1008_v59 = vrot.slane %v1006_v52, 4  ;;  %v874_v42 = vld [vmem:[%s5718_s19 + $0xb8] sm:$0xf]  ;;  %261 = vst.msk [vmem:[#allocation2 + $0x74] sm:$0xf] %vm231_vm6, %v228_v45 }
  0x70   : > { %v975_v17 = vsel %vm5919_vm5, %v973_v1, %v974_v2  ;;  %v221_v1 = vld [vmem:[%s5718_s19 + $0x84] sm:$0xf] }
  0x71   : > { %254 = vst.msk [vmem:[#allocation2 + $0x58] sm:$0xf] %vm231_vm6, %v221_v1 }
  0x72   : > { %1043 = vrot.lane.b32.xlu1 %v937_v3, %s5666_s21 }
  0x73   : > { %1041 = vrot.lane.b32.xlu0 %v933_v7, %s5666_s21  ;;  %v212_v7 = vld [vmem:[%s5718_s19 + $0x4c] sm:$0xf] }
  0x74   : > { %245 = vst.msk [vmem:[#allocation2 + $0x34] sm:$0xf] %vm231_vm6, %v212_v7  ;;  %v222_v7 = vld [vmem:[%s5718_s19 + $0x88] sm:$0xf] }
  0x75   : > { %255 = vst.msk [vmem:[#allocation2 + $0x5c] sm:$0xf] %vm231_vm6, %v222_v7  ;;  %v4840_v7 = vld [vmem:[%s5718_s19 + $0x1c] sm:$0xf] }
  0x76   : > { %1039 = vrot.lane.b32.xlu2 %v930_v19, %s5666_s21  ;;  %v852_v19 = vld [vmem:[%s5718_s19 + $0x60] sm:$0xe] }
  0x77   : > { %v4829_v22 = vrot.slane %v852_v19, 9 }
  0x79   : > { %v986_v34 = vsel %vm5919_vm5, %v4829_v22, %v985_v15 }
  0x7a   : > { %1049 = vrot.lane.b32.xlu1 %v947_v20, %s5666_s21  ;;  %v987_v20 = vrot.slane %v985_v15, 4  ;;  %v866_v15 = vld [vmem:[%s5718_s19 + $0x98] sm:$0x1] }
  0x7b   : > { %1047 = vrot.lane.b32.xlu0 %v944_v23, %s5666_s21 }
  0x7c   : > { %v989_v31 = vsel %vm5919_vm5, %v987_v20, %v988_v21  ;;  %v1016_v20 = vrot.slane %v866_v15, 5  ;;  %v4843_v15 = vld [vmem:[%s5718_s19 + $0x30] sm:$0xf] }
  0x7e   : > { %1045 = vrot.lane.b32.xlu2 %v940_v35, %s5666_s21  ;;  %v6047_v35 = vld [vmem:[%s5718_s19 + $0x7c] sm:$0xf] }
  0x80   : > { %v708_v47 = vpop.permute.xlu2 %707 }
  0x81   : > { %800 = vst.msk [vmem:[#allocation2 + $0x10] sm:$0xf] %vm795_vm7, %v708_v47 }
  0x82   : > { %1055 = vrot.lane.b32.xlu1 %v958_v38, %s5666_s21  ;;  %v980_v38 = vrot.slane %v978_v0, 4  ;;  %v6080_v0 = vld [vmem:[%s5718_s19 + $0x94] sm:$0xf] }
  0x83   : > { %1053 = vrot.lane.b32.xlu0 %v954_v40, %s5666_s21  ;;  %v999_v40 = vrot.slane %v6047_v35, 5  ;;  %v1013_v11 = vrot.slane %v6080_v0, 5 }
  0x84   : > { %v982_v49 = vsel %vm5919_vm5, %v980_v38, %v981_v39 }
  0x85   : > { %v1001_v16 = vrot.slane %v999_v40, 4  ;;  %v1015_v5 = vrot.slane %v1013_v11, 4 }
  0x86   : > { %1051 = vrot.lane.b32.xlu2 %v951_v51, %s5666_s21  ;;  %v1000_v51 = vsel %vm5919_vm5, %v4831_v36, %v999_v40  ;;  %v4835_v36 = vrot.slane %v870_v33, 9  ;;  %v227_v40 = vld [vmem:[%s5718_s19 + $0xa8] sm:$0xf] }
  0x87   : > { %260 = vst.msk [vmem:[#allocation2 + $0x70] sm:$0xf] %vm231_vm6, %v227_v40 }
  0x88   : > { %v710_v3 = vpop.permute.xlu2 %709 }
  0x89   : > { %801 = vst.msk [vmem:[#allocation2 + $0x14] sm:$0xf] %vm795_vm7, %v710_v3  ;;  %v220_v3 = vld [vmem:[%s5718_s19 + $0x7c] sm:$0xf] }
  0x8a   : > { %1061 = vrot.lane.b32.xlu1 %v968_v53, %s5666_s21  ;;  %v855_v53 = vld [vmem:[%s5718_s19 + $0x6c] sm:$0xe]  ;;  %253 = vst.msk [vmem:[#allocation2 + $0x54] sm:$0xf] %vm231_vm6, %v220_v3 }
  0x8b   : > { %1059 = vrot.lane.b32.xlu0 %v965_v56, %s5666_s21  ;;  %v861_v56 = vld [vmem:[%s5718_s19 + $0x84] sm:$0xe]  ;;  %v4830_v57 = vrot.slane %v855_v53, 9 }
  0x8c   : > { %v704_v4 = vpop.permute.xlu1 %703  ;;  %v4832_v61 = vrot.slane %v861_v56, 9  ;;  %v1037_v56 = vrot.slane %v875_v50, 5  ;;  %v4860_v50 = vld [vmem:[%s5718_s19 + $0x94] sm:$0xf] }
  0x8d   : > { %798 = vst.msk [vmem:[#allocation2 + $0x8] sm:$0xf] %vm795_vm7, %v704_v4  ;;  %v700_v8 = vpop.permute.xlu0 %699  ;;  %v867_v4 = vld [vmem:[%s5718_s19 + $0x9c] sm:$0xe]  ;;  %v993_v6 = vsel %vm5919_vm5, %v4830_v57, %v992_v32  ;;  %v872_v32 = vld [vmem:[%s5718_s19 + $0xb0] sm:$0x1] }
  0x8e   : > { %796 = vst.msk [vmem:[#allocation2] sm:$0xf] %vm795_vm7, %v700_v8  ;;  %1057 = vrot.lane.b32.xlu2 %v961_v12, %s5666_s21  ;;  %v1010_v8 = vsel %vm5919_vm5, %v1008_v59, %v1009_v60  ;;  %v860_v12 = vld [vmem:[%s5718_s19 + $0x80] sm:$0x1]  ;;  %v1007_v13 = vsel %vm5919_vm5, %v4832_v61, %v1006_v52  ;;  %v4834_v18 = vrot.slane %v867_v4, 9  ;;  %v1030_v37 = vrot.slane %v872_v32, 5 }
  0x8f   : > { %v230_v57 = vld [vmem:[%s5718_s19 + $0xb8] sm:$0xf]  ;;  %v229_v60 = vld [vmem:[%s5718_s19 + $0xb4] sm:$0xf]  ;;  %v4851_v32 = vld [vmem:[%s5718_s19 + $0x60] sm:$0xf] }
  0x90   : > { %v716_v23 = vpop.permute.xlu2 %715  ;;  %263 = vst.msk [vmem:[#allocation2 + $0x7c] sm:$0xf] %vm231_vm6, %v230_v57 }
  0x91   : > { %804 = vst.msk [vmem:[#allocation2 + $0x20] sm:$0xf] %vm795_vm7, %v716_v23  ;;  %v871_v23 = vld [vmem:[%s5718_s19 + $0xac] sm:$0xf] }
  0x92   : > { %1067 = vrot.lane.b32.xlu1 %v979_v14, %s5666_s21  ;;  %v868_v14 = vld [vmem:[%s5718_s19 + $0xa0] sm:$0xf]  ;;  %262 = vst.msk [vmem:[#allocation2 + $0x78] sm:$0xf] %vm231_vm6, %v229_v60 }
  0x93   : > { %1065 = vrot.lane.b32.xlu0 %v975_v17, %s5666_s21  ;;  %v1002_v17 = vrot.slane %v860_v12, 5  ;;  %v1020_v19 = vrot.slane %v868_v14, 5  ;;  %v4838_v14 = vld [vmem:[%s5718_s19 + $0x10] sm:$0xf] }
  0x94   : > { %v706_v24 = vpop.permute.xlu1 %705 }
  0x95   : > { %799 = vst.msk [vmem:[#allocation2 + $0xc] sm:$0xf] %vm795_vm7, %v706_v24  ;;  %v702_v10 = vpop.permute.xlu0 %701  ;;  %v224_v24 = vld [vmem:[%s5718_s19 + $0x94] sm:$0xf]  ;;  %v1021_v29 = vsel %vm5919_vm5, %v4834_v18, %v1020_v19 }
  0x96   : > { %797 = vst.msk [vmem:[#allocation2 + $0x4] sm:$0xf] %vm795_vm7, %v702_v10  ;;  %1063 = vrot.lane.b32.xlu2 %v972_v9, %s5666_s21  ;;  %v1003_v10 = vsel %vm5919_vm5, %v1001_v16, %v1002_v17  ;;  %v1027_v9 = vrot.slane %v871_v23, 5  ;;  %v4842_v16 = vld [vmem:[%s5718_s19 + $0x28] sm:$0xf] }
  0x97   : > { %257 = vst.msk [vmem:[#allocation2 + $0x64] sm:$0xf] %vm231_vm6, %v224_v24 }
  0x98   : > { %v722_v43 = vpop.permute.xlu2 %721  ;;  %v1029_v35 = vrot.slane %v1027_v9, 4  ;;  %v1028_v48 = vsel %vm5919_vm5, %v4835_v36, %v1027_v9 }
  0x99   : > { %807 = vst.msk [vmem:[#allocation2 + $0x2c] sm:$0xf] %vm795_vm7, %v722_v43  ;;  %v226_v43 = vld [vmem:[%s5718_s19 + $0xa0] sm:$0xf] }
  0x9a   : > { %1073 = vrot.lane.b32.xlu1 %v989_v31, %s5666_s21  ;;  %v1017_v31 = vsel %vm5919_vm5, %v1015_v5, %v1016_v20  ;;  %v1031_v46 = vsel %vm5919_vm5, %v1029_v35, %v1030_v37  ;;  %259 = vst.msk [vmem:[#allocation2 + $0x6c] sm:$0xf] %vm231_vm6, %v226_v43  ;;  %v4841_v5 = vld [vmem:[%s5718_s19 + $0x24] sm:$0xf]  ;;  %v4846_v20 = vld [vmem:[%s5718_s19 + $0x40] sm:$0xf] }
  0x9b   : > { %1071 = vrot.lane.b32.xlu0 %v986_v34, %s5666_s21  ;;  %v4833_v34 = vrot.slane %v864_v30, 9  ;;  %v4847_v30 = vld [vmem:[%s5718_s19 + $0x48] sm:$0xf]  ;;  %v4850_v37 = vld [vmem:[%s5718_s19 + $0x58] sm:$0xf] }
  0x9c   : > { %v714_v44 = vpop.permute.xlu1 %713  ;;  %v4858_v43 = vld [vmem:[%s5718_s19 + $0x88] sm:$0xf] }
  0x9d   : > { %803 = vst.msk [vmem:[#allocation2 + $0x1c] sm:$0xf] %vm795_vm7, %v714_v44  ;;  %v712_v47 = vpop.permute.xlu0 %711  ;;  %v1014_v44 = vsel %vm5919_vm5, %v4833_v34, %v1013_v11 }
  0x9e   : > { %802 = vst.msk [vmem:[#allocation2 + $0x18] sm:$0xf] %vm795_vm7, %v712_v47  ;;  %1069 = vrot.lane.b32.xlu2 %v982_v49, %s5666_s21  ;;  %v869_v47 = vld [vmem:[%s5718_s19 + $0xa4] sm:$0x1]  ;;  %v1034_v49 = vrot.slane %v874_v42, 5 }
  0x9f   : > { %v1023_v52 = vrot.slane %v869_v47, 5  ;;  %v4853_v42 = vld [vmem:[%s5718_s19 + $0x6c] sm:$0xf] }
  0xa0   : > { %v728_v62 = vpop.permute.xlu2 %727  ;;  %v1036_v55 = vrot.slane %v1034_v49, 4 }
  0xa1   : > { %810 = vst.msk [vmem:[#allocation2 + $0x38] sm:$0xf] %vm795_vm7, %v728_v62  ;;  %v4837_v62 = vld [vmem:[%s5718_s19 + $0xc] sm:$0xf] }
  0xa2   : > { %1079 = vrot.lane.b32.xlu1 %v1000_v51, %s5666_s21  ;;  %v1022_v51 = vrot.slane %v1020_v19, 4  ;;  %v1038_v0 = vsel %vm5919_vm5, %v1036_v55, %v1037_v56 }
  0xa3   : > { %1077 = vrot.lane.b32.xlu0 %v996_v54, %s5666_s21 }
  0xa4   : > { %v720_v63 = vpop.permute.xlu1 %719  ;;  %v1024_v61 = vsel %vm5919_vm5, %v1022_v51, %v1023_v52  ;;  %v4870_v51 = vld [vmem:[%s5718_s19 + $0x10] sm:$0xf] }
  0xa5   : > { %806 = vst.msk [vmem:[#allocation2 + $0x28] sm:$0xf] %vm795_vm7, %v720_v63  ;;  %v718_v2 = vpop.permute.xlu0 %717  ;;  %v873_v63 = vld [vmem:[%s5718_s19 + $0xb4] sm:$0xe]  ;;  %v1423_v56 = vshll.u32 %v4870_v51, 16  ;;  %v1427_v57 = vshrl.u32 %v4870_v51, 16 }
  0xa6   : > { %805 = vst.msk [vmem:[#allocation2 + $0x24] sm:$0xf] %vm795_vm7, %v718_v2  ;;  %1075 = vrot.lane.b32.xlu2 %v993_v6, %s5666_s21  ;;  %v4836_v1 = vrot.slane %v873_v63, 9  ;;  %v4863_v63 = vld [vmem:[%s5718_s19 + $0xa8] sm:$0xf] }
  0xa8   : > { %v734_v21 = vpop.permute.xlu2 %733  ;;  %v1035_v6 = vsel %vm5919_vm5, %v4836_v1, %v1034_v49  ;;  %v4861_v49 = vld [vmem:[%s5718_s19 + $0x9c] sm:$0xf]  ;;  %v1429_v1 = vrot.slane %v1427_v57, 4 }
  0xa9   : > { %813 = vst.msk [vmem:[#allocation2 + $0x44] sm:$0xf] %vm795_vm7, %v734_v21  ;;  %v4845_v21 = vld [vmem:[%s5718_s19 + $0x3c] sm:$0xf] }
  0xaa   : > { %1085 = vrot.lane.b32.xlu1 %v1010_v8, %s5666_s21  ;;  %v4839_v8 = vld [vmem:[%s5718_s19 + $0x18] sm:$0xf] }
  0xab   : > { %1083 = vrot.lane.b32.xlu0 %v1007_v13, %s5666_s21 }
  0xac   : > { %v726_v22 = vpop.permute.xlu1 %725 }
  0xad   : > { %809 = vst.msk [vmem:[#allocation2 + $0x34] sm:$0xf] %vm795_vm7, %v726_v22  ;;  %v724_v26 = vpop.permute.xlu0 %723 }
  0xae   : > { %808 = vst.msk [vmem:[#allocation2 + $0x30] sm:$0xf] %vm795_vm7, %v724_v26  ;;  %1081 = vrot.lane.b32.xlu2 %v1003_v10, %s5666_s21  ;;  %v4844_v26 = vld [vmem:[%s5718_s19 + $0x34] sm:$0xf]  ;;  %v4848_v10 = vld [vmem:[%s5718_s19 + $0x4c] sm:$0xf] }
  0xb0   : > { %v740_v38 = vpop.permute.xlu2 %739 }
  0xb1   : > { %816 = vst.msk [vmem:[#allocation2 + $0x50] sm:$0xf] %vm795_vm7, %v740_v38  ;;  %v4855_v38 = vld [vmem:[%s5718_s19 + $0x78] sm:$0xf] }
  0xb2   : > { %1091 = vrot.lane.b32.xlu1 %v1021_v29, %s5666_s21 }
  0xb3   : > { %1089 = vrot.lane.b32.xlu0 %v1017_v31, %s5666_s21  ;;  %v4852_v31 = vld [vmem:[%s5718_s19 + $0x64] sm:$0xf] }
  0xb4   : > { %v732_v39 = vpop.permute.xlu1 %731 }
  0xb5   : > { %812 = vst.msk [vmem:[#allocation2 + $0x40] sm:$0xf] %vm795_vm7, %v732_v39  ;;  %v730_v41 = vpop.permute.xlu0 %729  ;;  %v4854_v39 = vld [vmem:[%s5718_s19 + $0x70] sm:$0xf] }
  0xb6   : > { %811 = vst.msk [vmem:[#allocation2 + $0x3c] sm:$0xf] %vm795_vm7, %v730_v41  ;;  %1087 = vrot.lane.b32.xlu2 %v1014_v44, %s5666_s21  ;;  %v4857_v44 = vld [vmem:[%s5718_s19 + $0x84] sm:$0xf] }
  0xb8   : > { %v746_v53 = vpop.permute.xlu2 %745 }
  0xb9   : > { %819 = vst.msk [vmem:[#allocation2 + $0x5c] sm:$0xf] %vm795_vm7, %v746_v53  ;;  %v4869_v53 = vld [vmem:[%s5718_s19 + $0xc] sm:$0xf] }
  0xba   : > { %1097 = vrot.lane.b32.xlu1 %v1031_v46, %s5666_s21  ;;  %v1414_v60 = vshrl.u32 %v4869_v53, 16 }
  0xbb   : > { %1095 = vrot.lane.b32.xlu0 %v1028_v48, %s5666_s21  ;;  %v4856_v48 = vld [vmem:[%s5718_s19 + $0x7c] sm:$0xf] }
  0xbc   : > { %v738_v54 = vpop.permute.xlu1 %737 }
  0xbd   : > { %815 = vst.msk [vmem:[#allocation2 + $0x4c] sm:$0xf] %vm795_vm7, %v738_v54  ;;  %v736_v59 = vpop.permute.xlu0 %735 }
  0xbe   : > { %814 = vst.msk [vmem:[#allocation2 + $0x48] sm:$0xf] %vm795_vm7, %v736_v59  ;;  %1093 = vrot.lane.b32.xlu2 %v1024_v61, %s5666_s21  ;;  %v4859_v59 = vld [vmem:[%s5718_s19 + $0x90] sm:$0xf]  ;;  %v1417_v61 = vshll.u32 %v4869_v53, 16 }
  0xbf   : > { %v4880_v53 = vld [vmem:[%s5718_s19 + $0x38] sm:$0x1] }
  0xc0   : > { %v752_v2 = vpop.permute.xlu2 %751 }
  0xc1   : > { %822 = vst.msk [vmem:[#allocation2 + $0x68] sm:$0xf] %vm795_vm7, %v752_v2  ;;  %v1416_v2 = vrot.slane %v1414_v60, 4 }
  0xc2   : > { %1236 = vrot.lane.b32.xlu1 %v4837_v62, %s5667_s22  ;;  %v4864_v62 = vld [vmem:[%s5718_s19 + $0xac] sm:$0xf] }
  0xc3   : > { %1101 = vrot.lane.b32.xlu0 %v1038_v0, %s5666_s21  ;;  %v6245_v0 = vrot.slane %v1423_v56, 5 }
  0xc4   : > { %v744_v3 = vpop.permute.xlu1 %743 }
  0xc5   : > { %818 = vst.msk [vmem:[#allocation2 + $0x58] sm:$0xf] %vm795_vm7, %v744_v3  ;;  %v742_v4 = vpop.permute.xlu0 %741  ;;  %v1419_v3 = vrot.slane %v1417_v61, 5 }
  0xc6   : > { %817 = vst.msk [vmem:[#allocation2 + $0x54] sm:$0xf] %vm795_vm7, %v742_v4  ;;  %1099 = vrot.lane.b32.xlu2 %v1035_v6, %s5666_s21  ;;  %v4871_v6 = vld [vmem:[%s5718_s19 + $0x14] sm:$0x1] }
  0xc8   : > { %v758_v11 = vpop.permute.xlu2 %757 }
  0xc9   : > { %825 = vst.msk [vmem:[#allocation2 + $0x74] sm:$0xf] %vm795_vm7, %v758_v11 }
  0xca   : > { %1242 = vrot.lane.b32.xlu1 %v4840_v7, %s5667_s22 }
  0xcb   : > { %1240 = vrot.lane.b32.xlu0 %v4839_v8, %s5667_s22  ;;  %v4875_v8 = vld [vmem:[%s5718_s19 + $0x24] sm:$0xf] }
  0xcc   : > { %v750_v12 = vpop.permute.xlu1 %749 }
  0xcd   : > { %821 = vst.msk [vmem:[#allocation2 + $0x64] sm:$0xf] %vm795_vm7, %v750_v12  ;;  %v748_v13 = vpop.permute.xlu0 %747  ;;  %v1430_v12 = vor.u32 %v1429_v1, %v6245_v0 }
  0xce   : > { %820 = vst.msk [vmem:[#allocation2 + $0x60] sm:$0xf] %vm795_vm7, %v748_v13  ;;  %1238 = vrot.lane.b32.xlu2 %v4838_v14, %s5667_s22  ;;  %v4873_v13 = vld [vmem:[%s5718_s19 + $0x1c] sm:$0xf]  ;;  %v1433_v14 = vshll.u32 %v4871_v6, 16 }
  0xd0   : > { %v1040_v17 = vpop.permute.xlu2 %1039 }
  0xd1   : > { %1136 = vst.msk [vmem:[#allocation2] sm:$0xf] %vm1135_vm8, %v1040_v17  ;;  %v4867_v17 = vld [vmem:[%s5718_s19 + $0xc0] sm:$0xf] }
  0xd2   : > { %1248 = vrot.lane.b32.xlu1 %v4843_v15, %s5667_s22  ;;  %v1420_v15 = vor.u32 %v1419_v3, %v1416_v2  ;;  %v1505_v3 = vshll.u32 %v4880_v53, 16  ;;  %v4889_v53 = vld [vmem:[%s5718_s19 + $0x5c] sm:$0x1] }
  0xd3   : > { %1246 = vrot.lane.b32.xlu0 %v4842_v16, %s5667_s22  ;;  %v4862_v16 = vld [vmem:[%s5718_s19 + $0xa0] sm:$0xf] }
  0xd4   : > { %v756_v18 = vpop.permute.xlu1 %755 }
  0xd5   : > { %824 = vst.msk [vmem:[#allocation2 + $0x70] sm:$0xf] %vm795_vm7, %v756_v18  ;;  %v754_v19 = vpop.permute.xlu0 %753  ;;  %v1462_v18 = vshrl.u32 %v4875_v8, 16 }
  0xd6   : > { %823 = vst.msk [vmem:[#allocation2 + $0x6c] sm:$0xf] %vm795_vm7, %v754_v19  ;;  %1244 = vrot.lane.b32.xlu2 %v4841_v5, %s5667_s22  ;;  %v1465_v19 = vshll.u32 %v4875_v8, 16  ;;  %v4866_v5 = vld [vmem:[%s5718_s19 + $0xb8] sm:$0xf] }
  0xd7   : > { %v4868_v8 = vld [vmem:[%s5718_s19 + $0xc4] sm:$0xf] }
  0xd8   : > { %v1046_v22 = vpop.permute.xlu2 %1045 }
  0xd9   : > { %1139 = vst.msk [vmem:[#allocation2 + $0xc] sm:$0xf] %vm1135_vm8, %v1046_v22  ;;  %v1431_v22 = vrot.slane %v1430_v12, 4 }
  0xda   : > { %1254 = vrot.lane.b32.xlu1 %v4846_v20, %s5667_s22  ;;  %v1447_v20 = vshll.u32 %v4873_v13, 16 }
  0xdb   : > { %1252 = vrot.lane.b32.xlu0 %v4845_v21, %s5667_s22  ;;  %v1451_v21 = vshrl.u32 %v4873_v13, 16 }
  0xdc   : > { %v762_v23 = vpop.permute.xlu1 %761 }
  0xdd   : > { %827 = vst.msk [vmem:[#allocation2 + $0x7c] sm:$0xf] %vm795_vm7, %v762_v23  ;;  %v760_v24 = vpop.permute.xlu0 %759  ;;  %v1435_v23 = vrot.slane %v1433_v14, 5 }
  0xde   : > { %826 = vst.msk [vmem:[#allocation2 + $0x78] sm:$0xf] %vm795_vm7, %v760_v24  ;;  %1250 = vrot.lane.b32.xlu2 %v4844_v26, %s5667_s22  ;;  %v1421_v24 = vrot.slane %v1420_v15, 4  ;;  %v4879_v26 = vld [vmem:[%s5718_s19 + $0x34] sm:$0xf] }
  0xe0   : > { %v1052_v28 = vpop.permute.xlu2 %1051 }
  0xe1   : > { %1142 = vst.msk [vmem:[#allocation2 + $0x18] sm:$0xf] %vm1135_vm8, %v1052_v28  ;;  %v6265_v28 = vld [vmem:[%s5718_s19 + $0x28] sm:$0xf] }
  0xe2   : > { %1260 = vrot.lane.b32.xlu1 %v4849_v27, %s5667_s22  ;;  %v4878_v27 = vld [vmem:[%s5718_s19 + $0x30] sm:$0xf] }
  0xe3   : > { %1258 = vrot.lane.b32.xlu0 %v4848_v10, %s5667_s22 }
  0xe4   : > { %v1044_v29 = vpop.permute.xlu1 %1043 }
  0xe5   : > { %1138 = vst.msk [vmem:[#allocation2 + $0x8] sm:$0xf] %vm1135_vm8, %v1044_v29  ;;  %v1042_v9 = vpop.permute.xlu0 %1041  ;;  %v1464_v29 = vrot.slane %v1462_v18, 4  ;;  %v1507_v18 = vrot.slane %v1505_v3, 5 }
  0xe6   : > { %1137 = vst.msk [vmem:[#allocation2 + $0x4] sm:$0xf] %vm1135_vm8, %v1042_v9  ;;  %1256 = vrot.lane.b32.xlu2 %v4847_v30, %s5667_s22  ;;  %v1467_v9 = vrot.slane %v1465_v19, 5  ;;  %v4872_v30 = vld [vmem:[%s5718_s19 + $0x18] sm:$0xf] }
  0xe8   : > { %v1058_v33 = vpop.permute.xlu2 %1057 }
  0xe9   : > { %1145 = vst.msk [vmem:[#allocation2 + $0x24] sm:$0xf] %vm1135_vm8, %v1058_v33  ;;  %v6270_v33 = vrot.slane %v1447_v20, 5  ;;  %v4888_v20 = vld [vmem:[%s5718_s19 + $0x58] sm:$0xf] }
  0xea   : > { %1266 = vrot.lane.b32.xlu1 %v4852_v31, %s5667_s22 }
  0xeb   : > { %1264 = vrot.lane.b32.xlu0 %v4851_v32, %s5667_s22  ;;  %v4874_v32 = vld [vmem:[%s5718_s19 + $0x20] sm:$0x1] }
  0xec   : > { %v1050_v34 = vpop.permute.xlu1 %1049 }
  0xed   : > { %1141 = vst.msk [vmem:[#allocation2 + $0x14] sm:$0xf] %vm1135_vm8, %v1050_v34  ;;  %v1048_v35 = vpop.permute.xlu0 %1047  ;;  %v1453_v34 = vrot.slane %v1451_v21, 4 }
  0xee   : > { %1140 = vst.msk [vmem:[#allocation2 + $0x10] sm:$0xf] %vm1135_vm8, %v1048_v35  ;;  %1262 = vrot.lane.b32.xlu2 %v4850_v37, %s5667_s22  ;;  %v1495_v37 = vshll.u32 %v4879_v26, 16 }
  0xf0   : > { %v1064_v36 = vpop.permute.xlu2 %1063 }
  0xf1   : > { %1148 = vst.msk [vmem:[#allocation2 + $0x30] sm:$0xf] %vm1135_vm8, %v1064_v36  ;;  %v1489_v36 = vshll.u32 %v4878_v27, 16 }
  0xf2   : > { %1272 = vrot.lane.b32.xlu1 %v4855_v38, %s5667_s22  ;;  %v1499_v38 = vshrl.u32 %v4879_v26, 16 }
  0xf3   : > { %1270 = vrot.lane.b32.xlu0 %v4854_v39, %s5667_s22  ;;  %v1486_v39 = vshrl.u32 %v4878_v27, 16  ;;  %v6310_v27 = vld [vmem:[%s5718_s19 + $0x4c] sm:$0xf] }
  0xf4   : > { %v1056_v40 = vpop.permute.xlu1 %1055 }
  0xf5   : > { %1144 = vst.msk [vmem:[#allocation2 + $0x20] sm:$0xf] %vm1135_vm8, %v1056_v40  ;;  %v1054_v41 = vpop.permute.xlu0 %1053  ;;  %v4865_v40 = vld [vmem:[%s5718_s19 + $0xb4] sm:$0xf]  ;;  %v1488_v51 = vrot.slane %v1486_v39, 4 }
  0xf6   : > { %1143 = vst.msk [vmem:[#allocation2 + $0x1c] sm:$0xf] %vm1135_vm8, %v1054_v41  ;;  %1268 = vrot.lane.b32.xlu2 %v4853_v42, %s5667_s22  ;;  %v1438_v41 = vshrl.u32 %v4872_v30, 16  ;;  %v1441_v42 = vshll.u32 %v4872_v30, 16  ;;  %v4883_v30 = vld [vmem:[%s5718_s19 + $0x44] sm:$0x1] }
  0xf8   : > { %v1070_v45 = vpop.permute.xlu2 %1069  ;;  %v1443_v56 = vrot.slane %v1441_v42, 5 }
  0xf9   : > { %1151 = vst.msk [vmem:[#allocation2 + $0x3c] sm:$0xf] %vm1135_vm8, %v1070_v45  ;;  %v1471_v45 = vshll.u32 %v6265_v28, 16 }
  0xfa   : > { %1278 = vrot.lane.b32.xlu1 %v4858_v43, %s5667_s22  ;;  %v1436_v43 = vsel %vm5729_vm2, %v1431_v22, %v1435_v23  ;;  %v4887_v22 = vld [vmem:[%s5718_s19 + $0x54] sm:$0xf] }
  0xfb   : > { %1276 = vrot.lane.b32.xlu0 %v4857_v44, %s5667_s22  ;;  %v1468_v44 = vor.u32 %v1467_v9, %v1464_v29  ;;  %v4877_v29 = vld [vmem:[%s5718_s19 + $0x2c] sm:$0x1] }
  0xfc   : > { %v1062_v46 = vpop.permute.xlu1 %1061  ;;  %v1481_v42 = vshll.u32 %v4877_v29, 16  ;;  %v4886_v29 = vld [vmem:[%s5718_s19 + $0x50] sm:$0x1] }
  0xfd   : > { %1147 = vst.msk [vmem:[#allocation2 + $0x2c] sm:$0xf] %vm1135_vm8, %v1062_v46  ;;  %v1060_v47 = vpop.permute.xlu0 %1059  ;;  %v1426_v46 = vsel %vm5729_vm2, %v1421_v24, %v6245_v0  ;;  %v1469_v57 = vrot.slane %v1468_v44, 4  ;;  %v4882_v0 = vld [vmem:[%s5718_s19 + $0x40] sm:$0xf] }
  0xfe   : > { %1146 = vst.msk [vmem:[#allocation2 + $0x28] sm:$0xf] %vm1135_vm8, %v1060_v47  ;;  %1274 = vrot.lane.b32.xlu2 %v4856_v48, %s5667_s22  ;;  %v1454_v47 = vor.u32 %v1453_v34, %v6270_v33  ;;  %v1457_v48 = vshll.u32 %v4874_v32, 16  ;;  %v1519_v14 = vshll.u32 %v4882_v0, 16  ;;  %v4881_v24 = vld [vmem:[%s5718_s19 + $0x3c] sm:$0xf] }
  0xff   : > { %v1567_v32 = vshll.u32 %v4888_v20, 16  ;;  %v1513_v39 = vshll.u32 %v4881_v24, 16 }
 0x100   : > { %v1076_v52 = vpop.permute.xlu2 %1075 }
 0x101   : > { %1154 = vst.msk [vmem:[#allocation2 + $0x48] sm:$0xf] %vm1135_vm8, %v1076_v52  ;;  %v1491_v52 = vrot.slane %v1489_v36, 5 }
 0x102   : > { %1284 = vrot.lane.b32.xlu1 %v4861_v49, %s5667_s22  ;;  %v6283_v49 = vrot.slane %v1495_v37, 5  ;;  %v1558_v37 = vshrl.u32 %v4887_v22, 16 }
 0x103   : > { %1282 = vrot.lane.b32.xlu0 %v4860_v50, %s5667_s22  ;;  %v1501_v50 = vrot.slane %v1499_v38, 4  ;;  %v1510_v38 = vshrl.u32 %v4881_v24, 16  ;;  %v4896_v24 = vld [vmem:[%s5718_s19 + $0x78] sm:$0xf] }
 0x104   : > { %v1068_v54 = vpop.permute.xlu1 %1067 }
 0x105   : > { %1150 = vst.msk [vmem:[#allocation2 + $0x38] sm:$0xf] %vm1135_vm8, %v1068_v54  ;;  %v1066_v55 = vpop.permute.xlu0 %1065  ;;  %v4884_v54 = vld [vmem:[%s5718_s19 + $0x48] sm:$0xf]  ;;  %v1502_v2 = vor.u32 %v1501_v50, %v6283_v49 }
 0x106   : > { %1149 = vst.msk [vmem:[#allocation2 + $0x34] sm:$0xf] %vm1135_vm8, %v1066_v55  ;;  %1280 = vrot.lane.b32.xlu2 %v4859_v59, %s5667_s22  ;;  %v1440_v55 = vrot.slane %v1438_v41, 4  ;;  %v6289_v59 = vrot.slane %v1471_v45, 5  ;;  %v1534_v6 = vshrl.u32 %v4884_v54, 16  ;;  %v1537_v13 = vshll.u32 %v4884_v54, 16 }
 0x107   : > { %v1543_v45 = vshll.u32 %v6310_v27, 16  ;;  %v1560_v54 = vrot.slane %v1558_v37, 4 }
 0x108   : > { %v1082_v4 = vpop.permute.xlu2 %1081  ;;  %v1474_v12 = vsel %vm5729_vm2, %v1469_v57, %v6289_v59 }
 0x109   : > { %1157 = vst.msk [vmem:[#allocation2 + $0x54] sm:$0xf] %vm1135_vm8, %v1082_v4  ;;  %v1492_v4 = vor.u32 %v1491_v52, %v1488_v51  ;;  %v1512_v51 = vrot.slane %v1510_v38, 4  ;;  %v1515_v52 = vrot.slane %v1513_v39, 5  ;;  %v4892_v38 = vld [vmem:[%s5718_s19 + $0x68] sm:$0x1] }
 0x10a   : > { %1290 = vrot.lane.b32.xlu1 %v4864_v62, %s5667_s22  ;;  %v1455_v62 = vrot.slane %v1454_v47, 4 }
 0x10b   : > { %1288 = vrot.lane.b32.xlu0 %v4863_v63, %s5667_s22  ;;  %v1459_v63 = vrot.slane %v1457_v48, 5  ;;  %v1493_v19 = vrot.slane %v1492_v4, 4  ;;  %v1529_v48 = vshll.u32 %v4883_v30, 16  ;;  %v1577_v4 = vshll.u32 %v4889_v53, 16  ;;  %v4898_v53 = vld [vmem:[%s5718_s19 + $0x80] sm:$0x1] }
 0x10c   : > { %v1074_v7 = vpop.permute.xlu1 %1073 }
 0x10d   : > { %1153 = vst.msk [vmem:[#allocation2 + $0x44] sm:$0xf] %vm1135_vm8, %v1074_v7  ;;  %v1072_v11 = vpop.permute.xlu0 %1071  ;;  %v1475_v7 = vshrl.u32 %v6265_v28, 16  ;;  %v1460_v15 = vsel %vm5729_vm2, %v1455_v62, %v1459_v63  ;;  %v6312_v28 = vrot.slane %v1519_v14, 5 }
 0x10e   : > { %1152 = vst.msk [vmem:[#allocation2 + $0x40] sm:$0xf] %vm1135_vm8, %v1072_v11  ;;  %1286 = vrot.lane.b32.xlu2 %v4862_v16, %s5667_s22  ;;  %v1444_v11 = vor.u32 %v1443_v56, %v1440_v55  ;;  %v1523_v16 = vshrl.u32 %v4882_v0, 16  ;;  %v1531_v0 = vrot.slane %v1529_v48, 5 }
 0x10f   : > { %v1477_v23 = vrot.slane %v1475_v7, 4  ;;  %v1516_v7 = vor.u32 %v1515_v52, %v1512_v51 }
 0x110   : > { %v1088_v10 = vpop.permute.xlu2 %1087  ;;  %v1445_v21 = vrot.slane %v1444_v11, 4 }
 0x111   : > { %1160 = vst.msk [vmem:[#allocation2 + $0x60] sm:$0xf] %vm1135_vm8, %v1088_v10  ;;  %v1539_v10 = vrot.slane %v1537_v13, 5  ;;  %v1478_v41 = vor.u32 %v1477_v23, %v6289_v59  ;;  %v6336_v59 = vrot.slane %v1543_v45, 5 }
 0x112   : > { %1296 = vrot.lane.b32.xlu1 %v4867_v17, %s5667_s22  ;;  %v1503_v17 = vrot.slane %v1502_v2, 4  ;;  %v1450_v36 = vsel %vm5729_vm2, %v1445_v21, %v6270_v33  ;;  %v6331_v33 = vrot.slane %v1567_v32, 5  ;;  %v1547_v2 = vshrl.u32 %v6310_v27, 16 }
 0x113   : > { %1294 = vrot.lane.b32.xlu0 %v4866_v5, %s5667_s22  ;;  %v1536_v5 = vrot.slane %v1534_v6, 4  ;;  %v1479_v56 = vrot.slane %v1478_v41, 4  ;;  %v4891_v6 = vld [vmem:[%s5718_s19 + $0x64] sm:$0xf] }
 0x114   : > { %v1080_v31 = vpop.permute.xlu1 %1079 }
 0x115   : > { %1156 = vst.msk [vmem:[#allocation2 + $0x50] sm:$0xf] %vm1135_vm8, %v1080_v31  ;;  %v1078_v35 = vpop.permute.xlu0 %1077  ;;  %v1525_v31 = vrot.slane %v1523_v16, 4  ;;  %v1540_v44 = vor.u32 %v1539_v10, %v1536_v5  ;;  %v1591_v16 = vshll.u32 %v4891_v6, 16  ;;  %v1517_v5 = vrot.slane %v1516_v7, 4 }
 0x116   : > { %1155 = vst.msk [vmem:[#allocation2 + $0x4c] sm:$0xf] %vm1135_vm8, %v1078_v35  ;;  %1292 = vrot.lane.b32.xlu2 %v4865_v40, %s5667_s22  ;;  %v1571_v35 = vshrl.u32 %v4888_v20, 16  ;;  %v1561_v40 = vshll.u32 %v4887_v22, 16  ;;  %v4897_v20 = vld [vmem:[%s5718_s19 + $0x7c] sm:$0xf] }
 0x117   : > { %v1526_v47 = vor.u32 %v1525_v31, %v6312_v28  ;;  %v1541_v57 = vrot.slane %v1540_v44, 4  ;;  %v6358_v10 = vld [vmem:[%s5718_s19 + $0x70] sm:$0xf]  ;;  %v6363_v31 = vrot.slane %v1591_v16, 5  ;;  %v1522_v39 = vsel %vm5729_vm2, %v1517_v5, %v6312_v28 }
 0x118   : > { %v1094_v60 = vpop.permute.xlu2 %1093  ;;  %v1573_v50 = vrot.slane %v1571_v35, 4  ;;  %v1563_v55 = vrot.slane %v1561_v40, 5  ;;  %v1643_v35 = vshrl.u32 %v4897_v20, 16  ;;  %v1633_v40 = vshll.u32 %v4896_v24, 16 }
 0x119   : > { %1163 = vst.msk [vmem:[#allocation2 + $0x6c] sm:$0xf] %vm1135_vm8, %v1094_v60  ;;  %v1527_v63 = vrot.slane %v1526_v47, 4  ;;  %v1546_v14 = vsel %vm5729_vm2, %v1541_v57, %v6336_v59  ;;  %v1615_v28 = vshll.u32 %v6358_v10, 16  ;;  %v4902_v57 = vld [vmem:[%s5718_s19 + $0x90] sm:$0xf] }
 0x11a   : > { %1799 = vrot.lane.b32.xlu1 %v1436_v43, %s5668_s23  ;;  %v1508_v43 = vsel %vm5729_vm2, %v1503_v17, %v1507_v18  ;;  %v1574_v3 = vor.u32 %v1573_v50, %v6331_v33  ;;  %v1595_v17 = vshrl.u32 %v4891_v6, 16  ;;  %v1601_v50 = vshll.u32 %v4892_v38, 16 }
 0x11b   : > { %1797 = vrot.lane.b32.xlu0 %v1426_v46, %s5668_s23  ;;  %v1498_v46 = vsel %vm5729_vm2, %v1493_v19, %v6283_v49  ;;  %v1483_v49 = vrot.slane %v1481_v42, 5  ;;  %v1579_v19 = vrot.slane %v1577_v4, 5  ;;  %v1553_v42 = vshll.u32 %v4886_v29, 16  ;;  %v6407_v29 = vld [vmem:[%s5718_s19 + $0x94] sm:$0xf] }
 0x11c   : > { %v1086_v61 = vpop.permute.xlu1 %1085  ;;  %v1575_v18 = vrot.slane %v1574_v3, 4  ;;  %v1597_v32 = vrot.slane %v1595_v17, 4  ;;  %v1645_v52 = vrot.slane %v1643_v35, 4  ;;  %v1649_v3 = vshll.u32 %v4898_v53, 16 }
 0x11d   : > { %1159 = vst.msk [vmem:[#allocation2 + $0x5c] sm:$0xf] %vm1135_vm8, %v1086_v61  ;;  %v1084_v1 = vpop.permute.xlu0 %1083  ;;  %v4893_v61 = vld [vmem:[%s5718_s19 + $0x6c] sm:$0xf]  ;;  %v1484_v11 = vsel %vm5729_vm2, %v1479_v56, %v1483_v49  ;;  %v1555_v49 = vrot.slane %v1553_v42, 5  ;;  %v1678_v7 = vshrl.u32 %v4902_v57, 16 }
 0x11e   : > { %1158 = vst.msk [vmem:[#allocation2 + $0x58] sm:$0xf] %vm1135_vm8, %v1084_v1  ;;  %1298 = vrot.lane.b32.xlu2 %v4868_v8, %s5667_s22  ;;  %v1564_v8 = vor.u32 %v1563_v55, %v1560_v54  ;;  %v1609_v13 = vshll.u32 %v4893_v61, 16  ;;  %v1580_v45 = vsel %vm5729_vm2, %v1575_v18, %v1579_v19  ;;  %v1598_v48 = vor.u32 %v1597_v32, %v6363_v31 }
 0x11f   : > { %v1635_v55 = vrot.slane %v1633_v40, 5  ;;  %v1651_v5 = vrot.slane %v1649_v3, 5 }
 0x120   : > { %v1100_v26 = vpop.permute.xlu2 %1099  ;;  %v1565_v21 = vrot.slane %v1564_v8, 4  ;;  %v1611_v23 = vrot.slane %v1609_v13, 5  ;;  %v1681_v8 = vshll.u32 %v4902_v57, 16 }
 0x121   : > { %1166 = vst.msk [vmem:[#allocation2 + $0x78] sm:$0xf] %vm1135_vm8, %v1100_v26  ;;  %v1549_v26 = vrot.slane %v1547_v2, 4 }
 0x122   : > { %1805 = vrot.lane.b32.xlu1 %v1474_v12, %s5668_s23  ;;  %v1606_v12 = vshrl.u32 %v4893_v61, 16  ;;  %v6386_v61 = vrot.slane %v1615_v28, 5 }
 0x123   : > { %1803 = vrot.lane.b32.xlu0 %v1460_v15, %s5668_s23  ;;  %v1532_v15 = vsel %vm5729_vm2, %v1527_v63, %v1531_v0  ;;  %v1550_v41 = vor.u32 %v1549_v26, %v6336_v59  ;;  %v1599_v0 = vrot.slane %v1598_v48, 4 }
 0x124   : > { %v1092_v9 = vpop.permute.xlu1 %1091  ;;  %v1608_v22 = vrot.slane %v1606_v12, 4  ;;  %v1619_v12 = vshrl.u32 %v6358_v10, 16 }
 0x125   : > { %1162 = vst.msk [vmem:[#allocation2 + $0x68] sm:$0xf] %vm1135_vm8, %v1092_v9  ;;  %v1090_v34 = vpop.permute.xlu0 %1089  ;;  %v4890_v9 = vld [vmem:[%s5718_s19 + $0x60] sm:$0xf]  ;;  %v1551_v56 = vrot.slane %v1550_v41, 4 }
 0x126   : > { %1161 = vst.msk [vmem:[#allocation2 + $0x64] sm:$0xf] %vm1135_vm8, %v1090_v34  ;;  %1801 = vrot.lane.b32.xlu2 %v1450_v36, %s5668_s23  ;;  %v1639_v34 = vshll.u32 %v4897_v20, 16  ;;  %v1630_v36 = vshrl.u32 %v4896_v24, 16  ;;  %v1585_v44 = vshll.u32 %v4890_v9, 16  ;;  %v1612_v47 = vor.u32 %v1611_v23, %v1608_v22 }
 0x127   : > { %v1556_v13 = vsel %vm5729_vm2, %v1551_v56, %v1555_v49  ;;  %v1683_v22 = vrot.slane %v1681_v8, 5  ;;  %v4906_v24 = vld [vmem:[%s5718_s19 + $0xa0] sm:$0xf]  ;;  %v1621_v26 = vrot.slane %v1619_v12, 4  ;;  %v4907_v49 = vld [vmem:[%s5718_s19 + $0xa4] sm:$0x1] }
 0x128   : > { %v1239_v60 = vpop.permute.xlu2 %1238  ;;  %v6379_v51 = vrot.slane %v1639_v34, 5  ;;  %v1632_v54 = vrot.slane %v1630_v36, 4  ;;  %v1587_v59 = vrot.slane %v1585_v44, 5  ;;  %v1715_v36 = vshrl.u32 %v4906_v24, 16 }
 0x129   : > { %1334 = vst.msk [vmem:[#allocation2 + $0x4] sm:$0xf] %vm1332_vm9, %v1239_v60  ;;  %v1613_v60 = vrot.slane %v1612_v47, 4  ;;  %v1622_v44 = vor.u32 %v1621_v26, %v6386_v61  ;;  %v1687_v47 = vshll.u32 %v6407_v29, 16  ;;  %v4918_v26 = vld [vmem:[%s5718_s19 + $0x10] sm:$0xf] }
 0x12a   : > { %1811 = vrot.lane.b32.xlu1 %v1508_v43, %s5668_s23  ;;  %v1582_v43 = vshrl.u32 %v4890_v9, 16  ;;  %v1646_v2 = vor.u32 %v1645_v52, %v6379_v51  ;;  %v1636_v6 = vor.u32 %v1635_v55, %v1632_v54  ;;  %v4901_v9 = vld [vmem:[%s5718_s19 + $0x8c] sm:$0x1] }
 0x12b   : > { %1809 = vrot.lane.b32.xlu0 %v1498_v46, %s5668_s23  ;;  %v1570_v46 = vsel %vm5729_vm2, %v1565_v21, %v6331_v33  ;;  %v1680_v21 = vrot.slane %v1678_v7, 4  ;;  %v1673_v53 = vshll.u32 %v4901_v9, 16  ;;  %v1623_v57 = vrot.slane %v1622_v44, 4  ;;  %v4917_v44 = vld [vmem:[%s5718_s19 + $0xc] sm:$0xe] }
 0x12c   : > { %v1098_v62 = vpop.permute.xlu1 %1097  ;;  %v1584_v33 = vrot.slane %v1582_v43, 4  ;;  %v1647_v17 = vrot.slane %v1646_v2, 4  ;;  %v1637_v20 = vrot.slane %v1636_v6, 4  ;;  %v1691_v7 = vshrl.u32 %v6407_v29, 16 }
 0x12d   : > { %1165 = vst.msk [vmem:[#allocation2 + $0x74] sm:$0xf] %vm1135_vm8, %v1098_v62  ;;  %v1096_v1 = vpop.permute.xlu0 %1095 }
 0x12e   : > { %1164 = vst.msk [vmem:[#allocation2 + $0x70] sm:$0xf] %vm1135_vm8, %v1096_v1  ;;  %1807 = vrot.lane.b32.xlu2 %v1484_v11, %s5668_s23  ;;  %v1603_v1 = vrot.slane %v1601_v50, 5  ;;  %v4900_v11 = vld [vmem:[%s5718_s19 + $0x88] sm:$0xf]  ;;  %v1652_v42 = vsel %vm5729_vm2, %v1647_v17, %v1651_v5  ;;  %v1642_v50 = vsel %vm5729_vm2, %v1637_v20, %v6379_v51 }
 0x12f   : > { %v1663_v18 = vshll.u32 %v4900_v11, 16  ;;  %v1667_v19 = vshrl.u32 %v4900_v11, 16 }
 0x130   : > { %v1245_v27 = vpop.permute.xlu2 %1244  ;;  %v1604_v16 = vsel %vm5729_vm2, %v1599_v0, %v1603_v1  ;;  %v1675_v1 = vrot.slane %v1673_v53, 5 }
 0x131   : > { %1337 = vst.msk [vmem:[#allocation2 + $0x10] sm:$0xf] %vm1332_vm9, %v1245_v27  ;;  %v4899_v27 = vld [vmem:[%s5718_s19 + $0x84] sm:$0xf]  ;;  %v6412_v34 = vrot.slane %v1663_v18, 5  ;;  %v1669_v35 = vrot.slane %v1667_v19, 4 }
 0x132   : > { %1817 = vrot.lane.b32.xlu1 %v1546_v14, %s5668_s23  ;;  %v1588_v14 = vor.u32 %v1587_v59, %v1584_v33  ;;  %v1654_v40 = vshrl.u32 %v4899_v27, 16  ;;  %v1657_v41 = vshll.u32 %v4899_v27, 16  ;;  %v1693_v19 = vrot.slane %v1691_v7, 4  ;;  %v5013_v27 = vld [vmem:[%s5718_s19 + $0x18] sm:$0xf] }
 0x133   : > { %1815 = vrot.lane.b32.xlu0 %v1532_v15, %s5668_s23  ;;  %v1618_v15 = vsel %vm5729_vm2, %v1613_v60, %v6386_v61  ;;  %v1670_v52 = vor.u32 %v1669_v35, %v6412_v34  ;;  %v1689_v60 = vrot.slane %v1687_v47, 5 }
 0x134   : > { %v1237_v30 = vpop.permute.xlu1 %1236  ;;  %v1589_v23 = vrot.slane %v1588_v14, 4  ;;  %v1656_v55 = vrot.slane %v1654_v40, 4  ;;  %v1659_v56 = vrot.slane %v1657_v41, 5  ;;  %v2509_v40 = vshrl.u32 %v5013_v27, 16 }
 0x135   : > { %1333 = vst.msk [vmem:[#allocation2] sm:$0xf] %vm1332_vm9, %v1237_v30  ;;  %v1102_v37 = vpop.permute.xlu0 %1101  ;;  %v4895_v30 = vld [vmem:[%s5718_s19 + $0x74] sm:$0x1]  ;;  %v1671_v0 = vrot.slane %v1670_v52, 4  ;;  %v1694_v35 = vor.u32 %v1693_v19, %v1689_v60  ;;  %v2512_v41 = vshll.u32 %v5013_v27, 16 }
 0x136   : > { %1167 = vst.msk [vmem:[#allocation2 + $0x7c] sm:$0xf] %vm1135_vm8, %v1102_v37  ;;  %1813 = vrot.lane.b32.xlu2 %v1522_v39, %s5668_s23  ;;  %v4905_v37 = vld [vmem:[%s5718_s19 + $0x9c] sm:$0xf]  ;;  %v1711_v39 = vshll.u32 %v4906_v24, 16  ;;  %v1594_v43 = vsel %vm5729_vm2, %v1589_v23, %v6363_v31  ;;  %v1717_v31 = vrot.slane %v1715_v36, 4  ;;  %v1660_v6 = vor.u32 %v1659_v56, %v1656_v55 }
 0x137   : > { %v1702_v28 = vshrl.u32 %v4905_v37, 16  ;;  %v1705_v48 = vshll.u32 %v4905_v37, 16  ;;  %v1676_v14 = vsel %vm5729_vm2, %v1671_v0, %v1675_v1  ;;  %v2024_v36 = vrot.slane %v4918_v26, 5  ;;  %v5014_v56 = vld [vmem:[%s5718_s19 + $0x1c] sm:$0xf] }
 0x138   : > { %v1251_v62 = vpop.permute.xlu2 %1250  ;;  %v6429_v54 = vrot.slane %v1711_v39, 5  ;;  %v1661_v17 = vrot.slane %v1660_v6, 4  ;;  %v2511_v53 = vrot.slane %v2509_v40, 4  ;;  %v2522_v6 = vshrl.u32 %v5014_v56, 16  ;;  %v4981_v26 = vld [vmem:[%s5718_s19 + $0x18] sm:$0xf] }
 0x139   : > { %1340 = vst.msk [vmem:[#allocation2 + $0x1c] sm:$0xf] %vm1332_vm9, %v1251_v62  ;;  %v1704_v61 = vrot.slane %v1702_v28, 4  ;;  %v1707_v62 = vrot.slane %v1705_v48, 5  ;;  %v2026_v48 = vrot.slane %v2024_v36, 4 }
 0x13a   : > { %1823 = vrot.lane.b32.xlu1 %v1580_v45, %s5668_s23  ;;  %v1625_v45 = vshll.u32 %v4895_v30, 16  ;;  %v1718_v3 = vor.u32 %v1717_v31, %v6429_v54  ;;  %v1666_v9 = vsel %vm5729_vm2, %v1661_v17, %v6412_v34  ;;  %v2514_v31 = vrot.slane %v2512_v41, 5 }
 0x13b   : > { %1821 = vrot.lane.b32.xlu0 %v1570_v46, %s5668_s23  ;;  %v1684_v46 = vor.u32 %v1683_v22, %v1680_v21  ;;  %v1708_v12 = vor.u32 %v1707_v62, %v1704_v61  ;;  %v4904_v21 = vld [vmem:[%s5718_s19 + $0x98] sm:$0x1]  ;;  %v4908_v22 = vld [vmem:[%s5718_s19 + $0xa8] sm:$0xf] }
 0x13c   : > { %v1243_v63 = vpop.permute.xlu1 %1242  ;;  %v1627_v33 = vrot.slane %v1625_v45, 5  ;;  %v1697_v37 = vshll.u32 %v4904_v21, 16  ;;  %v1729_v39 = vshll.u32 %v4908_v22, 16  ;;  %v1695_v45 = vrot.slane %v1694_v35, 4  ;;  %v4921_v21 = vld [vmem:[%s5718_s19 + $0x1c] sm:$0xf] }
 0x13d   : > { %1336 = vst.msk [vmem:[#allocation2 + $0xc] sm:$0xf] %vm1332_vm9, %v1243_v63  ;;  %v1241_v4 = vpop.permute.xlu0 %1240  ;;  %v1685_v59 = vrot.slane %v1684_v46, 4  ;;  %v1709_v5 = vrot.slane %v1708_v12, 4  ;;  %v4982_v12 = vld [vmem:[%s5718_s19 + $0x1c] sm:$0xf] }
 0x13e   : > { %1335 = vst.msk [vmem:[#allocation2 + $0x8] sm:$0xf] %vm1332_vm9, %v1241_v4  ;;  %1819 = vrot.lane.b32.xlu2 %v1556_v13, %s5668_s23  ;;  %v1721_v4 = vshll.u32 %v4907_v49, 16  ;;  %v1628_v8 = vsel %vm5729_vm2, %v1623_v57, %v1627_v33  ;;  %v4909_v13 = vld [vmem:[%s5718_s19 + $0xac] sm:$0xf]  ;;  %v1699_v46 = vrot.slane %v1697_v37, 5 }
 0x13f   : > { %v1690_v11 = vsel %vm5729_vm2, %v1685_v59, %v1689_v60  ;;  %v1735_v18 = vshll.u32 %v4909_v13, 16  ;;  %v1739_v23 = vshrl.u32 %v4909_v13, 16  ;;  %v1714_v34 = vsel %vm5729_vm2, %v1709_v5, %v6429_v54  ;;  %v5063_v13 = vld [vmem:[%s5718_s19 + $0x20] sm:$0x1] }
 0x140   : > { %v1257_v10 = vpop.permute.xlu2 %1256  ;;  %v1731_v28 = vrot.slane %v1729_v39, 5  ;;  %v4965_v54 = vrot.slane %v4917_v44, 9  ;;  %v1700_v57 = vsel %vm5729_vm2, %v1695_v45, %v1699_v46  ;;  %v2515_v60 = vor.u32 %v2514_v31, %v2511_v53  ;;  %v5015_v5 = vld [vmem:[%s5718_s19 + $0x20] sm:$0x1] }
 0x141   : > { %1343 = vst.msk [vmem:[#allocation2 + $0x28] sm:$0xf] %vm1332_vm9, %v1257_v10  ;;  %v6460_v30 = vrot.slane %v1735_v18, 5  ;;  %v3122_v17 = vrot.slane %v5063_v13, 5  ;;  %v4922_v39 = vld [vmem:[%s5718_s19 + $0x20] sm:$0x1] }
 0x142   : > { %1829 = vrot.lane.b32.xlu1 %v1618_v15, %s5668_s23  ;;  %v1719_v15 = vrot.slane %v1718_v3, 4  ;;  %v2025_v61 = vsel %vm5919_vm5, %v4965_v54, %v2024_v36  ;;  %v5062_v3 = vld [vmem:[%s5718_s19 + $0x1c] sm:$0xf]  ;;  %v2034_v44 = vrot.slane %v4922_v39, 5 }
 0x143   : > { %1827 = vrot.lane.b32.xlu0 %v1604_v16, %s5668_s23  ;;  %v1723_v16 = vrot.slane %v1721_v4, 5 }
 0x144   : > { %v1249_v32 = vpop.permute.xlu1 %1248 }
 0x145   : > { %1339 = vst.msk [vmem:[#allocation2 + $0x18] sm:$0xf] %vm1332_vm9, %v1249_v32  ;;  %v1247_v38 = vpop.permute.xlu0 %1246  ;;  %v1724_v29 = vsel %vm5729_vm2, %v1719_v15, %v1723_v16  ;;  %v6462_v32 = vrot.slane %v1739_v23, 4  ;;  %v2524_v15 = vrot.slane %v2522_v6, 4  ;;  %v4953_v6 = vld [vmem:[%s5718_s19 + $0x9c] sm:$0xe] }
 0x146   : > { %1338 = vst.msk [vmem:[#allocation2 + $0x14] sm:$0xf] %vm1332_vm9, %v1247_v38  ;;  %1825 = vrot.lane.b32.xlu2 %v1594_v43, %s5668_s23  ;;  %v1726_v38 = vshrl.u32 %v4908_v22, 16  ;;  %v4919_v43 = vld [vmem:[%s5718_s19 + $0x14] sm:$0x1] }
 0x147   : > { %v5017_v22 = vld [vmem:[%s5718_s19 + $0x28] sm:$0xf] }
 0x148   : > { %v1263_v51 = vpop.permute.xlu2 %1262  ;;  %v1728_v47 = vrot.slane %v1726_v38, 4  ;;  %v2542_v35 = vshll.u32 %v5017_v22, 16  ;;  %v2546_v37 = vshrl.u32 %v5017_v22, 16 }
 0x149   : > { %1346 = vst.msk [vmem:[#allocation2 + $0x34] sm:$0xf] %vm1332_vm9, %v1263_v51  ;;  %v2518_v51 = vshll.u32 %v5014_v56, 16 }
 0x14a   : > { %1835 = vrot.lane.b32.xlu1 %v1652_v42, %s5668_s23  ;;  %v1742_v42 = vor.u32 %v6462_v32, %v6460_v30  ;;  %v1732_v33 = vor.u32 %v1731_v28, %v1728_v47  ;;  %v2544_v46 = vrot.slane %v2542_v35, 5  ;;  %v2548_v47 = vrot.slane %v2546_v37, 4  ;;  %v5051_v37 = vld [vmem:[%s5718_s19 + $0xb0] sm:$0x1] }
 0x14b   : > { %1833 = vrot.lane.b32.xlu0 %v1642_v50, %s5668_s23  ;;  %v2027_v50 = vrot.slane %v4919_v43, 5  ;;  %v2520_v0 = vrot.slane %v2518_v51, 5 }
 0x14c   : > { %v1255_v63 = vpop.permute.xlu1 %1254  ;;  %v1733_v62 = vrot.slane %v1732_v33, 4  ;;  %v2549_v54 = vor.u32 %v2548_v47, %v2544_v46  ;;  %v5098_v47 = vld [vmem:[%s5718_s19 + $0xac] sm:$0xf] }
 0x14d   : > { %1342 = vst.msk [vmem:[#allocation2 + $0x24] sm:$0xf] %vm1332_vm9, %v1255_v63  ;;  %v1253_v2 = vpop.permute.xlu0 %1252  ;;  %v2028_v59 = vsel %vm5919_vm5, %v2026_v48, %v2027_v50  ;;  %v2516_v63 = vrot.slane %v2515_v60, 4  ;;  %v2525_v27 = vor.u32 %v2524_v15, %v2520_v0  ;;  %v5018_v48 = vld [vmem:[%s5718_s19 + $0x2c] sm:$0x1] }
 0x14e   : > { %1341 = vst.msk [vmem:[#allocation2 + $0x20] sm:$0xf] %vm1332_vm9, %v1253_v2  ;;  %1831 = vrot.lane.b32.xlu2 %v1628_v8, %s5668_s23  ;;  %v1738_v7 = vsel %vm5729_vm2, %v1733_v62, %v6460_v30  ;;  %v2552_v56 = vshll.u32 %v5018_v48, 16  ;;  %v2550_v60 = vrot.slane %v2549_v54, 4 }
 0x14f   : > { %v2521_v8 = vsel %vm5729_vm2, %v2516_v63, %v2520_v0  ;;  %v2526_v41 = vrot.slane %v2525_v27, 4 }
 0x150   : > { %v1269_v20 = vpop.permute.xlu2 %1268  ;;  %v2554_v51 = vrot.slane %v2552_v56, 5 }
 0x151   : > { %1349 = vst.msk [vmem:[#allocation2 + $0x40] sm:$0xf] %vm1332_vm9, %v1269_v20 }
 0x152   : > { %1841 = vrot.lane.b32.xlu1 %v1690_v11, %s5668_s23  ;;  %v3119_v11 = vrot.slane %v5062_v3, 5  ;;  %v2555_v3 = vsel %vm5729_vm2, %v2550_v60, %v2554_v51 }
 0x153   : > { %1839 = vrot.lane.b32.xlu0 %v1676_v14, %s5668_s23  ;;  %v5061_v14 = vld [vmem:[%s5718_s19 + $0x18] sm:$0xe] }
 0x154   : > { %v1261_v24 = vpop.permute.xlu1 %1260  ;;  %v3121_v16 = vrot.slane %v3119_v11, 4  ;;  %v5109_v18 = vrot.slane %v5061_v14, 9 }
 0x155   : > { %1345 = vst.msk [vmem:[#allocation2 + $0x30] sm:$0xf] %vm1332_vm9, %v1261_v24  ;;  %v1259_v10 = vpop.permute.xlu0 %1258  ;;  %v5016_v24 = vld [vmem:[%s5718_s19 + $0x24] sm:$0xf] }
 0x156   : > { %1344 = vst.msk [vmem:[#allocation2 + $0x2c] sm:$0xf] %vm1332_vm9, %v1259_v10  ;;  %1837 = vrot.lane.b32.xlu2 %v1666_v9, %s5668_s23  ;;  %v2528_v10 = vshll.u32 %v5015_v5, 16  ;;  %v2031_v9 = vrot.slane %v4921_v21, 5  ;;  %v3120_v38 = vsel %vm5919_vm5, %v5109_v18, %v3119_v11  ;;  %v2533_v36 = vshrl.u32 %v5016_v24, 16 }
 0x157   : > { %v2536_v40 = vshll.u32 %v5016_v24, 16  ;;  %v5066_v11 = vld [vmem:[%s5718_s19 + $0x2c] sm:$0x1]  ;;  %v4984_v5 = vld [vmem:[%s5718_s19 + $0x28] sm:$0xf] }
 0x158   : > { %v1275_v52 = vpop.permute.xlu2 %1274  ;;  %v2033_v43 = vrot.slane %v2031_v9, 4  ;;  %v2535_v50 = vrot.slane %v2533_v36, 4  ;;  %v5050_v18 = vld [vmem:[%s5718_s19 + $0xac] sm:$0xf] }
 0x159   : > { %1352 = vst.msk [vmem:[#allocation2 + $0x4c] sm:$0xf] %vm1332_vm9, %v1275_v52  ;;  %v2538_v52 = vrot.slane %v2536_v40, 5  ;;  %v2806_v21 = vshll.u32 %v5050_v18, 16  ;;  %v2810_v22 = vshrl.u32 %v5050_v18, 16 }
 0x15a   : > { %1847 = vrot.lane.b32.xlu1 %v1724_v29, %s5668_s23  ;;  %v3123_v29 = vsel %vm5919_vm5, %v3121_v16, %v3122_v17  ;;  %v3129_v17 = vrot.slane %v5066_v11, 5 }
 0x15b   : > { %1845 = vrot.lane.b32.xlu0 %v1714_v34, %s5668_s23  ;;  %v2530_v34 = vrot.slane %v2528_v10, 5  ;;  %v2539_v33 = vor.u32 %v2538_v52, %v2535_v50  ;;  %v6561_v10 = vrot.slane %v2806_v21, 5 }
 0x15c   : > { %v1267_v55 = vpop.permute.xlu1 %1266 }
 0x15d   : > { %1348 = vst.msk [vmem:[#allocation2 + $0x3c] sm:$0xf] %vm1332_vm9, %v1267_v55  ;;  %v1265_v49 = vpop.permute.xlu0 %1264  ;;  %v2531_v31 = vsel %vm5729_vm2, %v2526_v41, %v2530_v34  ;;  %v4983_v55 = vld [vmem:[%s5718_s19 + $0x24] sm:$0xf]  ;;  %v2540_v63 = vrot.slane %v2539_v33, 4 }
 0x15e   : > { %1347 = vst.msk [vmem:[#allocation2 + $0x38] sm:$0xf] %vm1332_vm9, %v1265_v49  ;;  %1843 = vrot.lane.b32.xlu2 %v1700_v57, %s5668_s23  ;;  %v4920_v49 = vld [vmem:[%s5718_s19 + $0x18] sm:$0xe]  ;;  %v2035_v57 = vsel %vm5919_vm5, %v2033_v43, %v2034_v44  ;;  %v5006_v41 = vld [vmem:[%s5718_s19 + $0xac] sm:$0xf] }
 0x15f   : > { %v2816_v43 = vshll.u32 %v5051_v37, 16  ;;  %v4955_v44 = vld [vmem:[%s5718_s19 + $0xa4] sm:$0x1]  ;;  %v5019_v33 = vld [vmem:[%s5718_s19 + $0x30] sm:$0xf] }
 0x160   : > { %v1281_v1 = vpop.permute.xlu2 %1280  ;;  %v2111_v48 = vrot.slane %v4955_v44, 5 }
 0x161   : > { %1355 = vst.msk [vmem:[#allocation2 + $0x58] sm:$0xf] %vm1332_vm9, %v1281_v1  ;;  %v5065_v1 = vld [vmem:[%s5718_s19 + $0x28] sm:$0xf]  ;;  %v2818_v54 = vrot.slane %v2816_v43, 5 }
 0x162   : > { %2136 = vrot.lane.b32.xlu1 %v2028_v59, %s5669_s24  ;;  %v4966_v59 = vrot.slane %v4920_v49, 9 }
 0x163   : > { %2134 = vrot.lane.b32.xlu0 %v2025_v61, %s5669_s24 }
 0x164   : > { %v1273_v2 = vpop.permute.xlu1 %1272 }
 0x165   : > { %1351 = vst.msk [vmem:[#allocation2 + $0x48] sm:$0xf] %vm1332_vm9, %v1273_v2  ;;  %v1271_v4 = vpop.permute.xlu0 %1270  ;;  %v2032_v2 = vsel %vm5919_vm5, %v4966_v59, %v2031_v9  ;;  %v5049_v9 = vld [vmem:[%s5718_s19 + $0xa8] sm:$0xf] }
 0x166   : > { %1350 = vst.msk [vmem:[#allocation2 + $0x44] sm:$0xf] %vm1332_vm9, %v1271_v4  ;;  %1849 = vrot.lane.b32.xlu2 %v1738_v7, %s5668_s23  ;;  %v2545_v4 = vsel %vm5729_vm2, %v2540_v63, %v2544_v46  ;;  %v4954_v7 = vld [vmem:[%s5718_s19 + $0xa0] sm:$0xf]  ;;  %v2797_v36 = vshrl.u32 %v5049_v9, 16  ;;  %v2800_v40 = vshll.u32 %v5049_v9, 16 }
 0x167   : > { %v2108_v13 = vrot.slane %v4954_v7, 5  ;;  %v5097_v46 = vld [vmem:[%s5718_s19 + $0xa8] sm:$0xe]  ;;  %v2557_v63 = vshrl.u32 %v5019_v33, 16 }
 0x168   : > { %v1287_v19 = vpop.permute.xlu2 %1286  ;;  %v2799_v50 = vrot.slane %v2797_v36, 4  ;;  %v2802_v52 = vrot.slane %v2800_v40, 5  ;;  %v4986_v36 = vld [vmem:[%s5718_s19 + $0x34] sm:$0xf]  ;;  %v5069_v40 = vld [vmem:[%s5718_s19 + $0x38] sm:$0x1] }
 0x169   : > { %1358 = vst.msk [vmem:[#allocation2 + $0x64] sm:$0xf] %vm1332_vm9, %v1287_v19  ;;  %v2559_v11 = vrot.slane %v2557_v63, 4  ;;  %v3136_v44 = vrot.slane %v5069_v40, 5  ;;  %v6674_v40 = vld [vmem:[%s5718_s19 + $0x34] sm:$0xf] }
 0x16a   : > { %2892 = vrot.lane.b32.xlu1 %v2521_v8, %s5670_s25  ;;  %v3126_v8 = vrot.slane %v5065_v1, 5  ;;  %v2803_v51 = vor.u32 %v2802_v52, %v2799_v50  ;;  %v5052_v50 = vld [vmem:[%s5718_s19 + $0xb4] sm:$0xf] }
 0x16b   : > { %2333 = vrot.lane.b32.xlu0 %v4982_v12, %s5671_s26  ;;  %v4977_v12 = vrot.slane %v4953_v6, 9 }
 0x16c   : > { %v1279_v20 = vpop.permute.xlu1 %1278  ;;  %v3128_v16 = vrot.slane %v3126_v8, 4 }
 0x16d   : > { %1354 = vst.msk [vmem:[#allocation2 + $0x54] sm:$0xf] %vm1332_vm9, %v1279_v20  ;;  %v1277_v23 = vpop.permute.xlu0 %1276  ;;  %v2109_v20 = vsel %vm5919_vm5, %v4977_v12, %v2108_v13 }
 0x16e   : > { %1353 = vst.msk [vmem:[#allocation2 + $0x50] sm:$0xf] %vm1332_vm9, %v1277_v23  ;;  %2331 = vrot.lane.b32.xlu2 %v4981_v26, %s5671_s26  ;;  %v5064_v23 = vld [vmem:[%s5718_s19 + $0x24] sm:$0xe]  ;;  %v3130_v24 = vsel %vm5919_vm5, %v3128_v16, %v3129_v17 }
 0x16f   : > { %v5110_v26 = vrot.slane %v5064_v23, 9 }
 0x170   : > { %v1293_v45 = vpop.permute.xlu2 %1292 }
 0x171   : > { %1361 = vst.msk [vmem:[#allocation2 + $0x70] sm:$0xf] %vm1332_vm9, %v1293_v45  ;;  %v3127_v39 = vsel %vm5919_vm5, %v5110_v26, %v3126_v8  ;;  %v5005_v45 = vld [vmem:[%s5718_s19 + $0xa8] sm:$0xf] }
 0x172   : > { %3231 = vrot.lane.b32.xlu1 %v3123_v29, %s5672_s27  ;;  %v2812_v29 = vrot.slane %v2810_v22, 4 }
 0x173   : > { %3229 = vrot.lane.b32.xlu0 %v3120_v38, %s5672_s27 }
 0x174   : > { %v1285_v28 = vpop.permute.xlu1 %1284  ;;  %v2813_v34 = vor.u32 %v2812_v29, %v6561_v10  ;;  %v5068_v29 = vld [vmem:[%s5718_s19 + $0x34] sm:$0xf] }
 0x175   : > { %1357 = vst.msk [vmem:[#allocation2 + $0x60] sm:$0xf] %vm1332_vm9, %v1285_v28  ;;  %v1283_v53 = vpop.permute.xlu0 %1282  ;;  %v2110_v28 = vrot.slane %v2108_v13, 4 }
 0x176   : > { %1356 = vst.msk [vmem:[#allocation2 + $0x5c] sm:$0xf] %vm1332_vm9, %v1283_v53  ;;  %2894 = vrot.lane.b32.xlu2 %v2531_v31, %s5670_s25  ;;  %v5121_v53 = vrot.slane %v5097_v46, 9  ;;  %v3203_v31 = vrot.slane %v5098_v47, 5  ;;  %v5021_v47 = vld [vmem:[%s5718_s19 + $0x38] sm:$0x1] }
 0x177   : > { %v2112_v60 = vsel %vm5919_vm5, %v2110_v28, %v2111_v48  ;;  %v4957_v48 = vld [vmem:[%s5718_s19 + $0xac] sm:$0xf] }
 0x178   : > { %v1299_v61 = vpop.permute.xlu2 %1298  ;;  %v3205_v22 = vrot.slane %v3203_v31, 4 }
 0x179   : > { %1364 = vst.msk [vmem:[#allocation2 + $0x7c] sm:$0xf] %vm1332_vm9, %v1299_v61  ;;  %v3204_v61 = vsel %vm5919_vm5, %v5121_v53, %v3203_v31  ;;  %v4985_v53 = vld [vmem:[%s5718_s19 + $0x30] sm:$0xf] }
 0x17a   : > { %2335 = vrot.lane.b32.xlu1 %v4983_v55, %s5671_s26  ;;  %v2814_v55 = vrot.slane %v2813_v34, 4 }
 0x17b   : > { %2140 = vrot.lane.b32.xlu0 %v2035_v57, %s5669_s24  ;;  %v4924_v57 = vld [vmem:[%s5718_s19 + $0x28] sm:$0xf] }
 0x17c   : > { %v1291_v62 = vpop.permute.xlu1 %1290  ;;  %v2819_v1 = vsel %vm5729_vm2, %v2814_v55, %v2818_v54  ;;  %v2576_v55 = vshll.u32 %v5021_v47, 16 }
 0x17d   : > { %1360 = vst.msk [vmem:[#allocation2 + $0x6c] sm:$0xf] %vm1332_vm9, %v1291_v62  ;;  %v1289_v0 = vpop.permute.xlu0 %1288  ;;  %v2038_v62 = vrot.slane %v4924_v57, 5  ;;  %v2824_v57 = vshll.u32 %v5052_v50, 16 }
 0x17e   : > { %1359 = vst.msk [vmem:[#allocation2 + $0x68] sm:$0xf] %vm1332_vm9, %v1289_v0  ;;  %2138 = vrot.lane.b32.xlu2 %v2032_v2, %s5669_s24  ;;  %v2560_v0 = vshll.u32 %v5019_v33, 16  ;;  %v4925_v2 = vld [vmem:[%s5718_s19 + $0x2c] sm:$0x1] }
 0x17f   : > { %v2040_v6 = vrot.slane %v2038_v62, 4  ;;  %v2041_v7 = vrot.slane %v4925_v2, 5  ;;  %v2826_v2 = vrot.slane %v2824_v57, 5 }
 0x180   : > { %v1802_v14 = vpop.permute.xlu2 %1801  ;;  %v2562_v12 = vrot.slane %v2560_v0, 5 }
 0x181   : > { %1896 = vst.msk [vmem:[#allocation2 + $0x8] sm:$0xf] %vm1893_vm10, %v1802_v14  ;;  %v2042_v18 = vsel %vm5919_vm5, %v2040_v6, %v2041_v7  ;;  %v5053_v7 = vld [vmem:[%s5718_s19 + $0xb8] sm:$0xf] }
 0x182   : > { %2898 = vrot.lane.b32.xlu1 %v2555_v3, %s5670_s25  ;;  %v4923_v3 = vld [vmem:[%s5718_s19 + $0x24] sm:$0xe]  ;;  %v2834_v30 = vshrl.u32 %v5053_v7, 16 }
 0x183   : > { %2896 = vrot.lane.b32.xlu0 %v2545_v4, %s5670_s25  ;;  %v2804_v4 = vrot.slane %v2803_v51, 4  ;;  %v4967_v14 = vrot.slane %v4923_v3, 9  ;;  %v4910_v3 = vld [vmem:[%s5718_s19 + $0xb0] sm:$0x1] }
 0x184   : > { %v1297_v15 = vpop.permute.xlu1 %1296 }
 0x185   : > { %1363 = vst.msk [vmem:[#allocation2 + $0x78] sm:$0xf] %vm1332_vm9, %v1297_v15  ;;  %v1295_v19 = vpop.permute.xlu0 %1294  ;;  %v5020_v15 = vld [vmem:[%s5718_s19 + $0x34] sm:$0xf]  ;;  %v2809_v17 = vsel %vm5729_vm2, %v2804_v4, %v6561_v10  ;;  %v2039_v21 = vsel %vm5919_vm5, %v4967_v14, %v2038_v62 }
 0x186   : > { %1362 = vst.msk [vmem:[#allocation2 + $0x74] sm:$0xf] %vm1332_vm9, %v1295_v19  ;;  %2337 = vrot.lane.b32.xlu2 %v4984_v5, %s5671_s26  ;;  %v2563_v19 = vor.u32 %v2562_v12, %v2559_v11  ;;  %v2566_v5 = vshll.u32 %v5020_v15, 16  ;;  %v1745_v12 = vshll.u32 %v4910_v3, 16 }
 0x188   : > { %v1808_v27 = vpop.permute.xlu2 %1807  ;;  %v2568_v26 = vrot.slane %v2566_v5, 5 }
 0x189   : > { %1899 = vst.msk [vmem:[#allocation2 + $0x14] sm:$0xf] %vm1893_vm10, %v1808_v27 }
 0x18a   : > { %2182 = vrot.lane.b32.xlu1 %v2109_v20, %s5669_s24  ;;  %v5099_v20 = vld [vmem:[%s5718_s19 + $0xb0] sm:$0x1] }
 0x18b   : > { %3235 = vrot.lane.b32.xlu0 %v3130_v24, %s5672_s27  ;;  %v3206_v23 = vrot.slane %v5099_v20, 5  ;;  %v2564_v24 = vrot.slane %v2563_v19, 4 }
 0x18c   : > { %v1800_v35 = vpop.permute.xlu1 %1799 }
 0x18d   : > { %1895 = vst.msk [vmem:[#allocation2 + $0x4] sm:$0xf] %vm1893_vm10, %v1800_v35  ;;  %v1798_v38 = vpop.permute.xlu0 %1797  ;;  %v2570_v35 = vshrl.u32 %v5020_v15, 16  ;;  %v3207_v37 = vsel %vm5919_vm5, %v3205_v22, %v3206_v23  ;;  %v2830_v15 = vshll.u32 %v5053_v7, 16  ;;  %v5101_v22 = vld [vmem:[%s5718_s19 + $0xb8] sm:$0xf] }
 0x18e   : > { %1894 = vst.msk [vmem:[#allocation2] sm:$0xf] %vm1893_vm10, %v1798_v38  ;;  %3233 = vrot.lane.b32.xlu2 %v3127_v39, %s5672_s27  ;;  %v2569_v38 = vsel %vm5729_vm2, %v2564_v24, %v2568_v26  ;;  %v3133_v39 = vrot.slane %v5068_v29, 5  ;;  %v3210_v24 = vrot.slane %v5101_v22, 5  ;;  %v2836_v29 = vrot.slane %v2834_v30, 4 }
 0x18f   : > { %v2572_v34 = vrot.slane %v2570_v35, 4  ;;  %v2832_v5 = vrot.slane %v2830_v15, 5 }
 0x190   : > { %v1814_v56 = vpop.permute.xlu2 %1813  ;;  %v3135_v43 = vrot.slane %v3133_v39, 4 }
 0x191   : > { %1902 = vst.msk [vmem:[#allocation2 + $0x20] sm:$0xf] %vm1893_vm10, %v1814_v56  ;;  %v2573_v31 = vor.u32 %v2572_v34, %v2568_v26  ;;  %v2115_v56 = vrot.slane %v4957_v48, 5  ;;  %v5008_v26 = vld [vmem:[%s5718_s19 + $0xb8] sm:$0xf] }
 0x192   : > { %2381 = vrot.lane.b32.xlu1 %v5006_v41, %s5671_s26  ;;  %v5067_v41 = vld [vmem:[%s5718_s19 + $0x30] sm:$0xe]  ;;  %v3137_v54 = vsel %vm5919_vm5, %v3135_v43, %v3136_v44  ;;  %v5022_v43 = vld [vmem:[%s5718_s19 + $0x3c] sm:$0xf]  ;;  %v5007_v44 = vld [vmem:[%s5718_s19 + $0xb4] sm:$0xf] }
 0x193   : > { %2379 = vrot.lane.b32.xlu0 %v5005_v45, %s5671_s26  ;;  %v5111_v45 = vrot.slane %v5067_v41, 9  ;;  %v2574_v51 = vrot.slane %v2573_v31, 4  ;;  %v2117_v62 = vrot.slane %v2115_v56, 4  ;;  %v5023_v41 = vld [vmem:[%s5718_s19 + $0x40] sm:$0xf]  ;;  %v2581_v31 = vshrl.u32 %v5022_v43, 16 }
 0x194   : > { %v1806_v49 = vpop.permute.xlu1 %1805  ;;  %v2590_v48 = vshll.u32 %v5023_v41, 16 }
 0x195   : > { %1898 = vst.msk [vmem:[#allocation2 + $0x10] sm:$0xf] %vm1893_vm10, %v1806_v49  ;;  %v1804_v59 = vpop.permute.xlu0 %1803  ;;  %v2821_v49 = vshrl.u32 %v5052_v50, 16  ;;  %v3134_v33 = vsel %vm5919_vm5, %v5111_v45, %v3133_v39  ;;  %v5054_v39 = vld [vmem:[%s5718_s19 + $0xbc] sm:$0x1]  ;;  %v2837_v45 = vor.u32 %v2836_v29, %v2832_v5  ;;  %v2594_v50 = vshrl.u32 %v5023_v41, 16 }
 0x196   : > { %1897 = vst.msk [vmem:[#allocation2 + $0xc] sm:$0xf] %vm1893_vm10, %v1804_v59  ;;  %2184 = vrot.lane.b32.xlu2 %v2112_v60, %s5669_s24  ;;  %v4958_v59 = vld [vmem:[%s5718_s19 + $0xb0] sm:$0x1]  ;;  %v4956_v60 = vld [vmem:[%s5718_s19 + $0xa8] sm:$0xe] }
 0x197   : > { %v2118_v63 = vrot.slane %v4958_v59, 5  ;;  %v4978_v6 = vrot.slane %v4956_v60, 9  ;;  %v2592_v59 = vrot.slane %v2590_v48, 5  ;;  %v2596_v60 = vrot.slane %v2594_v50, 4  ;;  %v4961_v50 = vld [vmem:[%s5718_s19 + $0xbc] sm:$0x1] }
 0x198   : > { %v1820_v8 = vpop.permute.xlu2 %1819 }
 0x199   : > { %1905 = vst.msk [vmem:[#allocation2 + $0x2c] sm:$0xf] %vm1893_vm10, %v1820_v8 }
 0x19a   : > { %3277 = vrot.lane.b32.xlu1 %v3204_v61, %s5672_s27  ;;  %v2578_v61 = vrot.slane %v2576_v55, 5  ;;  %v2584_v55 = vshll.u32 %v5022_v43, 16 }
 0x19b   : > { %2942 = vrot.lane.b32.xlu0 %v2819_v1, %s5670_s25  ;;  %v2823_v1 = vrot.slane %v2821_v49, 4 }
 0x19c   : > { %v1812_v13 = vpop.permute.xlu1 %1811  ;;  %v2579_v11 = vsel %vm5729_vm2, %v2574_v51, %v2578_v61  ;;  %v5024_v61 = vld [vmem:[%s5718_s19 + $0x44] sm:$0x1] }
 0x19d   : > { %1901 = vst.msk [vmem:[#allocation2 + $0x1c] sm:$0xf] %vm1893_vm10, %v1812_v13  ;;  %v1810_v16 = vpop.permute.xlu0 %1809  ;;  %v2119_v13 = vsel %vm5919_vm5, %v2117_v62, %v2118_v63  ;;  %v2827_v14 = vor.u32 %v2826_v2, %v2823_v1  ;;  %v2583_v62 = vrot.slane %v2581_v31, 4  ;;  %v2586_v63 = vrot.slane %v2584_v55, 5  ;;  %v4987_v2 = vld [vmem:[%s5718_s19 + $0x3c] sm:$0xf] }
 0x19e   : > { %1900 = vst.msk [vmem:[#allocation2 + $0x18] sm:$0xf] %vm1893_vm10, %v1810_v16  ;;  %2940 = vrot.lane.b32.xlu2 %v2809_v17, %s5670_s25  ;;  %v2116_v16 = vsel %vm5919_vm5, %v4978_v6, %v2115_v56  ;;  %v1743_v17 = vrot.slane %v1742_v42, 4  ;;  %v2600_v6 = vshll.u32 %v5024_v61, 16 }
 0x19f   : > { %v2828_v19 = vrot.slane %v2827_v14, 4 }
 0x1a0   : > { %v1826_v27 = vpop.permute.xlu2 %1825 }
 0x1a1   : > { %1908 = vst.msk [vmem:[#allocation2 + $0x38] sm:$0xf] %vm1893_vm10, %v1826_v27  ;;  %v2833_v42 = vsel %vm5729_vm2, %v2828_v19, %v2832_v5  ;;  %v5102_v27 = vld [vmem:[%s5718_s19 + $0xbc] sm:$0x1] }
 0x1a2   : > { %2144 = vrot.lane.b32.xlu1 %v2042_v18, %s5669_s24  ;;  %v1747_v18 = vrot.slane %v1745_v12, 5  ;;  %v3213_v35 = vrot.slane %v5102_v27, 5 }
 0x1a3   : > { %2142 = vrot.lane.b32.xlu0 %v2039_v21, %s5669_s24 }
 0x1a4   : > { %v1818_v10 = vpop.permute.xlu1 %1817  ;;  %v1748_v32 = vsel %vm5729_vm2, %v1743_v17, %v1747_v18 }
 0x1a5   : > { %1904 = vst.msk [vmem:[#allocation2 + $0x28] sm:$0xf] %vm1893_vm10, %v1818_v10  ;;  %v1816_v9 = vpop.permute.xlu0 %1815  ;;  %v5100_v10 = vld [vmem:[%s5718_s19 + $0xb4] sm:$0xe] }
 0x1a6   : > { %1903 = vst.msk [vmem:[#allocation2 + $0x24] sm:$0xf] %vm1893_vm10, %v1816_v9  ;;  %3279 = vrot.lane.b32.xlu2 %v3207_v37, %s5672_s27  ;;  %v3212_v9 = vrot.slane %v3210_v24, 4  ;;  %v5122_v37 = vrot.slane %v5100_v10, 9  ;;  %v5072_v10 = vld [vmem:[%s5718_s19 + $0x44] sm:$0x1] }
 0x1a8   : > { %v1832_v46 = vpop.permute.xlu2 %1831  ;;  %v3214_v47 = vsel %vm5919_vm5, %v3212_v9, %v3213_v35 }
 0x1a9   : > { %1911 = vst.msk [vmem:[#allocation2 + $0x44] sm:$0xf] %vm1893_vm10, %v1832_v46  ;;  %v2840_v46 = vshll.u32 %v5054_v39, 16 }
 0x1aa   : > { %2900 = vrot.lane.b32.xlu1 %v2569_v38, %s5670_s25 }
 0x1ab   : > { %2341 = vrot.lane.b32.xlu0 %v4986_v36, %s5671_s26  ;;  %v2842_v56 = vrot.slane %v2840_v46, 5 }
 0x1ac   : > { %v1824_v28 = vpop.permute.xlu1 %1823 }
 0x1ad   : > { %1907 = vst.msk [vmem:[#allocation2 + $0x34] sm:$0xf] %vm1893_vm10, %v1824_v28  ;;  %v1822_v52 = vpop.permute.xlu0 %1821  ;;  %v2045_v28 = vrot.slane %v6674_v40, 5  ;;  %v5055_v40 = vld [vmem:[%s5718_s19 + $0xc0] sm:$0xf] }
 0x1ae   : > { %1906 = vst.msk [vmem:[#allocation2 + $0x30] sm:$0xf] %vm1893_vm10, %v1822_v52  ;;  %2339 = vrot.lane.b32.xlu2 %v4985_v53, %s5671_s26  ;;  %v3211_v52 = vsel %vm5919_vm5, %v5122_v37, %v3210_v24  ;;  %v4928_v53 = vld [vmem:[%s5718_s19 + $0x38] sm:$0x1]  ;;  %v2845_v46 = vshrl.u32 %v5055_v40, 16 }
 0x1af   : > { %v2047_v49 = vrot.slane %v2045_v28, 4  ;;  %v2048_v57 = vrot.slane %v4928_v53, 5  ;;  %v4960_v37 = vld [vmem:[%s5718_s19 + $0xb8] sm:$0xf] }
 0x1b0   : > { %v1838_v0 = vpop.permute.xlu2 %1837  ;;  %v2122_v43 = vrot.slane %v4960_v37, 5  ;;  %v5009_v37 = vld [vmem:[%s5718_s19 + $0xc0] sm:$0xf] }
 0x1b1   : > { %1914 = vst.msk [vmem:[#allocation2 + $0x50] sm:$0xf] %vm1893_vm10, %v1838_v0  ;;  %v4911_v0 = vld [vmem:[%s5718_s19 + $0xb4] sm:$0xf]  ;;  %v2049_v12 = vsel %vm5919_vm5, %v2047_v49, %v2048_v57  ;;  %v2847_v49 = vrot.slane %v2845_v46, 4 }
 0x1b2   : > { %3239 = vrot.lane.b32.xlu1 %v3137_v54, %s5672_s27  ;;  %v2838_v54 = vrot.slane %v2837_v45, 4  ;;  %v1750_v7 = vshrl.u32 %v4911_v0, 16  ;;  %v2124_v55 = vrot.slane %v2122_v43, 4  ;;  %v4931_v46 = vld [vmem:[%s5718_s19 + $0x44] sm:$0x1] }
 0x1b3   : > { %3237 = vrot.lane.b32.xlu0 %v3134_v33, %s5672_s27 }
 0x1b4   : > { %v1830_v4 = vpop.permute.xlu1 %1829  ;;  %v2843_v3 = vsel %vm5729_vm2, %v2838_v54, %v2842_v56  ;;  %v1752_v18 = vrot.slane %v1750_v7, 4  ;;  %v2125_v54 = vrot.slane %v4961_v50, 5  ;;  %v5027_v50 = vld [vmem:[%s5718_s19 + $0x50] sm:$0x1] }
 0x1b5   : > { %1910 = vst.msk [vmem:[#allocation2 + $0x40] sm:$0xf] %vm1893_vm10, %v1830_v4  ;;  %v1828_v8 = vpop.permute.xlu0 %1827  ;;  %v2597_v4 = vor.u32 %v2596_v60, %v2592_v59 }
 0x1b6   : > { %1909 = vst.msk [vmem:[#allocation2 + $0x3c] sm:$0xf] %vm1893_vm10, %v1828_v8  ;;  %2902 = vrot.lane.b32.xlu2 %v2579_v11, %s5670_s25  ;;  %v1753_v8 = vshll.u32 %v4911_v0, 16  ;;  %v4926_v11 = vld [vmem:[%s5718_s19 + $0x30] sm:$0xe] }
 0x1b7   : > { %v4968_v14 = vrot.slane %v4926_v11, 9  ;;  %v2598_v15 = vrot.slane %v2597_v4, 4 }
 0x1b8   : > { %v1844_v20 = vpop.permute.xlu2 %1843  ;;  %v1755_v19 = vrot.slane %v1753_v8, 5 }
 0x1b9   : > { %1917 = vst.msk [vmem:[#allocation2 + $0x5c] sm:$0xf] %vm1893_vm10, %v1844_v20  ;;  %v2046_v30 = vsel %vm5919_vm5, %v4968_v14, %v2045_v28  ;;  %v5070_v28 = vld [vmem:[%s5718_s19 + $0x3c] sm:$0xe] }
 0x1ba   : > { %2188 = vrot.lane.b32.xlu1 %v2119_v13, %s5669_s24  ;;  %v2587_v13 = vor.u32 %v2586_v63, %v2583_v62  ;;  %v5112_v53 = vrot.slane %v5070_v28, 9  ;;  %v5673_v62 = vmov 0  }
 0x1bb   : > { %2186 = vrot.lane.b32.xlu0 %v2116_v16, %s5669_s24  ;;  %v2602_v16 = vrot.slane %v2600_v6, 5 }
 0x1bc   : > { %v1836_v21 = vpop.permute.xlu1 %1835  ;;  %v2588_v20 = vrot.slane %v2587_v13, 4 }
 0x1bd   : > { %1913 = vst.msk [vmem:[#allocation2 + $0x4c] sm:$0xf] %vm1893_vm10, %v1836_v21  ;;  %v1834_v23 = vpop.permute.xlu0 %1833  ;;  %v4912_v21 = vld [vmem:[%s5718_s19 + $0xb8] sm:$0xf] }
 0x1be   : > { %1912 = vst.msk [vmem:[#allocation2 + $0x48] sm:$0xf] %vm1893_vm10, %v1834_v23  ;;  %1851 = vrot.lane.b32.xlu2 %v1748_v32, %s5668_s23  ;;  %v5071_v23 = vld [vmem:[%s5718_s19 + $0x40] sm:$0xf]  ;;  %v2603_v32 = vsel %vm5729_vm2, %v2598_v15, %v2602_v16  ;;  %v1759_v24 = vshll.u32 %v4912_v21, 16 }
 0x1bf   : > { %v3140_v27 = vrot.slane %v5071_v23, 5  ;;  %v5104_v15 = vld [vmem:[%s5718_s19 + $0xc4] sm:$0xf] }
 0x1c0   : > { %v1850_v38 = vpop.permute.xlu2 %1849  ;;  %v1761_v9 = vrot.slane %v1759_v24, 5  ;;  %v5057_v24 = vld [vmem:[%s5718_s19 + $0xc8] sm:$0x1] }
 0x1c1   : > { %1920 = vst.msk [vmem:[#allocation2 + $0x68] sm:$0xf] %vm1893_vm10, %v1850_v38  ;;  %v3142_v39 = vrot.slane %v3140_v27, 4  ;;  %v3141_v63 = vsel %vm5919_vm5, %v5112_v53, %v3140_v27 }
 0x1c2   : > { %2944 = vrot.lane.b32.xlu1 %v2833_v42, %s5670_s25  ;;  %v1756_v42 = vor.u32 %v1755_v19, %v1752_v18 }
 0x1c3   : > { %2385 = vrot.lane.b32.xlu0 %v5008_v26, %s5671_s26  ;;  %v2593_v26 = vsel %vm5729_vm2, %v2588_v20, %v2592_v59  ;;  %v5010_v20 = vld [vmem:[%s5718_s19 + $0xc4] sm:$0xf] }
 0x1c4   : > { %v1842_v36 = vpop.permute.xlu1 %1841  ;;  %v1757_v29 = vrot.slane %v1756_v42, 4 }
 0x1c5   : > { %1916 = vst.msk [vmem:[#allocation2 + $0x58] sm:$0xf] %vm1893_vm10, %v1842_v36  ;;  %v1840_v34 = vpop.permute.xlu0 %1839  ;;  %v3143_v36 = vrot.slane %v5072_v10, 5  ;;  %v5026_v10 = vld [vmem:[%s5718_s19 + $0x4c] sm:$0xf] }
 0x1c6   : > { %1915 = vst.msk [vmem:[#allocation2 + $0x54] sm:$0xf] %vm1893_vm10, %v1840_v34  ;;  %2383 = vrot.lane.b32.xlu2 %v5007_v44, %s5671_s26  ;;  %v1763_v34 = vshrl.u32 %v4912_v21, 16  ;;  %v4988_v44 = vld [vmem:[%s5718_s19 + $0x40] sm:$0xf]  ;;  %v1762_v45 = vsel %vm5729_vm2, %v1757_v29, %v1761_v9 }
 0x1c7   : > { %v3144_v48 = vsel %vm5919_vm5, %v3142_v39, %v3143_v36  ;;  %v5105_v21 = vld [vmem:[%s5718_s19 + $0xc8] sm:$0x1]  ;;  %v2864_v39 = vshll.u32 %v5057_v24, 16  ;;  %v4963_v24 = vld [vmem:[%s5718_s19 + $0xc4] sm:$0xf] }
 0x1c8   : > { %v2332_v33 = vpop.permute.xlu2 %2331  ;;  %v1765_v31 = vrot.slane %v1763_v34, 4 }
 0x1c9   : > { %v2866_v28 = vrot.slane %v2864_v39, 5 }
 0x1ca   : > { %3283 = vrot.lane.b32.xlu1 %v3214_v47, %s5672_s27  ;;  %v2848_v47 = vshll.u32 %v5055_v40, 16  ;;  %v1766_v0 = vor.u32 %v1765_v31, %v1761_v9  ;;  %v4930_v9 = vld [vmem:[%s5718_s19 + $0x40] sm:$0xf]  ;;  %v2614_v40 = vshll.u32 %v5026_v10, 16 }
 0x1cb   : > { %3281 = vrot.lane.b32.xlu0 %v3211_v52, %s5672_s27  ;;  %v4959_v52 = vld [vmem:[%s5718_s19 + $0xb4] sm:$0xe] }
 0x1cc   : > { %v1848_v51 = vpop.permute.xlu1 %1847  ;;  %v2850_v57 = vrot.slane %v2848_v47, 5  ;;  %v4979_v60 = vrot.slane %v4959_v52, 9  ;;  %v1767_v7 = vrot.slane %v1766_v0, 4  ;;  %v2616_v52 = vrot.slane %v2614_v40, 5 }
 0x1cd   : > { %1919 = vst.msk [vmem:[#allocation2 + $0x64] sm:$0xf] %vm1893_vm10, %v1848_v51  ;;  %v1846_v1 = vpop.permute.xlu0 %1845  ;;  %v5056_v51 = vld [vmem:[%s5718_s19 + $0xc4] sm:$0xf] }
 0x1ce   : > { %1918 = vst.msk [vmem:[#allocation2 + $0x60] sm:$0xf] %vm1893_vm10, %v1846_v1  ;;  %2946 = vrot.lane.b32.xlu2 %v2843_v3, %s5670_s25  ;;  %v2851_v3 = vor.u32 %v2850_v57, %v2847_v49  ;;  %v2854_v4 = vshll.u32 %v5056_v51, 16  ;;  %v2123_v6 = vsel %vm5919_vm5, %v4979_v60, %v2122_v43  ;;  %v2052_v43 = vrot.slane %v4930_v9, 5  ;;  %v4914_v57 = vld [vmem:[%s5718_s19 + $0xc0] sm:$0xf] }
 0x1cf   : > { %v2624_v60 = vshll.u32 %v5027_v50, 16  ;;  %v1777_v0 = vshll.u32 %v4914_v57, 16 }
 0x1d0   : > { %v2895_v17 = vpop.permute.xlu2 %2894  ;;  %v2852_v11 = vrot.slane %v2851_v3, 4 }
 0x1d2   : > { %2343 = vrot.lane.b32.xlu1 %v4987_v2, %s5671_s26  ;;  %v2126_v2 = vsel %vm5919_vm5, %v2124_v55, %v2125_v54  ;;  %v2054_v55 = vrot.slane %v2052_v43, 4  ;;  %v2055_v54 = vrot.slane %v4931_v46, 5 }
 0x1d3   : > { %2148 = vrot.lane.b32.xlu0 %v2049_v12, %s5669_s24  ;;  %v2856_v12 = vrot.slane %v2854_v4, 5 }
 0x1d4   : > { %v2137_v5 = vpop.permute.xlu1 %2136 }
 0x1d5   : > { %2232 = vst.msk [vmem:[#allocation2 + $0x4] sm:$0xf] %vm2230_vm11, %v2137_v5  ;;  %v2135_v22 = vpop.permute.xlu0 %2134  ;;  %v2857_v19 = vsel %vm5729_vm2, %v2852_v11, %v2856_v12  ;;  %v3217_v5 = vrot.slane %v5104_v15, 5  ;;  %v4915_v15 = vld [vmem:[%s5718_s19 + $0xc4] sm:$0xf] }
 0x1d6   : > { %2231 = vst.msk [vmem:[#allocation2] sm:$0xf] %vm2230_vm11, %v2135_v22  ;;  %2146 = vrot.lane.b32.xlu2 %v2046_v30, %s5669_s24  ;;  %v5103_v22 = vld [vmem:[%s5718_s19 + $0xc0] sm:$0xe] }
 0x1d7   : > { %2428 = vst.msk [vmem:[#allocation2] sm:$0xf] %vm2427_vm12, %v2332_v33  ;;  %v4913_v33 = vld [vmem:[%s5718_s19 + $0xbc] sm:$0x1]  ;;  %v3219_v30 = vrot.slane %v3217_v5, 4  ;;  %v5123_v27 = vrot.slane %v5103_v22, 9 }
 0x1d8   : > { %v2139_v35 = vpop.permute.xlu2 %2138  ;;  %v1769_v1 = vshll.u32 %v4913_v33, 16 }
 0x1d9   : > { %2233 = vst.msk [vmem:[#allocation2 + $0x8] sm:$0xf] %vm2230_vm11, %v2139_v35  ;;  %v5025_v35 = vld [vmem:[%s5718_s19 + $0x48] sm:$0xf]  ;;  %v3218_v34 = vsel %vm5919_vm5, %v5123_v27, %v3217_v5 }
 0x1da   : > { %2906 = vrot.lane.b32.xlu1 %v2603_v32, %s5670_s25  ;;  %v1771_v8 = vrot.slane %v1769_v1, 5  ;;  %v3220_v32 = vrot.slane %v5105_v21, 5  ;;  %v4929_v1 = vld [vmem:[%s5718_s19 + $0x3c] sm:$0xe] }
 0x1db   : > { %2904 = vrot.lane.b32.xlu0 %v2593_v26, %s5670_s25  ;;  %v4969_v4 = vrot.slane %v4929_v1, 9 }
 0x1dc   : > { %v2893_v38 = vpop.permute.xlu1 %2892  ;;  %v1772_v18 = vsel %vm5729_vm2, %v1767_v7, %v1771_v8  ;;  %v3221_v36 = vsel %vm5919_vm5, %v3219_v30, %v3220_v32  ;;  %v2626_v7 = vrot.slane %v2624_v60, 5 }
 0x1dd   : > { %2989 = vst.msk [vmem:[#allocation2] sm:$0xf] %vm2988_vm13, %v2893_v38  ;;  %v2334_v41 = vpop.permute.xlu0 %2333 }
 0x1de   : > { %2429 = vst.msk [vmem:[#allocation2 + $0x4] sm:$0xf] %vm2427_vm12, %v2334_v41  ;;  %2345 = vrot.lane.b32.xlu2 %v4988_v44, %s5671_s26  ;;  %v2618_v41 = vshrl.u32 %v5026_v10, 16  ;;  %v2605_v44 = vshrl.u32 %v5025_v35, 16 }
 0x1df   : > { %2990 = vst.msk [vmem:[#allocation2 + $0x4] sm:$0xf] %vm2988_vm13, %v2895_v17  ;;  %v2858_v17 = vshrl.u32 %v5056_v51, 16 }
 0x1e0   : > { %v2338_v56 = vpop.permute.xlu2 %2337  ;;  %v2620_v53 = vrot.slane %v2618_v41, 4  ;;  %v5073_v41 = vld [vmem:[%s5718_s19 + $0x48] sm:$0xe] }
 0x1e1   : > { %v2860_v23 = vrot.slane %v2858_v17, 4  ;;  %v5074_v17 = vld [vmem:[%s5718_s19 + $0x4c] sm:$0xf] }
 0x1e2   : > { %1853 = vrot.lane.b32.xlu1 %v1762_v45, %s5668_s23  ;;  %v2608_v45 = vshll.u32 %v5025_v35, 16  ;;  %v3147_v22 = vrot.slane %v5074_v17, 5  ;;  %v1787_v35 = vshrl.u32 %v4915_v15, 16 }
 0x1e3   : > { %3243 = vrot.lane.b32.xlu0 %v3144_v48, %s5672_s27  ;;  %v2861_v38 = vor.u32 %v2860_v23, %v2856_v12  ;;  %v1779_v12 = vrot.slane %v1777_v0, 5  ;;  %v5075_v23 = vld [vmem:[%s5718_s19 + $0x50] sm:$0x1] }
 0x1e4   : > { %v3232_v59 = vpop.permute.xlu1 %3231  ;;  %v2610_v49 = vrot.slane %v2608_v45, 5  ;;  %v3149_v27 = vrot.slane %v3147_v22, 4  ;;  %v3150_v10 = vrot.slane %v5075_v23, 5  ;;  %v5113_v45 = vrot.slane %v5073_v41, 9  ;;  %v5029_v23 = vld [vmem:[%s5718_s19 + $0x58] sm:$0xf] }
 0x1e5   : > { %3327 = vst.msk [vmem:[#allocation2 + $0x4] sm:$0xf] %vm3325_vm14, %v3232_v59  ;;  %v3230_v61 = vpop.permute.xlu0 %3229  ;;  %v2862_v47 = vrot.slane %v2861_v38, 4  ;;  %v4989_v59 = vld [vmem:[%s5718_s19 + $0x48] sm:$0xf]  ;;  %v1789_v46 = vrot.slane %v1787_v35, 4 }
 0x1e6   : > { %3360 = vst.msk [vmem:[#allocation2 + $0x4] sm:$0xf] %vm3358_vm15, %v5673_v62  ;;  %3241 = vrot.lane.b32.xlu2 %v3141_v63, %s5672_s27  ;;  %v1774_v63 = vshrl.u32 %v4914_v57, 16  ;;  %v4990_v38 = vld [vmem:[%s5718_s19 + $0x4c] sm:$0xf] }
 0x1e7   : > { %3326 = vst.msk [vmem:[#allocation2] sm:$0xf] %vm3325_vm14, %v3230_v61  ;;  %v2867_v51 = vsel %vm5729_vm2, %v2862_v47, %v2866_v28  ;;  %v2621_v61 = vor.u32 %v2620_v53, %v2616_v52  ;;  %v4916_v53 = vld [vmem:[%s5718_s19 + $0xc8] sm:$0x1] }
 0x1e8   : > { %3359 = vst.msk [vmem:[#allocation2] sm:$0xf] %vm3358_vm15, %v5673_v62  ;;  %v3234_v13 = vpop.permute.xlu2 %3233  ;;  %v1776_v11 = vrot.slane %v1774_v63, 4 }
 0x1ea   : > { %2192 = vrot.lane.b32.xlu1 %v2126_v2, %s5669_s24  ;;  %v2056_v2 = vsel %vm5919_vm5, %v2054_v55, %v2055_v54  ;;  %v1780_v5 = vor.u32 %v1779_v12, %v1776_v11  ;;  %v5059_v54 = vld [vmem:[%s5718_s19 + $0xd0] sm:$0xf] }
 0x1eb   : > { %2190 = vrot.lane.b32.xlu0 %v2123_v6, %s5669_s24  ;;  %v2622_v6 = vrot.slane %v2621_v61, 4 }
 0x1ec   : > { %v2336_v14 = vpop.permute.xlu1 %2335  ;;  %v1781_v30 = vrot.slane %v1780_v5, 4 }
 0x1ed   : > { %2430 = vst.msk [vmem:[#allocation2 + $0x8] sm:$0xf] %vm2427_vm12, %v2336_v14  ;;  %v2141_v16 = vpop.permute.xlu0 %2140 }
 0x1ee   : > { %2234 = vst.msk [vmem:[#allocation2 + $0xc] sm:$0xf] %vm2230_vm11, %v2141_v16  ;;  %1855 = vrot.lane.b32.xlu2 %v1772_v18, %s5668_s23  ;;  %v2053_v18 = vsel %vm5919_vm5, %v4969_v4, %v2052_v43  ;;  %v4964_v43 = vld [vmem:[%s5718_s19 + $0xc8] sm:$0x1] }
 0x1ef   : > { %2431 = vst.msk [vmem:[#allocation2 + $0xc] sm:$0xf] %vm2427_vm12, %v2338_v56  ;;  %v2607_v56 = vrot.slane %v2605_v44, 4  ;;  %v4962_v44 = vld [vmem:[%s5718_s19 + $0xc0] sm:$0xe]  ;;  %v2132_v28 = vrot.slane %v4964_v43, 5 }
 0x1f0   : > { %v2185_v42 = vpop.permute.xlu2 %2184  ;;  %v4980_v55 = vrot.slane %v4962_v44, 9 }
 0x1f1   : > { %2256 = vst.msk [vmem:[#allocation2 + $0x64] sm:$0xf] %vm2230_vm11, %v2185_v42  ;;  %v2611_v3 = vor.u32 %v2610_v49, %v2607_v56  ;;  %v3148_v49 = vsel %vm5919_vm5, %v5113_v45, %v3147_v22 }
 0x1f2   : > { %2948 = vrot.lane.b32.xlu1 %v2857_v19, %s5670_s25  ;;  %v2627_v19 = vsel %vm5729_vm2, %v2622_v6, %v2626_v7  ;;  %v5107_v6 = vld [vmem:[%s5718_s19 + $0xd0] sm:$0xf] }
 0x1f3   : > { %2389 = vrot.lane.b32.xlu0 %v5010_v20, %s5671_s26  ;;  %v2612_v14 = vrot.slane %v2611_v3, 4  ;;  %v1783_v20 = vshll.u32 %v4915_v15, 16  ;;  %v5108_v15 = vld [vmem:[%s5718_s19 + $0xd4] sm:$0x1] }
 0x1f4   : > { %v2899_v26 = vpop.permute.xlu1 %2898 }
 0x1f5   : > { %2992 = vst.msk [vmem:[#allocation2 + $0xc] sm:$0xf] %vm2988_vm13, %v2899_v26  ;;  %v2897_v29 = vpop.permute.xlu0 %2896  ;;  %v2617_v21 = vsel %vm5729_vm2, %v2612_v14, %v2616_v52  ;;  %v1785_v32 = vrot.slane %v1783_v20, 5  ;;  %v5012_v14 = vld [vmem:[%s5718_s19 + $0xd0] sm:$0xf] }
 0x1f6   : > { %2991 = vst.msk [vmem:[#allocation2 + $0x8] sm:$0xf] %vm2988_vm13, %v2897_v29  ;;  %2387 = vrot.lane.b32.xlu2 %v5009_v37, %s5671_s26  ;;  %v5058_v29 = vld [vmem:[%s5718_s19 + $0xcc] sm:$0xf]  ;;  %v2129_v37 = vrot.slane %v4963_v24, 5 }
 0x1f7   : > { %3328 = vst.msk [vmem:[#allocation2 + $0x8] sm:$0xf] %vm3325_vm14, %v3234_v13  ;;  %v1786_v39 = vsel %vm5729_vm2, %v1781_v30, %v1785_v32  ;;  %v2872_v40 = vshll.u32 %v5058_v29, 16  ;;  %v1790_v57 = vor.u32 %v1789_v46, %v1785_v32  ;;  %v5060_v20 = vld [vmem:[%s5718_s19 + $0xd4] sm:$0x1] }
 0x1f8   : > { %3361 = vst.msk [vmem:[#allocation2 + $0x8] sm:$0xf] %vm3358_vm15, %v5673_v62  ;;  %v2941_v48 = vpop.permute.xlu2 %2940  ;;  %v2131_v47 = vrot.slane %v2129_v37, 4  ;;  %v2130_v61 = vsel %vm5919_vm5, %v4980_v55, %v2129_v37  ;;  %v4933_v32 = vld [vmem:[%s5718_s19 + $0x4c] sm:$0xf] }
 0x1f9   : > { %v2874_v52 = vrot.slane %v2872_v40, 5  ;;  %v1791_v63 = vrot.slane %v1790_v57, 4  ;;  %v5011_v24 = vld [vmem:[%s5718_s19 + $0xcc] sm:$0xf]  ;;  %v2059_v37 = vrot.slane %v4933_v32, 5 }
 0x1fa   : > { %3287 = vrot.lane.b32.xlu1 %v3221_v36, %s5672_s27  ;;  %v2869_v36 = vshrl.u32 %v5058_v29, 16  ;;  %v2638_v29 = vshll.u32 %v5029_v23, 16  ;;  %v4992_v32 = vld [vmem:[%s5718_s19 + $0x58] sm:$0xf] }
 0x1fb   : > { %3285 = vrot.lane.b32.xlu0 %v3218_v34, %s5672_s27  ;;  %v3151_v34 = vsel %vm5919_vm5, %v3149_v27, %v3150_v10  ;;  %v2888_v27 = vshll.u32 %v5060_v20, 16  ;;  %v2061_v46 = vrot.slane %v2059_v37, 4  ;;  %v5263_v20 = vld [vmem:[%s8347_s1 + $0x90] sm:$0xf] }
 0x1fc   : > { %v2183_v31 = vpop.permute.xlu1 %2182  ;;  %v2871_v50 = vrot.slane %v2869_v36, 4  ;;  %v4934_v36 = vld [vmem:[%s5718_s19 + $0x50] sm:$0x1]  ;;  %v2640_v43 = vrot.slane %v2638_v29, 5  ;;  %v5076_v29 = vld [vmem:[%s5718_s19 + $0x54] sm:$0xe] }
 0x1fd   : > { %2255 = vst.msk [vmem:[#allocation2 + $0x60] sm:$0xf] %vm2230_vm11, %v2183_v31  ;;  %v3236_v33 = vpop.permute.xlu0 %3235  ;;  %v2890_v41 = vrot.slane %v2888_v27, 5 }
 0x1fe   : > { %3329 = vst.msk [vmem:[#allocation2 + $0xc] sm:$0xf] %vm3325_vm14, %v3236_v33  ;;  %2950 = vrot.lane.b32.xlu2 %v2867_v51, %s5670_s25  ;;  %v1793_v33 = vshll.u32 %v4916_v53, 16  ;;  %v2875_v60 = vor.u32 %v2874_v52, %v2871_v50  ;;  %v2878_v51 = vshll.u32 %v5059_v54, 16  ;;  %v4991_v53 = vld [vmem:[%s5718_s19 + $0x54] sm:$0xf] }
 0x1ff   : > { %3362 = vst.msk [vmem:[#allocation2 + $0xc] sm:$0xf] %vm3358_vm15, %v5673_v62 }
 0x200   : > { %v3280_v8 = vpop.permute.xlu2 %3279  ;;  %v1795_v0 = vrot.slane %v1793_v33, 5  ;;  %v2876_v1 = vrot.slane %v2875_v60, 4 }
 0x202   : > { %2347 = vrot.lane.b32.xlu1 %v4989_v59, %s5671_s26  ;;  %v2133_v59 = vsel %vm5919_vm5, %v2131_v47, %v2132_v28  ;;  %v1796_v11 = vsel %vm5729_vm2, %v1791_v63, %v1795_v0  ;;  %v2062_v47 = vrot.slane %v4934_v36, 5  ;;  %v5030_v28 = vld [vmem:[%s5718_s19 + $0x5c] sm:$0x1]  ;;  %v5352_v36 = vld [vmem:[%s8347_s1 + $0x80] sm:$0xf0] }
 0x203   : > { %2152 = vrot.lane.b32.xlu0 %v2056_v2, %s5669_s24  ;;  %v2880_v2 = vrot.slane %v2878_v51, 5 }
 0x204   : > { %v2382_v13 = vpop.permute.xlu1 %2381 }
 0x205   : > { %2453 = vst.msk [vmem:[#allocation2 + $0x64] sm:$0xf] %vm2427_vm12, %v2382_v13  ;;  %v2380_v16 = vpop.permute.xlu0 %2379  ;;  %v2881_v12 = vsel %vm5729_vm2, %v2876_v1, %v2880_v2  ;;  %v3224_v13 = vrot.slane %v5107_v6, 5  ;;  %v6899_v1 = vld [vmem:[%s5718_s19 + $0x58] sm:$0xf] }
 0x206   : > { %2452 = vst.msk [vmem:[#allocation2 + $0x60] sm:$0xf] %vm2427_vm12, %v2380_v16  ;;  %2150 = vrot.lane.b32.xlu2 %v2053_v18, %s5669_s24  ;;  %v5106_v16 = vld [vmem:[%s5718_s19 + $0xcc] sm:$0xe] }
 0x207   : > { %3013 = vst.msk [vmem:[#allocation2 + $0x60] sm:$0xf] %vm2988_vm13, %v2941_v48  ;;  %v3226_v18 = vrot.slane %v3224_v13, 4  ;;  %v5124_v22 = vrot.slane %v5106_v16, 9 }
 0x208   : > { %v2340_v42 = vpop.permute.xlu2 %2339 }
 0x209   : > { %v3225_v35 = vsel %vm5919_vm5, %v5124_v22, %v3224_v13 }
 0x20a   : > { %2910 = vrot.lane.b32.xlu1 %v2627_v19, %s5670_s25  ;;  %v3227_v19 = vrot.slane %v5108_v15, 5 }
 0x20b   : > { %2908 = vrot.lane.b32.xlu0 %v2617_v21, %s5670_s25 }
 0x20c   : > { %v3278_v26 = vpop.permute.xlu1 %3277  ;;  %v3228_v10 = vsel %vm5919_vm5, %v3226_v18, %v3227_v19  ;;  %v5357_v18 = vld [vmem:[%s8347_s1 + $0xac] sm:$0xf] }
 0x20d   : > { %3350 = vst.msk [vmem:[#allocation2 + $0x60] sm:$0xf] %vm3325_vm14, %v3278_v26  ;;  %v2943_v9 = vpop.permute.xlu0 %2942 }
 0x20e   : > { %3383 = vst.msk [vmem:[#allocation2 + $0x60] sm:$0xf] %vm3358_vm15, %v5673_v62  ;;  %2349 = vrot.lane.b32.xlu2 %v4990_v38, %s5671_s26 }
 0x20f   : > { %3014 = vst.msk [vmem:[#allocation2 + $0x64] sm:$0xf] %vm2988_vm13, %v2943_v9  ;;  %v2642_v9 = vshrl.u32 %v5029_v23, 16 }
 0x210   : > { %3351 = vst.msk [vmem:[#allocation2 + $0x64] sm:$0xf] %vm3325_vm14, %v3280_v8  ;;  %v2903_v48 = vpop.permute.xlu2 %2902  ;;  %v2882_v8 = vshrl.u32 %v5059_v54, 16  ;;  %v2648_v54 = vshll.u32 %v5030_v28, 16 }
 0x211   : > { %3384 = vst.msk [vmem:[#allocation2 + $0x64] sm:$0xf] %vm3358_vm15, %v5673_v62  ;;  %v2644_v44 = vrot.slane %v2642_v9, 4  ;;  %v5354_v9 = vld [vmem:[%s8347_s1 + $0x94] sm:$0xf] }
 0x212   : > { %1857 = vrot.lane.b32.xlu1 %v1786_v39, %s5668_s23  ;;  %v2884_v17 = vrot.slane %v2882_v8, 4  ;;  %v2650_v60 = vrot.slane %v2648_v54, 5  ;;  %v5358_v8 = vld [vmem:[%s8347_s1 + $0xb0] sm:$0xf0] }
 0x213   : > { %3247 = vrot.lane.b32.xlu0 %v3151_v34, %s5672_s27  ;;  %v2645_v55 = vor.u32 %v2644_v44, %v2640_v43  ;;  %v5351_v44 = vld [vmem:[%s8347_s1 + $0x7c] sm:$0xf] }
 0x214   : > { %v2145_v31 = vpop.permute.xlu1 %2144  ;;  %v2885_v26 = vor.u32 %v2884_v17, %v2880_v2  ;;  %v4935_v2 = vld [vmem:[%s5718_s19 + $0x54] sm:$0xe]  ;;  %v5032_v17 = vld [vmem:[%s5718_s19 + $0x64] sm:$0xf] }
 0x215   : > { %2236 = vst.msk [vmem:[#allocation2 + $0x14] sm:$0xf] %vm2230_vm11, %v2145_v31  ;;  %v2143_v56 = vpop.permute.xlu0 %2142  ;;  %v4971_v15 = vrot.slane %v4935_v2, 9  ;;  %v2662_v27 = vshll.u32 %v5032_v17, 16  ;;  %v5346_v2 = vld [vmem:[%s8347_s1 + $0x50] sm:$0xf0] }
 0x216   : > { %2235 = vst.msk [vmem:[#allocation2 + $0x10] sm:$0xf] %vm2230_vm11, %v2143_v56  ;;  %3245 = vrot.lane.b32.xlu2 %v3148_v49, %s5672_s27  ;;  %v2886_v40 = vrot.slane %v2885_v26, 4  ;;  %v4932_v56 = vld [vmem:[%s5718_s19 + $0x48] sm:$0xe]  ;;  %v2063_v49 = vsel %vm5919_vm5, %v2061_v46, %v2062_v47 }
 0x217   : > { %2432 = vst.msk [vmem:[#allocation2 + $0x10] sm:$0xf] %vm2427_vm12, %v2340_v42  ;;  %v5028_v42 = vld [vmem:[%s5718_s19 + $0x54] sm:$0xf]  ;;  %v4970_v33 = vrot.slane %v4932_v56, 9  ;;  %v6984_v47 = vrot.slane %v2662_v27, 5 }
 0x218   : > { %v1852_v3 = vpop.permute.xlu2 %1851  ;;  %v2629_v38 = vshrl.u32 %v5028_v42, 16  ;;  %v2632_v39 = vshll.u32 %v5028_v42, 16  ;;  %v2891_v31 = vsel %vm5729_vm2, %v2886_v40, %v2890_v41 }
 0x219   : > { %1921 = vst.msk [vmem:[#allocation2 + $0x6c] sm:$0xf] %vm1893_vm10, %v1852_v3  ;;  %v6904_v3 = vld [vmem:[%s5718_s19 + $0x58] sm:$0xf] }
 0x21a   : > { %2196 = vrot.lane.b32.xlu1 %v2133_v59, %s5669_s24  ;;  %v2634_v50 = vrot.slane %v2632_v39, 5  ;;  %v2646_v59 = vrot.slane %v2645_v55, 4  ;;  %v2066_v16 = vrot.slane %v6904_v3, 5  ;;  %v5251_v39 = vld [vmem:[%s8347_s1 + $0x78] sm:$0xf] }
 0x21b   : > { %2194 = vrot.lane.b32.xlu0 %v2130_v61, %s5669_s24  ;;  %v5252_v41 = vor.u32 %v5352_v36, %v5251_v39  ;;  %v5033_v55 = vld [vmem:[%s5718_s19 + $0x68] sm:$0x1]  ;;  %v5342_v36 = vld [vmem:[%s8347_s1 + $0x34] sm:$0xf] }
 0x21c   : > { %v2901_v4 = vpop.permute.xlu1 %2900  ;;  %v2651_v6 = vsel %vm5729_vm2, %v2646_v59, %v2650_v60 }
 0x21d   : > { %2993 = vst.msk [vmem:[#allocation2 + $0x10] sm:$0xf] %vm2988_vm13, %v2901_v4  ;;  %v2342_v7 = vpop.permute.xlu0 %2341  ;;  %v2060_v4 = vsel %vm5919_vm5, %v4970_v33, %v2059_v37  ;;  %v2067_v37 = vsel %vm5919_vm5, %v4971_v15, %v2066_v16  ;;  %v5034_v15 = vld [vmem:[%s5718_s19 + $0x6c] sm:$0xf] }
 0x21e   : > { %2433 = vst.msk [vmem:[#allocation2 + $0x14] sm:$0xf] %vm2427_vm12, %v2342_v7  ;;  %1859 = vrot.lane.b32.xlu2 %v1796_v11, %s5668_s23  ;;  %v5275_v7 = vld [vmem:[%s8347_s1 + $0xa8] sm:$0xf] }
 0x21f   : > { %2994 = vst.msk [vmem:[#allocation2 + $0x14] sm:$0xf] %vm2988_vm13, %v2903_v48  ;;  %v2631_v48 = vrot.slane %v2629_v38, 4  ;;  %v5276_v13 = vor.u32 %v5358_v8, %v5275_v7  ;;  %v2672_v8 = vshll.u32 %v5033_v55, 16  ;;  %v5205_v55 = vld [vmem:[%s8347_s1 + $0x24] sm:$0xf0] }
 0x220   : > { %v2384_v5 = vpop.permute.xlu2 %2383 }
 0x221   : > { %v2635_v57 = vor.u32 %v2634_v50, %v2631_v48  ;;  %5455 = vmatpush.bf16.msra.mxu3 %v5276_v13  ;;  %3687 = vmatpush.bf16.msra.mxu0 %v5276_v13  ;;  %v5239_v50 = vld [vmem:[%s8347_s1 + $0x60] sm:$0xf]  ;;  %v2068_v13 = vrot.slane %v2066_v16, 4 }
 0x222   : > { %2952 = vrot.lane.b32.xlu1 %v2881_v12, %s5670_s25  ;;  %v3154_v12 = vrot.slane %v6899_v1, 5  ;;  %v5227_v1 = vld [vmem:[%s8347_s1 + $0x48] sm:$0xf] }
 0x223   : > { %2393 = vrot.lane.b32.xlu0 %v5012_v14, %s5671_s26  ;;  %v2636_v63 = vrot.slane %v2635_v57, 4  ;;  %v5078_v14 = vld [vmem:[%s5718_s19 + $0x5c] sm:$0x1] }
 0x224   : > { %v3240_v21 = vpop.permute.xlu1 %3239  ;;  %v3156_v23 = vrot.slane %v3154_v12, 4  ;;  %v4937_v57 = vld [vmem:[%s5718_s19 + $0x5c] sm:$0x1] }
 0x225   : > { %3331 = vst.msk [vmem:[#allocation2 + $0x14] sm:$0xf] %vm3325_vm14, %v3240_v21  ;;  %v3238_v30 = vpop.permute.xlu0 %3237  ;;  %v2641_v11 = vsel %vm5729_vm2, %v2636_v63, %v2640_v43  ;;  %v5355_v21 = vld [vmem:[%s8347_s1 + $0x98] sm:$0xf0]  ;;  %v5031_v43 = vld [vmem:[%s5718_s19 + $0x60] sm:$0xf] }
 0x226   : > { %3364 = vst.msk [vmem:[#allocation2 + $0x14] sm:$0xf] %vm3358_vm15, %v5673_v62  ;;  %2391 = vrot.lane.b32.xlu2 %v5011_v24, %s5671_s26  ;;  %v5264_v24 = vor.u32 %v5355_v21, %v5263_v20  ;;  %v2653_v33 = vshrl.u32 %v5031_v43, 16  ;;  %v2656_v59 = vshll.u32 %v5031_v43, 16  ;;  %v5203_v43 = vld [vmem:[%s8347_s1 + $0x18] sm:$0xf] }
 0x227   : > { %3330 = vst.msk [vmem:[#allocation2 + $0x10] sm:$0xf] %vm3325_vm14, %v3238_v30  ;;  %v3157_v30 = vrot.slane %v5078_v14, 5  ;;  %v2069_v14 = vrot.slane %v4937_v57, 5 }
 0x228   : > { %3363 = vst.msk [vmem:[#allocation2 + $0x10] sm:$0xf] %vm3358_vm15, %v5673_v62  ;;  %v2947_v34 = vpop.permute.xlu2 %2946  ;;  %5456 = vmatpush.bf16.msra.mxu3 %v5264_v24  ;;  %3688 = vmatpush.bf16.msra.mxu0 %v5264_v24  ;;  %v4940_v24 = vld [vmem:[%s5718_s19 + $0x68] sm:$0x1] }
 0x229   : > { %v3158_v40 = vsel %vm5919_vm5, %v3156_v23, %v3157_v30  ;;  %v5343_v23 = vld [vmem:[%s8347_s1 + $0x38] sm:$0xf0] }
 0x22a   : > { %3291 = vrot.lane.b32.xlu1 %v3228_v10, %s5672_s27  ;;  %v2666_v10 = vshrl.u32 %v5032_v17, 16  ;;  %v2655_v17 = vrot.slane %v2653_v33, 4 }
 0x22b   : > { %3289 = vrot.lane.b32.xlu0 %v3225_v35, %s5672_s27  ;;  %v5265_v35 = vld [vmem:[%s8347_s1 + $0x9c] sm:$0xf0] }
 0x22c   : > { %v2189_v45 = vpop.permute.xlu1 %2188  ;;  %v6959_v38 = vor.u32 %v5354_v9, %v5265_v35  ;;  %v2668_v28 = vrot.slane %v2666_v10, 4  ;;  %5457 = vmatpush.bf16.msra.mxu3 %v5252_v41  ;;  %3689 = vmatpush.bf16.msra.mxu0 %v5252_v41  ;;  %v2677_v9 = vshrl.u32 %v5034_v15, 16  ;;  %v2680_v35 = vshll.u32 %v5034_v15, 16 }
 0x22d   : > { %2258 = vst.msk [vmem:[#allocation2 + $0x6c] sm:$0xf] %vm2230_vm11, %v2189_v45  ;;  %v2187_v52 = vpop.permute.xlu0 %2186  ;;  %v5253_v45 = vld [vmem:[%s8347_s1 + $0x84] sm:$0xf0] }
 0x22e   : > { %2257 = vst.msk [vmem:[#allocation2 + $0x68] sm:$0xf] %vm2230_vm11, %v2187_v52  ;;  %2954 = vrot.lane.b32.xlu2 %v2891_v31, %s5670_s25  ;;  %v6986_v48 = vor.u32 %v5351_v44, %v5253_v45  ;;  %v5349_v52 = vld [vmem:[%s8347_s1 + $0x68] sm:$0xf0]  ;;  %v6995_v31 = vld [vmem:[%s5718_s19 + $0x60] sm:$0xe]  ;;  %v2669_v63 = vor.u32 %v2668_v28, %v6984_v47 }
 0x22f   : > { %2454 = vst.msk [vmem:[#allocation2 + $0x68] sm:$0xf] %vm2427_vm12, %v2384_v5  ;;  %v5277_v5 = vld [vmem:[%s8347_s1 + $0xb4] sm:$0xf0]  ;;  %v5240_v54 = vor.u32 %v5349_v52, %v5239_v50  ;;  %v5115_v7 = vrot.slane %v6995_v31, 9  ;;  %v2076_v28 = vrot.slane %v4940_v24, 5 }
 0x230   : > { %v2147_v51 = vpop.permute.xlu2 %2146  ;;  %v6941_v42 = vor.u32 %v5357_v18, %v5277_v5  ;;  %v2658_v18 = vrot.slane %v2656_v59, 5  ;;  %v5229_v5 = vld [vmem:[%s8347_s1 + $0x54] sm:$0xf0]  ;;  %v2670_v16 = vrot.slane %v2669_v63, 4  ;;  %v5340_v44 = vld [vmem:[%s8347_s1 + $0x20] sm:$0xf0] }
 0x231   : > { %2237 = vst.msk [vmem:[#allocation2 + $0x18] sm:$0xf] %vm2230_vm11, %v2147_v51  ;;  %v5348_v51 = vld [vmem:[%s8347_s1 + $0x64] sm:$0xf]  ;;  %5458 = vmatpush.bf16.msra.mxu3 %v5240_v54  ;;  %3690 = vmatpush.bf16.msra.mxu0 %v5240_v54  ;;  %v5339_v31 = vld [vmem:[%s8347_s1 + $0x1c] sm:$0xf] }
 0x232   : > { %2351 = vrot.lane.b32.xlu1 %v4991_v53, %s5671_s26  ;;  %3776 = vmatpush.bf16.msra.mxu1 %v6941_v42  ;;  %v2659_v39 = vor.u32 %v2658_v18, %v2655_v17  ;;  %v2682_v57 = vrot.slane %v2680_v35, 5  ;;  %v7103_v33 = vor.u32 %v5339_v31, %v5205_v55  ;;  %v5283_v59 = vld [vmem:[%s8347_s1 + $0xb0] sm:$0xf]  ;;  %v5337_v63 = vld [vmem:[%s8347_s1 + $0x8] sm:$0xf0] }
 0x233   : > { %2156 = vrot.lane.b32.xlu0 %v2063_v49, %s5669_s24  ;;  %v4994_v49 = vld [vmem:[%s5718_s19 + $0x64] sm:$0xf]  ;;  %v5259_v24 = vld [vmem:[%s8347_s1 + $0x80] sm:$0xf]  ;;  %v7210_v31 = vld [vmem:[%s5718_s19 + $0x70] sm:$0xf] }
 0x234   : > { %v2945_v61 = vpop.permute.xlu1 %2944 }
 0x235   : > { %3015 = vst.msk [vmem:[#allocation2 + $0x68] sm:$0xf] %vm2988_vm13, %v2945_v61  ;;  %v2386_v0 = vpop.permute.xlu0 %2385  ;;  %v5241_v61 = vld [vmem:[%s8347_s1 + $0x6c] sm:$0xf0] }
 0x236   : > { %2455 = vst.msk [vmem:[#allocation2 + $0x6c] sm:$0xf] %vm2427_vm12, %v2386_v0  ;;  %2154 = vrot.lane.b32.xlu2 %v2060_v4, %s5669_s24  ;;  %3777 = vmatpush.bf16.msra.mxu1 %v6959_v38  ;;  %v7015_v0 = vor.u32 %v5348_v51, %v5241_v61  ;;  %v4993_v4 = vld [vmem:[%s5718_s19 + $0x60] sm:$0xf]  ;;  %v5359_v51 = vld [vmem:[%s8347_s1 + $0xb8] sm:$0xf0] }
 0x237   : > { %3016 = vst.msk [vmem:[#allocation2 + $0x6c] sm:$0xf] %vm2988_vm13, %v2947_v34  ;;  %v5114_v34 = vrot.slane %v5076_v29, 9  ;;  %v4938_v29 = vld [vmem:[%s5718_s19 + $0x60] sm:$0xe] }
 0x238   : > { %v2346_v19 = vpop.permute.xlu2 %2345  ;;  %v4972_v50 = vrot.slane %v4938_v29, 9  ;;  %v5191_v61 = vld [vmem:[%s8347_s1] sm:$0xf] }
 0x239   : > { %v3155_v60 = vsel %vm5919_vm5, %v5114_v34, %v3154_v12  ;;  %v7030_v12 = vld [vmem:[%s5718_s19 + $0x64] sm:$0xf] }
 0x23a   : > { %2914 = vrot.lane.b32.xlu1 %v2651_v6, %s5670_s25  ;;  %3778 = vmatpush.bf16.msra.mxu1 %v6986_v48  ;;  %v7025_v6 = vld [vmem:[%s5718_s19 + $0x64] sm:$0xf] }
 0x23b   : > { %2912 = vrot.lane.b32.xlu0 %v2641_v11, %s5670_s25  ;;  %v5228_v11 = vor.u32 %v5346_v2, %v5227_v1  ;;  %v3161_v3 = vrot.slane %v7025_v6, 5  ;;  %v5081_v2 = vld [vmem:[%s5718_s19 + $0x68] sm:$0x1]  ;;  %v5353_v6 = vld [vmem:[%s8347_s1 + $0x88] sm:$0xf0] }
 0x23c   : > { %v3284_v22 = vpop.permute.xlu1 %3283 }
 0x23d   : > { %3353 = vst.msk [vmem:[#allocation2 + $0x6c] sm:$0xf] %vm3325_vm14, %v3284_v22  ;;  %v3282_v26 = vpop.permute.xlu0 %3281  ;;  %5459 = vmatpush.bf16.msra.mxu3 %v5228_v11  ;;  %v5215_v22 = vld [vmem:[%s8347_s1 + $0x30] sm:$0xf]  ;;  %3691 = vmatpush.bf16.msra.mxu0 %v5228_v11  ;;  %v3162_v41 = vsel %vm5919_vm5, %v5115_v7, %v3161_v3  ;;  %v5192_v7 = vor.u32 %v5337_v63, %v5191_v61  ;;  %v5223_v61 = vld [vmem:[%s8347_s1 + $0x38] sm:$0xf] }
 0x23e   : > { %3386 = vst.msk [vmem:[#allocation2 + $0x6c] sm:$0xf] %vm3358_vm15, %v5673_v62  ;;  %2353 = vrot.lane.b32.xlu2 %v4992_v32, %s5671_s26  ;;  %3779 = vmatpush.bf16.msra.mxu1 %v7015_v0  ;;  %v2674_v32 = vrot.slane %v2672_v8, 5  ;;  %v5216_v27 = vor.u32 %v5343_v23, %v5215_v22  ;;  %v3164_v22 = vrot.slane %v5081_v2, 5  ;;  %v7160_v23 = vld [vmem:[#allocation2] sm:$0xff] }
 0x23f   : > { %3352 = vst.msk [vmem:[#allocation2 + $0x68] sm:$0xf] %vm3325_vm14, %v3282_v26  ;;  %v2073_v26 = vrot.slane %v7030_v12, 5  ;;  %v3163_v12 = vrot.slane %v3161_v3, 4  ;;  %v5344_v63 = vld [vmem:[%s8347_s1 + $0x40] sm:$0xf0] }
 0x240   : > { %3385 = vst.msk [vmem:[#allocation2 + $0x68] sm:$0xf] %vm3358_vm15, %v5673_v62  ;;  %v6982_v46 = vpop.permute.xlu2 %3241  ;;  %v2675_v45 = vsel %vm5729_vm2, %v2670_v16, %v2674_v32  ;;  %v5356_v16 = vld [vmem:[%s8347_s1 + $0xa0] sm:$0xf0] }
 0x241   : > { %5460 = vmatpush.bf16.msra.mxu3 %v5216_v27  ;;  %3692 = vmatpush.bf16.msra.mxu0 %v5216_v27  ;;  %v2075_v52 = vrot.slane %v2073_v26, 4  ;;  %v7174_v27 = vor.u32 %v5353_v6, %v5259_v24  ;;  %v3165_v35 = vsel %vm5919_vm5, %v3163_v12, %v3164_v22  ;;  %v5211_v12 = vld [vmem:[%s8347_s1 + $0x20] sm:$0xf] }
 0x242   : > { %2158 = vrot.lane.b32.xlu1 %v2067_v37, %s5669_s24  ;;  %v2070_v37 = vsel %vm5919_vm5, %v2068_v13, %v2069_v14  ;;  %v5336_v13 = vld [vmem:[%s8347_s1 + $0x4] sm:$0xf]  ;;  %v5193_v14 = vld [vmem:[%s8347_s1 + $0xc] sm:$0xf0] }
 0x243   : > { %3251 = vrot.lane.b32.xlu0 %v3158_v40, %s5672_s27  ;;  %v5217_v40 = vld [vmem:[%s8347_s1 + $0x3c] sm:$0xf0]  ;;  %v2077_v8 = vsel %vm5919_vm5, %v2075_v52, %v2076_v28  ;;  %v7140_v18 = vor.u32 %v5336_v13, %v5193_v14  ;;  %v5235_v28 = vld [vmem:[%s8347_s1 + $0x50] sm:$0xf]  ;;  %v2080_v13 = vrot.slane %v7210_v31, 5 }
 0x244   : > { %v2344_v53 = vpop.permute.xlu1 %2343  ;;  %v7074_v34 = vor.u32 %v5342_v36, %v5217_v40  ;;  %v5350_v36 = vld [vmem:[%s8347_s1 + $0x70] sm:$0xf0]  ;;  %v4996_v40 = vld [vmem:[%s5718_s19 + $0x70] sm:$0xf] }
 0x245   : > { %2434 = vst.msk [vmem:[#allocation2 + $0x18] sm:$0xf] %vm2427_vm12, %v2344_v53  ;;  %v2149_v56 = vpop.permute.xlu0 %2148  ;;  %v2660_v53 = vrot.slane %v2659_v39, 4  ;;  %v2082_v6 = vrot.slane %v2080_v13, 4 }
 0x246   : > { %2238 = vst.msk [vmem:[#allocation2 + $0x1c] sm:$0xf] %vm2230_vm11, %v2149_v56  ;;  %3249 = vrot.lane.b32.xlu2 %v3155_v60, %s5672_s27  ;;  %v7101_v56 = vld [vmem:[%s5718_s19 + $0x70] sm:$0xf] }
 0x247   : > { %2435 = vst.msk [vmem:[#allocation2 + $0x1c] sm:$0xf] %vm2427_vm12, %v2346_v19  ;;  %v5345_v19 = vld [vmem:[%s8347_s1 + $0x4c] sm:$0xf]  ;;  %v2665_v11 = vsel %vm5729_vm2, %v2660_v53, %v6984_v47  ;;  %v2686_v17 = vshll.u32 %v7101_v56, 16  ;;  %v7138_v47 = vld [vmem:[#allocation2 + $0x60] sm:$0xff] }
 0x248   : > { %v1856_v20 = vpop.permute.xlu2 %1855  ;;  %v7045_v21 = vor.u32 %v5345_v19, %v5229_v5  ;;  %v5271_v19 = vld [vmem:[%s8347_s1 + $0x98] sm:$0xf]  ;;  %v2074_v5 = vsel %vm5919_vm5, %v4972_v50, %v2073_v26  ;;  %v5083_v26 = vld [vmem:[%s5718_s19 + $0x70] sm:$0xf]  ;;  %v2690_v29 = vshrl.u32 %v7101_v56, 16 }
 0x249   : > { %1923 = vst.msk [vmem:[#allocation2 + $0x74] sm:$0xf] %vm1893_vm10, %v1856_v20  ;;  %v7154_v20 = vor.u32 %v5356_v16, %v5271_v19  ;;  %v3168_v39 = vrot.slane %v5083_v26, 5  ;;  %v5038_v56 = vld [vmem:[%s5718_s19 + $0x7c] sm:$0xf]  ;;  %v7248_v16 = vld [vmem:[#allocation2 + $0x8] sm:$0xff] }
 0x24a   : > { %2357 = vrot.lane.b32.xlu1 %v4994_v49, %s5671_s26  ;;  %3780 = vmatpush.bf16.msra.mxu1 %v7045_v21  ;;  %v2679_v49 = vrot.slane %v2677_v9, 4  ;;  %v5084_v9 = vld [vmem:[%s5718_s19 + $0x74] sm:$0x1]  ;;  %v2710_v2 = vshll.u32 %v5038_v56, 16 }
 0x24b   : > { %2355 = vrot.lane.b32.xlu0 %v4993_v4, %s5671_s26  ;;  %v7119_v4 = vor.u32 %v5359_v51, %v5283_v59  ;;  %v3170_v50 = vrot.slane %v3168_v39, 4  ;;  %v5037_v59 = vld [vmem:[%s5718_s19 + $0x78] sm:$0xf] }
 0x24c   : > { %v2907_v30 = vpop.permute.xlu1 %2906  ;;  %v2683_v15 = vor.u32 %v2682_v57, %v2679_v49  ;;  %v2701_v14 = vshrl.u32 %v5037_v59, 16 }
 0x24d   : > { %2996 = vst.msk [vmem:[#allocation2 + $0x1c] sm:$0xf] %vm2988_vm13, %v2907_v30  ;;  %v2905_v10 = vpop.permute.xlu0 %2904  ;;  %3865 = vmatpush.bf16.msra.mxu2 %v7119_v4 }
 0x24e   : > { %2995 = vst.msk [vmem:[#allocation2 + $0x18] sm:$0xf] %vm2988_vm13, %v2905_v10  ;;  %2160 = vrot.lane.b32.xlu2 %v2070_v37, %s5669_s24  ;;  %3781 = vmatpush.bf16.msra.mxu1 %v7074_v34  ;;  %v2684_v30 = vrot.slane %v2683_v15, 4  ;;  %v5247_v37 = vld [vmem:[%s8347_s1 + $0x68] sm:$0xf]  ;;  %v2704_v15 = vshll.u32 %v5037_v59, 16 }
 0x24f   : > { %3332 = vst.msk [vmem:[#allocation2 + $0x18] sm:$0xf] %vm3325_vm14, %v6982_v46  ;;  %v5204_v46 = vor.u32 %v5340_v44, %v5203_v43  ;;  %v7199_v43 = vor.u32 %v5350_v36, %v5247_v37  ;;  %v3171_v44 = vrot.slane %v5084_v9, 5  ;;  %v2703_v26 = vrot.slane %v2701_v14, 4  ;;  %v4945_v59 = vld [vmem:[%s5718_s19 + $0x7c] sm:$0xf] }
 0x250   : > { %3365 = vst.msk [vmem:[#allocation2 + $0x18] sm:$0xf] %vm3358_vm15, %v5673_v62  ;;  %v7098_v54 = vpop.permute.xlu2 %2387  ;;  %v5085_v14 = vld [vmem:[%s5718_s19 + $0x78] sm:$0xe] }
 0x251   : > { %5461 = vmatpush.bf16.msra.mxu3 %v5204_v46  ;;  %3693 = vmatpush.bf16.msra.mxu0 %v5204_v46  ;;  %v2692_v46 = vrot.slane %v2690_v29, 4 }
 0x252   : > { %3253 = vrot.lane.b32.xlu1 %v3162_v41, %s5672_s27  ;;  %3782 = vmatpush.bf16.msra.mxu1 %v7103_v33  ;;  %v5082_v41 = vld [vmem:[%s5718_s19 + $0x6c] sm:$0xe] }
 0x253   : > { %2918 = vrot.lane.b32.xlu0 %v2675_v45, %s5670_s25  ;;  %3866 = vmatpush.bf16.msra.mxu2 %v7154_v20  ;;  %v5036_v45 = vld [vmem:[%s5718_s19 + $0x74] sm:$0x1]  ;;  %v5116_v52 = vrot.slane %v5082_v41, 9 }
 0x254   : > { %v1854_v60 = vpop.permute.xlu1 %1853 }
 0x255   : > { %1922 = vst.msk [vmem:[#allocation2 + $0x70] sm:$0xf] %vm1893_vm10, %v1854_v60  ;;  %v3244_v1 = vpop.permute.xlu0 %3243  ;;  %5462 = vmatpush.bf16.msra.mxu3 %v5192_v7  ;;  %3694 = vmatpush.bf16.msra.mxu0 %v5192_v7  ;;  %v2696_v60 = vshll.u32 %v5036_v45, 16  ;;  %v2714_v7 = vshrl.u32 %v5038_v56, 16 }
 0x256   : > { %3333 = vst.msk [vmem:[#allocation2 + $0x1c] sm:$0xf] %vm3325_vm14, %v3244_v1  ;;  %2916 = vrot.lane.b32.xlu2 %v2665_v11, %s5670_s25  ;;  %3783 = vmatpush.bf16.msra.mxu1 %v7140_v18  ;;  %v3172_v1 = vsel %vm5919_vm5, %v3170_v50, %v3171_v44  ;;  %v4943_v11 = vld [vmem:[%s5718_s19 + $0x74] sm:$0x1] }
 0x257   : > { %3366 = vst.msk [vmem:[#allocation2 + $0x1c] sm:$0xf] %vm3358_vm15, %v5673_v62  ;;  %3867 = vmatpush.bf16.msra.mxu2 %v7174_v27  ;;  %v2083_v22 = vrot.slane %v4943_v11, 5  ;;  %v5041_v11 = vld [vmem:[%s5718_s19 + $0x88] sm:$0xf] }
 0x258   : > { %3755 = vmatmul.bf16.vlgmr.msra.gmra.mxu3 %v7138_v47  ;;  %v2951_v32 = vpop.permute.xlu2 %2950  ;;  %3695 = vmatmul.bf16.vlgmr.msra.gmra.mxu0 %v7160_v23 }
 0x259   : > { %5463 = vmatpush.bf16.msrb.mxu3 %v6941_v42  ;;  %v7163_v42 = vrot.slane %v2686_v17, 5  ;;  %3784 = vmatmul.bf16.vlgmr.msra.gmra.mxu1 %v7160_v23  ;;  %v7242_v17 = vor.u32 %v5344_v63, %v5223_v61  ;;  %v2084_v41 = vsel %vm5919_vm5, %v2082_v6, %v2083_v22  ;;  %v2087_v61 = vrot.slane %v4945_v59, 5  ;;  %v5000_v6 = vld [vmem:[%s5718_s19 + $0x88] sm:$0xf] }
 0x25a   : > { %2164 = vrot.lane.b32.xlu1 %v2077_v8, %s5669_s24  ;;  %v7237_v8 = vld [vmem:[#allocation2 + $0x68] sm:$0xff] }
 0x25b   : > { %2162 = vrot.lane.b32.xlu0 %v2074_v5, %s5669_s24  ;;  %3868 = vmatpush.bf16.msra.mxu2 %v7199_v43  ;;  %v2693_v51 = vor.u32 %v2692_v46, %v7163_v42  ;;  %v2698_v5 = vrot.slane %v2696_v60, 5 }
 0x25c   : > { %v2193_v3 = vpop.permute.xlu1 %2192 }
 0x25d   : > { %2260 = vst.msk [vmem:[#allocation2 + $0x74] sm:$0xf] %vm2230_vm11, %v2193_v3  ;;  %v2191_v10 = vpop.permute.xlu0 %2190  ;;  %5464 = vmatpush.bf16.msrb.mxu3 %v6959_v38  ;;  %v2689_v38 = vsel %vm5729_vm2, %v2684_v30, %v7163_v42  ;;  %v2694_v19 = vrot.slane %v2693_v51, 4  ;;  %v2712_v42 = vrot.slane %v2710_v2, 5  ;;  %v5039_v3 = vld [vmem:[%s5718_s19 + $0x80] sm:$0x1] }
 0x25e   : > { %2259 = vst.msk [vmem:[#allocation2 + $0x70] sm:$0xf] %vm2230_vm11, %v2191_v10  ;;  %3255 = vrot.lane.b32.xlu2 %v3165_v35, %s5672_s27  ;;  %v2706_v10 = vrot.slane %v2704_v15, 5  ;;  %v4997_v35 = vld [vmem:[%s5718_s19 + $0x78] sm:$0xf] }
 0x25f   : > { %2456 = vst.msk [vmem:[#allocation2 + $0x70] sm:$0xf] %vm2427_vm12, %v7098_v54  ;;  %v4995_v54 = vld [vmem:[%s5718_s19 + $0x6c] sm:$0xf]  ;;  %v2699_v37 = vsel %vm5729_vm2, %v2694_v19, %v2698_v5  ;;  %v5087_v51 = vld [vmem:[%s5718_s19 + $0x80] sm:$0x1] }
 0x260   : > { %v2151_v53 = vpop.permute.xlu2 %2150  ;;  %v2707_v44 = vor.u32 %v2706_v10, %v2703_v26  ;;  %v3178_v2 = vrot.slane %v5087_v51, 5  ;;  %v2734_v19 = vshll.u32 %v5041_v11, 16  ;;  %v2738_v5 = vshrl.u32 %v5041_v11, 16  ;;  %v4947_v51 = vld [vmem:[%s5718_s19 + $0x84] sm:$0xe] }
 0x261   : > { %5465 = vmatpush.bf16.msrb.mxu3 %v6986_v48  ;;  %v5347_v48 = vld [vmem:[%s8347_s1 + $0x58] sm:$0xf0]  ;;  %2239 = vst.msk [vmem:[#allocation2 + $0x20] sm:$0xf] %vm2230_vm11, %v2151_v53  ;;  %v5044_v11 = vld [vmem:[%s5718_s19 + $0x94] sm:$0xf] }
 0x262   : > { %2920 = vrot.lane.b32.xlu1 %v2689_v38, %s5670_s25  ;;  %v7219_v49 = vor.u32 %v5347_v48, %v5235_v28  ;;  %v5199_v38 = vld [vmem:[%s8347_s1 + $0x8] sm:$0xf]  ;;  %v2708_v31 = vrot.slane %v2707_v44, 4  ;;  %v7357_v44 = vld [vmem:[#allocation2 + $0x18] sm:$0xff] }
 0x263   : > { %2361 = vrot.lane.b32.xlu0 %v4996_v40, %s5671_s26  ;;  %v4941_v40 = vld [vmem:[%s5718_s19 + $0x6c] sm:$0xe] }
 0x264   : > { %v2949_v55 = vpop.permute.xlu1 %2948  ;;  %3869 = vmatpush.bf16.msra.mxu2 %v7219_v49  ;;  %v4973_v46 = vrot.slane %v4941_v40, 9 }
 0x265   : > { %3017 = vst.msk [vmem:[#allocation2 + $0x70] sm:$0xf] %vm2988_vm13, %v2949_v55  ;;  %v2390_v57 = vpop.permute.xlu0 %2389  ;;  %5466 = vmatpush.bf16.msrb.mxu3 %v7015_v0  ;;  %v3169_v0 = vsel %vm5919_vm5, %v5116_v52, %v3168_v39  ;;  %v5338_v39 = vld [vmem:[%s8347_s1 + $0x10] sm:$0xf0]  ;;  %v5086_v55 = vld [vmem:[%s5718_s19 + $0x7c] sm:$0xf] }
 0x266   : > { %2457 = vst.msk [vmem:[#allocation2 + $0x74] sm:$0xf] %vm2427_vm12, %v2390_v57  ;;  %2359 = vrot.lane.b32.xlu2 %v4995_v54, %s5671_s26  ;;  %v7283_v45 = vor.u32 %v5338_v39, %v5199_v38  ;;  %v2713_v57 = vsel %vm5729_vm2, %v2708_v31, %v2712_v42  ;;  %v3175_v60 = vrot.slane %v5086_v55, 5  ;;  %v5043_v31 = vld [vmem:[%s5718_s19 + $0x90] sm:$0xf] }
 0x267   : > { %3018 = vst.msk [vmem:[#allocation2 + $0x74] sm:$0xf] %vm2988_vm13, %v2951_v32  ;;  %v2716_v32 = vrot.slane %v2714_v7, 4 }
 0x268   : > { %3760 = vmatmul.bf16.gmra.mxu3 %v7237_v8  ;;  %v2350_v30 = vpop.permute.xlu2 %2349  ;;  %3870 = vmatpush.bf16.msra.mxu2 %v7242_v17 }
 0x269   : > { %5467 = vmatpush.bf16.msrb.mxu3 %v7045_v21  ;;  %v5341_v21 = vld [vmem:[%s8347_s1 + $0x28] sm:$0xf0]  ;;  %3700 = vmatmul.bf16.gmra.mxu0 %v7248_v16  ;;  %v2717_v36 = vor.u32 %v2716_v32, %v2712_v42  ;;  %v7336_v42 = vrot.slane %v2734_v19, 5  ;;  %v2740_v32 = vrot.slane %v2738_v5, 4 }
 0x26a   : > { %3259 = vrot.lane.b32.xlu1 %v3172_v1, %s5672_s27  ;;  %v7259_v29 = vor.u32 %v5341_v21, %v5211_v12  ;;  %3789 = vmatmul.bf16.gmra.mxu1 %v7248_v16  ;;  %v5117_v12 = vrot.slane %v5085_v14, 9  ;;  %v5090_v19 = vld [vmem:[%s5718_s19 + $0x8c] sm:$0x1] }
 0x26b   : > { %3257 = vrot.lane.b32.xlu0 %v3169_v0, %s5672_s27  ;;  %v2718_v28 = vrot.slane %v2717_v36, 4  ;;  %v3177_v0 = vrot.slane %v3175_v60, 4  ;;  %v2741_v38 = vor.u32 %v2740_v32, %v7336_v42  ;;  %v2089_v36 = vrot.slane %v2087_v61, 4 }
 0x26c   : > { %v3288_v24 = vpop.permute.xlu1 %3287  ;;  %3871 = vmatpush.bf16.msra.mxu2 %v7259_v29 }
 0x26d   : > { %3355 = vst.msk [vmem:[#allocation2 + $0x74] sm:$0xf] %vm3325_vm14, %v3288_v24  ;;  %v3286_v9 = vpop.permute.xlu0 %3285  ;;  %5468 = vmatpush.bf16.msrb.mxu3 %v7074_v34  ;;  %v2720_v34 = vshll.u32 %v5039_v3, 16  ;;  %v3179_v15 = vsel %vm5919_vm5, %v3177_v0, %v3178_v2  ;;  %v5042_v24 = vld [vmem:[%s5718_s19 + $0x8c] sm:$0x1]  ;;  %v3176_v3 = vsel %vm5919_vm5, %v5117_v12, %v3175_v60 }
 0x26e   : > { %3388 = vst.msk [vmem:[#allocation2 + $0x74] sm:$0xf] %vm3358_vm15, %v5673_v62  ;;  %2922 = vrot.lane.b32.xlu2 %v2699_v37, %s5670_s25  ;;  %v7352_v37 = vld [vmem:[%s5718_s19 + $0x88] sm:$0xf]  ;;  %v2744_v39 = vshll.u32 %v5042_v24, 16 }
 0x26f   : > { %3354 = vst.msk [vmem:[#allocation2 + $0x70] sm:$0xf] %vm3325_vm14, %v3286_v9  ;;  %v2722_v50 = vrot.slane %v2720_v34, 5  ;;  %v4946_v9 = vld [vmem:[%s5718_s19 + $0x80] sm:$0x1] }
 0x270   : > { %3387 = vst.msk [vmem:[#allocation2 + $0x70] sm:$0xf] %vm3358_vm15, %v5673_v62  ;;  %v3246_v52 = vpop.permute.xlu2 %3245  ;;  %3872 = vmatpush.bf16.msra.mxu2 %v7283_v45  ;;  %v2090_v34 = vrot.slane %v4946_v9, 5  ;;  %v4949_v60 = vld [vmem:[%s5718_s19 + $0x8c] sm:$0x1] }
 0x271   : > { %5469 = vmatpush.bf16.msrb.mxu3 %v7103_v33  ;;  %v2081_v33 = vsel %vm5919_vm5, %v4973_v46, %v2080_v13  ;;  %v2723_v54 = vsel %vm5729_vm2, %v2718_v28, %v2722_v50  ;;  %v4998_v13 = vld [vmem:[%s5718_s19 + $0x7c] sm:$0xf]  ;;  %v2742_v50 = vrot.slane %v2741_v38, 4  ;;  %v5093_v9 = vld [vmem:[%s5718_s19 + $0x98] sm:$0x1] }
 0x272   : > { %2363 = vrot.lane.b32.xlu1 %v4997_v35, %s5671_s26  ;;  %v5088_v35 = vld [vmem:[%s5718_s19 + $0x84] sm:$0xe]  ;;  %v2091_v55 = vsel %vm5919_vm5, %v2089_v36, %v2090_v34  ;;  %v5045_v34 = vld [vmem:[%s5718_s19 + $0x98] sm:$0x1] }
 0x273   : > { %2168 = vrot.lane.b32.xlu0 %v2084_v41, %s5669_s24  ;;  %3873 = vmatmul.bf16.vlgmr.msra.gmra.mxu2 %v7160_v23 }
 0x274   : > { %v2348_v53 = vpop.permute.xlu1 %2347 }
 0x275   : > { %2436 = vst.msk [vmem:[#allocation2 + $0x20] sm:$0xf] %vm2427_vm12, %v2348_v53  ;;  %v2153_v48 = vpop.permute.xlu0 %2152  ;;  %5470 = vmatpush.bf16.msrb.mxu3 %v7140_v18  ;;  %v4944_v18 = vld [vmem:[%s5718_s19 + $0x78] sm:$0xe]  ;;  %v4948_v53 = vld [vmem:[%s5718_s19 + $0x88] sm:$0xf] }
 0x276   : > { %2240 = vst.msk [vmem:[#allocation2 + $0x24] sm:$0xf] %vm2230_vm11, %v2153_v48  ;;  %2166 = vrot.lane.b32.xlu2 %v2081_v33, %s5669_s24  ;;  %v4974_v23 = vrot.slane %v4944_v18, 9  ;;  %v2752_v18 = vshll.u32 %v5043_v31, 16 }
 0x277   : > { %2437 = vst.msk [vmem:[#allocation2 + $0x24] sm:$0xf] %vm2427_vm12, %v2350_v30  ;;  %v7301_v56 = vld [vmem:[#allocation2 + $0x70] sm:$0xff] }
 0x278   : > { %3765 = vmatmul.bf16.gmra.mxu3 %v7301_v56  ;;  %v1860_v63 = vpop.permute.xlu2 %1859  ;;  %v2754_v2 = vrot.slane %v2752_v18, 5 }
 0x279   : > { %5471 = vmatpush.bf16.msra.mxu3 %v7119_v4  ;;  %v7311_v4 = vld [vmem:[#allocation2 + $0x10] sm:$0xff]  ;;  %1925 = vst.msk [vmem:[#allocation2 + $0x7c] sm:$0xf] %vm1893_vm10, %v1860_v63  ;;  %v2097_v63 = vrot.slane %v4949_v60, 5 }
 0x27a   : > { %2926 = vrot.lane.b32.xlu1 %v2723_v54, %s5670_s25  ;;  %3705 = vmatmul.bf16.gmra.mxu0 %v7311_v4  ;;  %v2094_v54 = vrot.slane %v4948_v53, 5  ;;  %v2768_v53 = vshll.u32 %v5045_v34, 16 }
 0x27b   : > { %2924 = vrot.lane.b32.xlu0 %v2713_v57, %s5670_s25  ;;  %3794 = vmatmul.bf16.gmra.mxu1 %v7311_v4  ;;  %v2749_v57 = vshrl.u32 %v5043_v31, 16 }
 0x27c   : > { %v2911_v1 = vpop.permute.xlu1 %2910 }
 0x27d   : > { %5472 = vmatpush.bf16.msra.mxu3 %v7154_v20  ;;  %2998 = vst.msk [vmem:[#allocation2 + $0x24] sm:$0xf] %vm2988_vm13, %v2911_v1  ;;  %v2909_v7 = vpop.permute.xlu0 %2908  ;;  %v2088_v20 = vsel %vm5919_vm5, %v4974_v23, %v2087_v61  ;;  %v2096_v61 = vrot.slane %v2094_v54, 4  ;;  %v2751_v0 = vrot.slane %v2749_v57, 4 }
 0x27e   : > { %2997 = vst.msk [vmem:[#allocation2 + $0x20] sm:$0xf] %vm2988_vm13, %v2909_v7  ;;  %2365 = vrot.lane.b32.xlu2 %v4998_v13, %s5671_s26  ;;  %v4975_v7 = vrot.slane %v4947_v51, 9  ;;  %v2770_v51 = vrot.slane %v2768_v53, 5 }
 0x27f   : > { %3334 = vst.msk [vmem:[#allocation2 + $0x20] sm:$0xf] %vm3325_vm14, %v3246_v52  ;;  %v2746_v52 = vrot.slane %v2744_v39, 5  ;;  %v2098_v14 = vsel %vm5919_vm5, %v2096_v61, %v2097_v63  ;;  %v3192_v39 = vrot.slane %v5093_v9, 5 }
 0x280   : > { %3367 = vst.msk [vmem:[#allocation2 + $0x20] sm:$0xf] %vm3358_vm15, %v5673_v62  ;;  %v2392_v22 = vpop.permute.xlu2 %2391  ;;  %v2095_v5 = vsel %vm5919_vm5, %v4975_v7, %v2094_v54  ;;  %v4952_v54 = vld [vmem:[%s5718_s19 + $0x98] sm:$0x1] }
 0x281   : > { %5473 = vmatpush.bf16.msra.mxu3 %v7174_v27  ;;  %v5040_v27 = vld [vmem:[%s5718_s19 + $0x84] sm:$0xf]  ;;  %v2747_v59 = vsel %vm5729_vm2, %v2742_v50, %v2746_v52  ;;  %v5001_v50 = vld [vmem:[%s5718_s19 + $0x90] sm:$0xf] }
 0x282   : > { %2170 = vrot.lane.b32.xlu1 %v2088_v20, %s5669_s24  ;;  %v2725_v26 = vshrl.u32 %v5040_v27, 16  ;;  %v2728_v10 = vshll.u32 %v5040_v27, 16 }
 0x283   : > { %3263 = vrot.lane.b32.xlu0 %v3179_v15, %s5672_s27  ;;  %3878 = vmatmul.bf16.gmra.mxu2 %v7248_v16  ;;  %v3182_v16 = vrot.slane %v7352_v37, 5  ;;  %v2758_v15 = vshll.u32 %v5044_v11, 16 }
 0x284   : > { %v1858_v30 = vpop.permute.xlu1 %1857  ;;  %v2727_v40 = vrot.slane %v2725_v26, 4  ;;  %v2730_v41 = vrot.slane %v2728_v10, 5 }
 0x285   : > { %5474 = vmatpush.bf16.msra.mxu3 %v7199_v43  ;;  %1924 = vst.msk [vmem:[#allocation2 + $0x78] sm:$0xf] %vm1893_vm10, %v1858_v30  ;;  %v3248_v21 = vpop.permute.xlu0 %3247  ;;  %v4999_v43 = vld [vmem:[%s5718_s19 + $0x84] sm:$0xf]  ;;  %v3184_v12 = vrot.slane %v3182_v16, 4 }
 0x286   : > { %3335 = vst.msk [vmem:[#allocation2 + $0x24] sm:$0xf] %vm3325_vm14, %v3248_v21  ;;  %3261 = vrot.lane.b32.xlu2 %v3176_v3, %s5672_s27  ;;  %v2731_v33 = vor.u32 %v2730_v41, %v2727_v40  ;;  %v5092_v21 = vld [vmem:[%s5718_s19 + $0x94] sm:$0xf] }
 0x287   : > { %3368 = vst.msk [vmem:[#allocation2 + $0x24] sm:$0xf] %vm3358_vm15, %v5673_v62  ;;  %v3189_v10 = vrot.slane %v5092_v21, 5 }
 0x288   : > { %v2955_v46 = vpop.permute.xlu2 %2954  ;;  %v2732_v23 = vrot.slane %v2731_v33, 4 }
 0x289   : > { %5475 = vmatpush.bf16.msra.mxu3 %v7219_v49  ;;  %v5118_v49 = vrot.slane %v5088_v35, 9  ;;  %v5091_v35 = vld [vmem:[%s5718_s19 + $0x90] sm:$0xe]  ;;  %v3191_v38 = vrot.slane %v3189_v10, 4 }
 0x28a   : > { %2369 = vrot.lane.b32.xlu1 %v5000_v6, %s5671_s26  ;;  %3710 = vmatmul.bf16.gmra.mxu0 %v7357_v44  ;;  %v2737_v20 = vsel %vm5729_vm2, %v2732_v23, %v7336_v42  ;;  %v2760_v42 = vrot.slane %v2758_v15, 5  ;;  %v2762_v6 = vshrl.u32 %v5044_v11, 16  ;;  %v5119_v41 = vrot.slane %v5091_v35, 9  ;;  %v4950_v15 = vld [vmem:[%s5718_s19 + $0x90] sm:$0xe] }
 0x28b   : > { %2367 = vrot.lane.b32.xlu0 %v4999_v43, %s5671_s26  ;;  %3799 = vmatmul.bf16.gmra.mxu1 %v7357_v44  ;;  %v5002_v43 = vld [vmem:[%s5718_s19 + $0x94] sm:$0xf]  ;;  %v2104_v23 = vrot.slane %v4952_v54, 5 }
 0x28c   : > { %v2197_v28 = vpop.permute.xlu1 %2196  ;;  %v2764_v37 = vrot.slane %v2762_v6, 4 }
 0x28d   : > { %5476 = vmatpush.bf16.msra.mxu3 %v7242_v17  ;;  %2262 = vst.msk [vmem:[#allocation2 + $0x7c] sm:$0xf] %vm2230_vm11, %v2197_v28  ;;  %v2195_v48 = vpop.permute.xlu0 %2194  ;;  %v3183_v17 = vsel %vm5919_vm5, %v5118_v49, %v3182_v16  ;;  %v7422_v49 = vld [vmem:[%s5718_s19 + $0x94] sm:$0xf]  ;;  %v5047_v28 = vld [vmem:[%s5718_s19 + $0xa0] sm:$0xf] }
 0x28e   : > { %2261 = vst.msk [vmem:[#allocation2 + $0x78] sm:$0xf] %vm2230_vm11, %v2195_v48  ;;  %2172 = vrot.lane.b32.xlu2 %v2091_v55, %s5669_s24  ;;  %v7398_v27 = vld [vmem:[#allocation2 + $0x20] sm:$0xff]  ;;  %v2765_v52 = vor.u32 %v2764_v37, %v2760_v42  ;;  %v3193_v48 = vsel %vm5919_vm5, %v3191_v38, %v3192_v39  ;;  %v2101_v55 = vrot.slane %v7422_v49, 5  ;;  %v2786_v33 = vshrl.u32 %v5047_v28, 16 }
 0x28f   : > { %2458 = vst.msk [vmem:[#allocation2 + $0x78] sm:$0xf] %vm2427_vm12, %v2392_v22  ;;  %v3185_v22 = vrot.slane %v5090_v19, 5  ;;  %v5004_v39 = vld [vmem:[%s5718_s19 + $0xa0] sm:$0xf] }
 0x290   : > { %v2155_v1 = vpop.permute.xlu2 %2154  ;;  %v2766_v60 = vrot.slane %v2765_v52, 4  ;;  %v2788_v63 = vrot.slane %v2786_v33, 4  ;;  %v7506_v33 = vld [vmem:[%s8348_s2] sm:$0x7] }
 0x291   : > { %5477 = vmatpush.bf16.msra.mxu3 %v7259_v29  ;;  %2241 = vst.msk [vmem:[#allocation2 + $0x28] sm:$0xf] %vm2230_vm11, %v2155_v1  ;;  %v3186_v3 = vsel %vm5919_vm5, %v3184_v12, %v3185_v22  ;;  %v4976_v12 = vrot.slane %v4950_v15, 9 }
 0x292   : > { %3265 = vrot.lane.b32.xlu1 %v3183_v17, %s5672_s27  ;;  %v3190_v17 = vsel %vm5919_vm5, %v5119_v41, %v3189_v10 }
 0x293   : > { %2930 = vrot.lane.b32.xlu0 %v2747_v59, %s5670_s25  ;;  %3883 = vmatmul.bf16.gmra.mxu2 %v7311_v4  ;;  %v2782_v59 = vshll.u32 %v5047_v28, 16  ;;  %v2102_v6 = vsel %vm5919_vm5, %v4976_v12, %v2101_v55 }
 0x294   : > { %v2953_v29 = vpop.permute.xlu1 %2952 }
 0x295   : > { %5478 = vmatpush.bf16.msra.mxu3 %v7283_v45  ;;  %3019 = vst.msk [vmem:[#allocation2 + $0x78] sm:$0xf] %vm2988_vm13, %v2953_v29  ;;  %v2394_v13 = vpop.permute.xlu0 %2393  ;;  %v2755_v45 = vor.u32 %v2754_v2, %v2751_v0  ;;  %v5048_v29 = vld [vmem:[%s5718_s19 + $0xa4] sm:$0x1]  ;;  %v2784_v11 = vrot.slane %v2782_v59, 5 }
 0x296   : > { %2459 = vst.msk [vmem:[#allocation2 + $0x7c] sm:$0xf] %vm2427_vm12, %v2394_v13  ;;  %2928 = vrot.lane.b32.xlu2 %v2737_v20, %s5670_s25  ;;  %v5003_v13 = vld [vmem:[%s5718_s19 + $0x9c] sm:$0xf]  ;;  %v2771_v20 = vsel %vm5729_vm2, %v2766_v60, %v2770_v51 }
 0x297   : > { %3020 = vst.msk [vmem:[#allocation2 + $0x7c] sm:$0xf] %vm2988_vm13, %v2955_v46  ;;  %v2756_v30 = vrot.slane %v2755_v45, 4  ;;  %v5046_v46 = vld [vmem:[%s5718_s19 + $0x9c] sm:$0xf]  ;;  %v2792_v45 = vshll.u32 %v5048_v29, 16 }
 0x298   : > { %v2354_v32 = vpop.permute.xlu2 %2353  ;;  %v2773_v57 = vshrl.u32 %v5046_v46, 16  ;;  %v2776_v18 = vshll.u32 %v5046_v46, 16 }
 0x299   : > { %v2761_v26 = vsel %vm5729_vm2, %v2756_v30, %v2760_v42  ;;  %v2794_v42 = vrot.slane %v2792_v45, 5 }
 0x29a   : > { %2176 = vrot.lane.b32.xlu1 %v2098_v14, %s5669_s24  ;;  %3715 = vmatmul.bf16.gmra.mxu0 %v7398_v27  ;;  %v2775_v0 = vrot.slane %v2773_v57, 4  ;;  %v2778_v2 = vrot.slane %v2776_v18, 5  ;;  %v2789_v14 = vor.u32 %v2788_v63, %v2784_v11 }
 0x29b   : > { %2174 = vrot.lane.b32.xlu0 %v2095_v5, %s5669_s24  ;;  %3804 = vmatmul.bf16.gmra.mxu1 %v7398_v27 }
 0x29c   : > { %v3292_v4 = vpop.permute.xlu1 %3291  ;;  %v2779_v5 = vor.u32 %v2778_v2, %v2775_v0  ;;  %v2790_v30 = vrot.slane %v2789_v14, 4 }
 0x29d   : > { %3357 = vst.msk [vmem:[#allocation2 + $0x7c] sm:$0xf] %vm3325_vm14, %v3292_v4  ;;  %v3290_v24 = vpop.permute.xlu0 %3289 }
 0x29e   : > { %3390 = vst.msk [vmem:[#allocation2 + $0x7c] sm:$0xf] %vm3358_vm15, %v5673_v62  ;;  %3267 = vrot.lane.b32.xlu2 %v3186_v3, %s5672_s27  ;;  %v2780_v4 = vrot.slane %v2779_v5, 4  ;;  %v2795_v3 = vsel %vm5729_vm2, %v2790_v30, %v2794_v42 }
 0x29f   : > { %3356 = vst.msk [vmem:[#allocation2 + $0x78] sm:$0xf] %vm3325_vm14, %v3290_v24  ;;  %v5095_v24 = vld [vmem:[%s5718_s19 + $0xa0] sm:$0xf] }
 0x2a0   : > { %3389 = vst.msk [vmem:[#allocation2 + $0x78] sm:$0xf] %vm3358_vm15, %v5673_v62  ;;  %v3250_v36 = vpop.permute.xlu2 %3249  ;;  %v3196_v10 = vrot.slane %v5095_v24, 5 }
 0x2a2   : > { %2932 = vrot.lane.b32.xlu1 %v2761_v26, %s5670_s25  ;;  %v2785_v26 = vsel %vm5729_vm2, %v2780_v4, %v2784_v11  ;;  %v3198_v37 = vrot.slane %v3196_v10, 4 }
 0x2a3   : > { %2373 = vrot.lane.b32.xlu0 %v5002_v43, %s5671_s26  ;;  %3888 = vmatmul.bf16.gmra.mxu2 %v7357_v44  ;;  %v2103_v44 = vrot.slane %v2101_v55, 4  ;;  %v5096_v43 = vld [vmem:[%s5718_s19 + $0xa4] sm:$0x1] }
 0x2a4   : > { %v2352_v40 = vpop.permute.xlu1 %2351  ;;  %v3199_v38 = vrot.slane %v5096_v43, 5 }
 0x2a5   : > { %2438 = vst.msk [vmem:[#allocation2 + $0x28] sm:$0xf] %vm2427_vm12, %v2352_v40  ;;  %v2157_v16 = vpop.permute.xlu0 %2156  ;;  %v2105_v19 = vsel %vm5919_vm5, %v2103_v44, %v2104_v23 }
 0x2a6   : > { %2242 = vst.msk [vmem:[#allocation2 + $0x2c] sm:$0xf] %vm2230_vm11, %v2157_v16  ;;  %2371 = vrot.lane.b32.xlu2 %v5001_v50, %s5671_s26  ;;  %v3200_v34 = vsel %vm5919_vm5, %v3198_v37, %v3199_v38 }
 0x2a7   : > { %2439 = vst.msk [vmem:[#allocation2 + $0x2c] sm:$0xf] %vm2427_vm12, %v2354_v32  ;;  %v7430_v31 = vld [vmem:[#allocation2 + $0x78] sm:$0xff] }
 0x2a8   : > { %3770 = vmatmul.bf16.gmra.mxu3 %v7430_v31  ;;  %v2161_v61 = vpop.permute.xlu2 %2160 }
 0x2a9   : > { %2244 = vst.msk [vmem:[#allocation2 + $0x34] sm:$0xf] %vm2230_vm11, %v2161_v61 }
 0x2aa   : > { %3271 = vrot.lane.b32.xlu1 %v3193_v48, %s5672_s27 }
 0x2ab   : > { %3269 = vrot.lane.b32.xlu0 %v3190_v17, %s5672_s27  ;;  %v7509_v17 = vperm.slane %v7506_v33, 1 }
 0x2ac   : > { %v2915_v1 = vpop.permute.xlu1 %2914 }
 0x2ad   : > { %3000 = vst.msk [vmem:[#allocation2 + $0x2c] sm:$0xf] %vm2988_vm13, %v2915_v1  ;;  %v2913_v7 = vpop.permute.xlu0 %2912 }
 0x2ae   : > { %2999 = vst.msk [vmem:[#allocation2 + $0x28] sm:$0xf] %vm2988_vm13, %v2913_v7  ;;  %2934 = vrot.lane.b32.xlu2 %v2771_v20, %s5670_s25 }
 0x2af   : > { %3336 = vst.msk [vmem:[#allocation2 + $0x28] sm:$0xf] %vm3325_vm14, %v3250_v36  ;;  %v5094_v36 = vld [vmem:[%s5718_s19 + $0x9c] sm:$0xe] }
 0x2b0   : > { %3369 = vst.msk [vmem:[#allocation2 + $0x28] sm:$0xf] %vm3358_vm15, %v5673_v62  ;;  %v2917_v22 = vpop.permute.xlu2 %2916  ;;  %v5120_v40 = vrot.slane %v5094_v36, 9 }
 0x2b2   : > { %2375 = vrot.lane.b32.xlu1 %v5003_v13, %s5671_s26  ;;  %v3197_v46 = vsel %vm5919_vm5, %v5120_v40, %v3196_v10 }
 0x2b3   : > { %2180 = vrot.lane.b32.xlu0 %v2105_v19, %s5669_s24  ;;  %3893 = vmatmul.bf16.gmra.mxu2 %v7398_v27 }
 0x2b4   : > { %v2159_v32 = vpop.permute.xlu1 %2158 }
 0x2b5   : > { %2243 = vst.msk [vmem:[#allocation2 + $0x30] sm:$0xf] %vm2230_vm11, %v2159_v32  ;;  %v3252_v21 = vpop.permute.xlu0 %3251  ;;  %v7534_v32 = vperm.slane %v7506_v33, 0 }
 0x2b6   : > { %3337 = vst.msk [vmem:[#allocation2 + $0x2c] sm:$0xf] %vm3325_vm14, %v3252_v21  ;;  %2178 = vrot.lane.b32.xlu2 %v2102_v6, %s5669_s24 }
 0x2b7   : > { %3370 = vst.msk [vmem:[#allocation2 + $0x2c] sm:$0xf] %vm3358_vm15, %v5673_v62 }
 0x2b8   : > { %3844 = vmatmul.bf16.vlgmr.msrb.gmra.mxu3 %v7138_v47  ;;  %v3256_v9 = vpop.permute.xlu2 %3255 }
 0x2ba   : > { %2938 = vrot.lane.b32.xlu1 %v2795_v3, %s5670_s25 }
 0x2bb   : > { %2936 = vrot.lane.b32.xlu0 %v2785_v26, %s5670_s25  ;;  %s5319_s25 = sshll.u32 %s8429_s12, 7 }
 0x2bc   : > { %v2358_v35 = vpop.permute.xlu1 %2357 }
 0x2bd   : > { %2441 = vst.msk [vmem:[#allocation2 + $0x34] sm:$0xf] %vm2427_vm12, %v2358_v35  ;;  %v2356_v25 = vpop.permute.xlu0 %2355 }
 0x2be   : > { %2440 = vst.msk [vmem:[#allocation2 + $0x30] sm:$0xf] %vm2427_vm12, %v2356_v25  ;;  %v5325_v27 = vld [vmem:[#allocation2 + $0x28] sm:$0xff]  ;;  %2377 = vrot.lane.b32.xlu2 %v5004_v39, %s5671_s26 }
 0x2bf   : > { %3001 = vst.msk [vmem:[#allocation2 + $0x30] sm:$0xf] %vm2988_vm13, %v2917_v22  ;;  %3809 = vmatmul.bf16.gmra.mxu1 %v5325_v27  ;;  %3720 = vmatmul.bf16.gmra.mxu0 %v5325_v27 }
 0x2c0   : > { %v2360_v41 = vpop.permute.xlu2 %2359 }
 0x2c3   : > { %3275 = vrot.lane.b32.xlu0 %v3200_v34, %s5672_s27  ;;  %3898 = vmatmul.bf16.gmra.mxu2 %v5325_v27 }
 0x2c4   : > { %v3254_v49 = vpop.permute.xlu1 %3253 }
 0x2c5   : > { %3338 = vst.msk [vmem:[#allocation2 + $0x30] sm:$0xf] %vm3325_vm14, %v3254_v49  ;;  %v2919_v16 = vpop.permute.xlu0 %2918 }
 0x2c6   : > { %3371 = vst.msk [vmem:[#allocation2 + $0x30] sm:$0xf] %vm3358_vm15, %v5673_v62  ;;  %3273 = vrot.lane.b32.xlu2 %v3197_v46, %s5672_s27  ;;  %s7616_s27 = scalar_lea.vmem %s8349_s3, %s5319_s25 }
 0x2c7   : > { %3002 = vst.msk [vmem:[#allocation2 + $0x34] sm:$0xf] %vm2988_vm13, %v2919_v16 }
 0x2c8   : > { %3339 = vst.msk [vmem:[#allocation2 + $0x34] sm:$0xf] %vm3325_vm14, %v3256_v9  ;;  %3849 = vmatmul.bf16.gmra.mxu3 %v7237_v8  ;;  %v2923_v28 = vpop.permute.xlu2 %2922 }
 0x2c9   : > { %3372 = vst.msk [vmem:[#allocation2 + $0x34] sm:$0xf] %vm3358_vm15, %v5673_v62 }
 0x2cc   : > { %v2165_v50 = vpop.permute.xlu1 %2164 }
 0x2cd   : > { %2246 = vst.msk [vmem:[#allocation2 + $0x3c] sm:$0xf] %vm2230_vm11, %v2165_v50  ;;  %v2163_v52 = vpop.permute.xlu0 %2162 }
 0x2ce   : > { %2245 = vst.msk [vmem:[#allocation2 + $0x38] sm:$0xf] %vm2230_vm11, %v2163_v52 }
 0x2cf   : > { %2442 = vst.msk [vmem:[#allocation2 + $0x38] sm:$0xf] %vm2427_vm12, %v2360_v41 }
 0x2d0   : > { %v5326_v58 = vld [vmem:[#allocation2 + $0x30] sm:$0xff]  ;;  %v2167_v53 = vpop.permute.xlu2 %2166 }
 0x2d1   : > { %3814 = vmatmul.bf16.gmra.mxu1 %v5326_v58  ;;  %3725 = vmatmul.bf16.gmra.mxu0 %v5326_v58  ;;  %2247 = vst.msk [vmem:[#allocation2 + $0x40] sm:$0xf] %vm2230_vm11, %v2167_v53 }
 0x2d3   : > { %3903 = vmatmul.bf16.gmra.mxu2 %v5326_v58 }
 0x2d4   : > { %v2921_v48 = vpop.permute.xlu1 %2920 }
 0x2d5   : > { %3003 = vst.msk [vmem:[#allocation2 + $0x38] sm:$0xf] %vm2988_vm13, %v2921_v48  ;;  %v2362_v55 = vpop.permute.xlu0 %2361  ;;  %v3696_v30 = vpop.f32.mrf.mxu0 }
 0x2d6   : > { %2443 = vst.msk [vmem:[#allocation2 + $0x3c] sm:$0xf] %vm2427_vm12, %v2362_v55  ;;  %v3785_v57 = vpop.f32.mrf.mxu1  ;;  %v3697_v27 = vadd.f32 %v3696_v30, %v7534_v32 }
 0x2d7   : > { %3004 = vst.msk [vmem:[#allocation2 + $0x3c] sm:$0xf] %vm2988_vm13, %v2923_v28  ;;  %v3786_v59 = vadd.f32 %v3785_v57, %v7509_v17 }
 0x2d8   : > { %3854 = vmatmul.bf16.gmra.mxu3 %v7301_v56  ;;  %v2366_v54 = vpop.permute.xlu2 %2365  ;;  %v3954_v53 = vmax.f32 %v3697_v27, 0.0 }
 0x2d9   : > { %v5285_v51 = vmul.f32 -1.442695, %v3786_v59 }
 0x2db   : > { %5513 = vpow2.f32 %v5285_v51  ;;  %v7529_v12 = vpop.f32.mrf.mxu3 }
 0x2dc   : > { %v3260_v18 = vpop.permute.xlu1 %3259 }
 0x2dd   : > { %3341 = vst.msk [vmem:[#allocation2 + $0x3c] sm:$0xf] %vm3325_vm14, %v3260_v18  ;;  %v3258_v60 = vpop.permute.xlu0 %3257  ;;  %v3698_v28 = vpop.f32.mrf.mxu0 }
 0x2de   : > { %3374 = vst.msk [vmem:[#allocation2 + $0x3c] sm:$0xf] %vm3358_vm15, %v5673_v62  ;;  %v3787_v23 = vpop.f32.mrf.mxu1  ;;  %v3699_v55 = vadd.f32 %v3698_v28, %v7534_v32 }
 0x2df   : > { %3340 = vst.msk [vmem:[#allocation2 + $0x38] sm:$0xf] %vm3325_vm14, %v3258_v60  ;;  %v3788_v63 = vadd.f32 %v3787_v23, %v7509_v17 }
 0x2e0   : > { %3373 = vst.msk [vmem:[#allocation2 + $0x38] sm:$0xf] %vm3358_vm15, %v5673_v62  ;;  %v3262_v44 = vpop.permute.xlu2 %3261 }
 0x2e1   : > { %v5514_v0 = vpop.eup %5513  ;;  %v5286_v2 = vmul.f32 -1.442695, %v3788_v63 }
 0x2e2   : > { %v4082_v7 = vadd.f32 1.0, %v5514_v0 }
 0x2e3   : > { %5515 = vpow2.f32 %v5286_v2  ;;  %v7550_v41 = vpop.f32.mrf.mxu3 }
 0x2e4   : > { %v2364_v61 = vpop.permute.xlu1 %2363  ;;  %5517 = vrcp.f32 %v4082_v7  ;;  %vm4119_vm0 = vweird.f32 %v4082_v7  ;;  %v4125_v26 = vand.u32 2147483648, %v4082_v7  ;;  %v4123_v43 = vand.u32 2147483647, %v4082_v7 }
 0x2e5   : > { %2444 = vst.msk [vmem:[#allocation2 + $0x40] sm:$0xf] %vm2427_vm12, %v2364_v61  ;;  %v2169_v1 = vpop.permute.xlu0 %2168 }
 0x2e6   : > { %2248 = vst.msk [vmem:[#allocation2 + $0x44] sm:$0xf] %vm2230_vm11, %v2169_v1  ;;  %v4126_v34 = vor.u32 1.1754944e-38, %v4125_v26  ;;  %vm4124_vm3 = vcmp.eq.f32.partialorder %v4123_v43, 8.507059e+37  ;;  %v3955_v1 = vmax.f32 %v3699_v55, 0.0 }
 0x2e7   : > { %2445 = vst.msk [vmem:[#allocation2 + $0x44] sm:$0xf] %vm2427_vm12, %v2366_v54  ;;  %v5327_v29 = vld [vmem:[#allocation2 + $0x38] sm:$0xff]  ;;  %v3790_v13 = vpop.f32.mrf.mxu1 }
 0x2e8   : > { %3859 = vmatmul.bf16.gmra.mxu3 %v7430_v31  ;;  %3819 = vmatmul.bf16.gmra.mxu1 %v5327_v29  ;;  %v2173_v11 = vpop.permute.xlu2 %2172  ;;  %v3791_v14 = vadd.f32 %v3790_v13, %v7509_v17 }
 0x2e9   : > { %3908 = vmatmul.bf16.gmra.mxu2 %v5327_v29  ;;  %3730 = vmatmul.bf16.gmra.mxu0 %v5327_v29  ;;  %2250 = vst.msk [vmem:[#allocation2 + $0x4c] sm:$0xf] %vm2230_vm11, %v2173_v11  ;;  %v5516_v15 = vpop.eup %5515 }
 0x2ea   : > { %v5287_v19 = vmul.f32 -1.442695, %v3791_v14  ;;  %v5518_v5 = vpop.eup %5517  ;;  %v4083_v22 = vadd.f32 1.0, %v5516_v15 }
 0x2eb   : > { %v4115_v42 = vmul.f32 %v5518_v5, %v4082_v7  ;;  %vm4120_vm1 = vweird.f32 %v5518_v5 }
 0x2ec   : > { %v2927_v20 = vpop.permute.xlu1 %2926  ;;  %5519 = vpow2.f32 %v5287_v19  ;;  %vm7545_vm2 = vmor %vm4119_vm0, %vm4120_vm1  ;;  %vm4134_vm4 = vweird.f32 %v4083_v22  ;;  %v4138_v49 = vand.u32 2147483647, %v4083_v22  ;;  %v4140_v52 = vand.u32 2147483648, %v4083_v22  ;;  %v3701_v19 = vpop.f32.mrf.mxu0 }
 0x2ed   : > { %3006 = vst.msk [vmem:[#allocation2 + $0x44] sm:$0xf] %vm2988_vm13, %v2927_v20  ;;  %v2925_v45 = vpop.permute.xlu0 %2924  ;;  %5521 = vrcp.f32 %v4083_v22  ;;  %v4116_v3 = vsub.f32 1.0, %v4115_v42 }
 0x2ee   : > { %3005 = vst.msk [vmem:[#allocation2 + $0x40] sm:$0xf] %vm2988_vm13, %v2925_v45  ;;  %vm7568_vm7 = vcmp.eq.f32.partialorder %v4138_v49, 8.507059e+37 }
 0x2ef   : > { %3342 = vst.msk [vmem:[#allocation2 + $0x40] sm:$0xf] %vm3325_vm14, %v3262_v44  ;;  %v3792_v21 = vpop.f32.mrf.mxu1  ;;  %v4117_v37 = vmul.f32 %v5518_v5, %v4116_v3 }
 0x2f0   : > { %3375 = vst.msk [vmem:[#allocation2 + $0x40] sm:$0xf] %vm3358_vm15, %v5673_v62  ;;  %v2929_v4 = vpop.permute.xlu2 %2928  ;;  %v3793_v6 = vadd.f32 %v3792_v21, %v7509_v17 }
 0x2f1   : > { %v4118_v36 = vadd.f32 %v5518_v5, %v4117_v37 }
 0x2f2   : > { %v5520_v9 = vpop.eup %5519  ;;  %v5288_v35 = vmul.f32 -1.442695, %v3793_v6 }
 0x2f3   : > { %v5522_v38 = vpop.eup %5521  ;;  %v7541_v25 = vadd.f32 1.0, %v5520_v9  ;;  %v4122_v16 = vsel %vm7545_vm2, %v5518_v5, %v4118_v36 }
 0x2f4   : > { %v2171_v24 = vpop.permute.xlu1 %2170  ;;  %5523 = vpow2.f32 %v5288_v35  ;;  %v4130_v40 = vmul.f32 %v5522_v38, %v4083_v22  ;;  %vm4135_vm5 = vweird.f32 %v5522_v38  ;;  %v4127_v57 = vsel %vm4124_vm3, %v4126_v34, %v4122_v16  ;;  %v3703_v28 = vpop.f32.mrf.mxu0 }
 0x2f5   : > { %2249 = vst.msk [vmem:[#allocation2 + $0x48] sm:$0xf] %vm2230_vm11, %v2171_v24  ;;  %v3264_v10 = vpop.permute.xlu0 %3263  ;;  %5525 = vrcp.f32 %v7541_v25  ;;  %vm7564_vm6 = vmor %vm4134_vm4, %vm4135_vm5  ;;  %v4594_v7 = vmul.f32 %v4127_v57, %v3954_v53  ;;  %vm4149_vm8 = vweird.f32 %v7541_v25  ;;  %v7591_v24 = vpop.f32.mrf.mxu3  ;;  %v4155_v26 = vand.u32 2147483648, %v7541_v25 }
 0x2f6   : > { %3343 = vst.msk [vmem:[#allocation2 + $0x44] sm:$0xf] %vm3325_vm14, %v3264_v10  ;;  %v3874_v46 = vpop.f32.mrf.mxu2  ;;  %v4131_v50 = vsub.f32 1.0, %v4130_v40  ;;  %v4153_v9 = vand.u32 2147483647, %v7541_v25  ;;  %v3702_v40 = vadd.f32 %v3701_v19, %v7534_v32  ;;  %v3704_v55 = vadd.f32 %v3703_v28, %v7534_v32 }
 0x2f7   : > { %3376 = vst.msk [vmem:[#allocation2 + $0x44] sm:$0xf] %vm3358_vm15, %v5673_v62 }
 0x2f8   : > { %3933 = vmatmul.bf16.vlgmr.msra.gmra.mxu3 %v7138_v47  ;;  %v7555_v58 = vpop.permute.xlu2 %3267  ;;  %v7558_v47 = vperm.slane %v7506_v33, 2  ;;  %v3795_v48 = vpop.f32.mrf.mxu1  ;;  %v4132_v59 = vmul.f32 %v5522_v38, %v4131_v50  ;;  %v4141_v33 = vor.u32 1.1754944e-38, %v4140_v52  ;;  %vm4154_vm0 = vcmp.eq.f32.partialorder %v4153_v9, 8.507059e+37 }
 0x2f9   : > { %v3796_v18 = vadd.f32 %v3795_v48, %v7509_v17 }
 0x2fa   : > { %v5524_v23 = vpop.eup %5523  ;;  %v4133_v0 = vadd.f32 %v5522_v38, %v4132_v59  ;;  %v3875_v11 = vadd.f32 %v3874_v46, %v7558_v47 }
 0x2fb   : > { %v5289_v63 = vmul.f32 -1.442695, %v3796_v18  ;;  %v7573_v2 = vpop.eup %5525  ;;  %v7576_v29 = vadd.f32 1.0, %v5524_v23 }
 0x2fc   : > { %v2370_v54 = vpop.permute.xlu1 %2369  ;;  %v4137_v13 = vsel %vm7564_vm6, %v5522_v38, %v4133_v0  ;;  %v4145_v20 = vmul.f32 %v7573_v2, %v7541_v25  ;;  %v4626_v30 = vadd.f32 %v4594_v7, %v3875_v11  ;;  %vm4150_vm9 = vweird.f32 %v7573_v2  ;;  %v3706_v19 = vpop.f32.mrf.mxu0 }
 0x2fd   : > { %2447 = vst.msk [vmem:[#allocation2 + $0x4c] sm:$0xf] %vm2427_vm12, %v2370_v54  ;;  %v2368_v60 = vpop.permute.xlu0 %2367  ;;  %5527 = vpow2.f32 %v5289_v63  ;;  %v4142_v14 = vsel %vm7568_vm7, %v4141_v33, %v4137_v13  ;;  %vm7606_vm10 = vmor %vm4149_vm8, %vm4150_vm9  ;;  %v4156_v25 = vor.u32 1.1754944e-38, %v4155_v26  ;;  %vm4164_vm1 = vweird.f32 %v7576_v29  ;;  %v7643_v23 = vpop.f32.mrf.mxu3 }
 0x2fe   : > { %2446 = vst.msk [vmem:[#allocation2 + $0x48] sm:$0xf] %vm2427_vm12, %v2368_v60  ;;  %v5328_v61 = vld [vmem:[#allocation2 + $0x40] sm:$0xff]  ;;  %5529 = vrcp.f32 %v7576_v29  ;;  %v4595_v45 = vmul.f32 %v4142_v14, %v3955_v1  ;;  %v3876_v15 = vpop.f32.mrf.mxu2  ;;  %v4146_v5 = vsub.f32 1.0, %v4145_v20  ;;  %v4168_v52 = vand.u32 2147483647, %v7576_v29 }
 0x2ff   : > { %3007 = vst.msk [vmem:[#allocation2 + $0x48] sm:$0xf] %vm2988_vm13, %v2929_v4  ;;  %3824 = vmatmul.bf16.gmra.mxu1 %v5328_v61  ;;  %3913 = vmatmul.bf16.gmra.mxu2 %v5328_v61  ;;  %v3877_v42 = vadd.f32 %v3876_v15, %v7558_v47  ;;  %v3957_v63 = vmax.f32 %v3704_v55, 0.0 }
 0x300   : > { %3735 = vmatmul.bf16.gmra.mxu0 %v5328_v61  ;;  %v7586_v22 = vpop.permute.xlu2 %2371  ;;  %v3797_v4 = vpop.f32.mrf.mxu1  ;;  %v4147_v3 = vmul.f32 %v7573_v2, %v4146_v5  ;;  %vm4169_vm4 = vcmp.eq.f32.partialorder %v4168_v52, 8.507059e+37 }
 0x301   : > { %v3798_v6 = vadd.f32 %v3797_v4, %v7509_v17  ;;  %v4627_v43 = vadd.f32 %v4595_v45, %v3877_v42 }
 0x302   : > { %v4148_v38 = vadd.f32 %v7573_v2, %v4147_v3 }
 0x303   : > { %v5528_v35 = vpop.eup %5527  ;;  %v5290_v37 = vmul.f32 -1.442695, %v3798_v6  ;;  %v5363_v34 = vpack.c.bf16 %v4627_v43, %v4626_v30 }
 0x304   : > { %v3266_v21 = vpop.permute.xlu1 %3265  ;;  %v5530_v39 = vpop.eup %5529  ;;  %v7611_v36 = vadd.f32 1.0, %v5528_v35  ;;  %v4152_v16 = vsel %vm7606_vm10, %v7573_v2, %v4148_v38 }
 0x305   : > { %3344 = vst.msk [vmem:[#allocation2 + $0x48] sm:$0xf] %vm3325_vm14, %v3266_v21  ;;  %v2931_v10 = vpop.permute.xlu0 %2930  ;;  %5531 = vpow2.f32 %v5290_v37  ;;  %v4160_v49 = vmul.f32 %v5530_v39, %v7576_v29  ;;  %vm4165_vm2 = vweird.f32 %v5530_v39  ;;  %v4157_v57 = vsel %vm4154_vm0, %v4156_v25, %v4152_v16  ;;  %v7676_v25 = vpop.f32.mrf.mxu3 }
 0x306   : > { %3377 = vst.msk [vmem:[#allocation2 + $0x48] sm:$0xf] %vm3358_vm15, %v5673_v62  ;;  %5533 = vrcp.f32 %v7611_v36  ;;  %v3879_v46 = vpop.f32.mrf.mxu2  ;;  %vm7638_vm3 = vmor %vm4164_vm1, %vm4165_vm2  ;;  %vm4179_vm5 = vweird.f32 %v7611_v36  ;;  %v4185_v26 = vand.u32 2147483648, %v7611_v36  ;;  %v4183_v9 = vand.u32 2147483647, %v7611_v36  ;;  %v3708_v52 = vpop.f32.mrf.mxu0 }
 0x307   : > { %3008 = vst.msk [vmem:[#allocation2 + $0x4c] sm:$0xf] %vm2988_vm13, %v2931_v10  ;;  %v4161_v50 = vsub.f32 1.0, %v4160_v49  ;;  %v3880_v7 = vadd.f32 %v3879_v46, %v7558_v47 }
 0x308   : > { %3345 = vst.msk [vmem:[#allocation2 + $0x4c] sm:$0xf] %vm3325_vm14, %v7555_v58  ;;  %3938 = vmatmul.bf16.gmra.mxu3 %v7237_v8  ;;  %v4170_v58 = vand.u32 2147483648, %v7576_v29  ;;  %v2935_v53 = vpop.permute.xlu2 %2934  ;;  %v3956_v8 = vmax.f32 %v3702_v40, 0.0  ;;  %v3800_v48 = vpop.f32.mrf.mxu1  ;;  %v3707_v40 = vadd.f32 %v3706_v19, %v7534_v32  ;;  %v4186_v49 = vor.u32 1.1754944e-38, %v4185_v26 }
 0x309   : > { %3378 = vst.msk [vmem:[#allocation2 + $0x4c] sm:$0xf] %vm3358_vm15, %v5673_v62  ;;  %v3801_v18 = vadd.f32 %v3800_v48, %v7509_v17  ;;  %v4162_v59 = vmul.f32 %v5530_v39, %v4161_v50  ;;  %vm4184_vm8 = vcmp.eq.f32.partialorder %v4183_v9, 8.507059e+37  ;;  %v3709_v48 = vadd.f32 %v3708_v52, %v7534_v32 }
 0x30a   : > { %5364 = vst [vmem:[%s7616_s27] sm:$0xff] %v5363_v34   ;;  %v4171_v44 = vor.u32 1.1754944e-38, %v4170_v58  ;;  %v4596_v29 = vmul.f32 %v4157_v57, %v3956_v8  ;;  %v3958_v8 = vmax.f32 %v3707_v40, 0.0 }
 0x30b   : > { %v5532_v33 = vpop.eup %5531  ;;  %v5291_v61 = vmul.f32 -1.442695, %v3801_v18  ;;  %v4163_v1 = vadd.f32 %v5530_v39, %v4162_v59 }
 0x30c   : > { %v2177_v54 = vpop.permute.xlu1 %2176  ;;  %v7645_v0 = vpop.eup %5533  ;;  %v7649_v2 = vadd.f32 1.0, %v5532_v33  ;;  %v4628_v30 = vadd.f32 %v4596_v29, %v3880_v7 }
 0x30d   : > { %2252 = vst.msk [vmem:[#allocation2 + $0x54] sm:$0xf] %vm2230_vm11, %v2177_v54  ;;  %v2175_v60 = vpop.permute.xlu0 %2174  ;;  %5535 = vpow2.f32 %v5291_v61  ;;  %v4167_v13 = vsel %vm7638_vm3, %v5530_v39, %v4163_v1  ;;  %v4175_v20 = vmul.f32 %v7645_v0, %v7611_v36  ;;  %vm4180_vm6 = vweird.f32 %v7645_v0 }
 0x30e   : > { %2251 = vst.msk [vmem:[#allocation2 + $0x50] sm:$0xf] %vm2230_vm11, %v2175_v60  ;;  %5537 = vrcp.f32 %v7649_v2  ;;  %v4172_v14 = vsel %vm4169_vm4, %v4171_v44, %v4167_v13  ;;  %v3881_v15 = vpop.f32.mrf.mxu2  ;;  %vm7670_vm7 = vmor %vm4179_vm5, %vm4180_vm6  ;;  %v4200_v28 = vand.u32 2147483648, %v7649_v2  ;;  %vm4194_vm9 = vweird.f32 %v7649_v2  ;;  %v7708_v13 = vpop.f32.mrf.mxu3 }
 0x30f   : > { %2448 = vst.msk [vmem:[#allocation2 + $0x50] sm:$0xf] %vm2427_vm12, %v7586_v22  ;;  %v4597_v45 = vmul.f32 %v4172_v14, %v3957_v63  ;;  %v4176_v5 = vsub.f32 1.0, %v4175_v20  ;;  %v3882_v42 = vadd.f32 %v3881_v15, %v7558_v47  ;;  %v3959_v61 = vmax.f32 %v3709_v48, 0.0 }
 0x310   : > { %v5329_v11 = vld [vmem:[#allocation2 + $0x48] sm:$0xff]  ;;  %v2179_v22 = vpop.permute.xlu2 %2178  ;;  %v3802_v4 = vpop.f32.mrf.mxu1  ;;  %v4201_v51 = vor.u32 1.1754944e-38, %v4200_v28 }
 0x311   : > { %3829 = vmatmul.bf16.gmra.mxu1 %v5329_v11  ;;  %3918 = vmatmul.bf16.gmra.mxu2 %v5329_v11  ;;  %2253 = vst.msk [vmem:[#allocation2 + $0x58] sm:$0xf] %vm2230_vm11, %v2179_v22  ;;  %v3803_v6 = vadd.f32 %v3802_v4, %v7509_v17  ;;  %v4177_v3 = vmul.f32 %v7645_v0, %v4176_v5 }
 0x312   : > { %3740 = vmatmul.bf16.gmra.mxu0 %v5329_v11  ;;  %v4629_v43 = vadd.f32 %v4597_v45, %v3882_v42  ;;  %v3711_v42 = vpop.f32.mrf.mxu0 }
 0x313   : > { %v5536_v35 = vpop.eup %5535  ;;  %v5292_v37 = vmul.f32 -1.442695, %v3803_v6  ;;  %v4178_v38 = vadd.f32 %v7645_v0, %v4177_v3  ;;  %v3712_v28 = vadd.f32 %v3711_v42, %v7534_v32 }
 0x314   : > { %v2933_v21 = vpop.permute.xlu1 %2932  ;;  %v5538_v39 = vpop.eup %5537  ;;  %v5368_v34 = vpack.c.bf16 %v4629_v43, %v4628_v30  ;;  %v7680_v46 = vadd.f32 1.0, %v5536_v35 }
 0x315   : > { %3009 = vst.msk [vmem:[#allocation2 + $0x50] sm:$0xf] %vm2988_vm13, %v2933_v21  ;;  %v2374_v10 = vpop.permute.xlu0 %2373  ;;  %5539 = vpow2.f32 %v5292_v37  ;;  %v4190_v16 = vmul.f32 %v5538_v39, %v7649_v2  ;;  %v4182_v36 = vsel %vm7670_vm7, %v7645_v0, %v4178_v38  ;;  %vm4195_vm10 = vweird.f32 %v5538_v39 }
 0x316   : > { %2449 = vst.msk [vmem:[#allocation2 + $0x54] sm:$0xf] %vm2427_vm12, %v2374_v10  ;;  %v3884_v50 = vpop.f32.mrf.mxu2  ;;  %v4187_v54 = vsel %vm4184_vm8, %v4186_v49, %v4182_v36  ;;  %5541 = vrcp.f32 %v7680_v46  ;;  %vm7693_vm0 = vmor %vm4194_vm9, %vm4195_vm10  ;;  %v4215_v49 = vand.u32 2147483648, %v7680_v46 }
 0x317   : > { %3010 = vst.msk [vmem:[#allocation2 + $0x54] sm:$0xf] %vm2988_vm13, %v2935_v53  ;;  %v4191_v58 = vsub.f32 1.0, %v4190_v16  ;;  %v4198_v53 = vand.u32 2147483647, %v7649_v2  ;;  %v4598_v0 = vmul.f32 %v4187_v54, %v3958_v8  ;;  %v3885_v2 = vadd.f32 %v3884_v50, %v7558_v47 }
 0x318   : > { %3943 = vmatmul.bf16.gmra.mxu3 %v7301_v56  ;;  %5440 = vst [vmem:[%s7616_s27 + $0x8] sm:$0xff] %v5368_v34   ;;  %v3805_v56 = vpop.f32.mrf.mxu1  ;;  %v2378_v7 = vpop.permute.xlu2 %2377  ;;  %v3960_v54 = vmax.f32 %v3712_v28, 0.0 }
 0x319   : > { %v3806_v57 = vadd.f32 %v3805_v56, %v7509_v17  ;;  %v4192_v18 = vmul.f32 %v5538_v39, %v4191_v58  ;;  %vm4199_vm1 = vcmp.eq.f32.partialorder %v4198_v53, 8.507059e+37  ;;  %v4630_v15 = vadd.f32 %v4598_v0, %v3885_v2 }
 0x31a   : > { %v4213_v58 = vand.u32 2147483647, %v7680_v46  ;;  %v4216_v53 = vor.u32 1.1754944e-38, %v4215_v49  ;;  %v3713_v8 = vpop.f32.mrf.mxu0 }
 0x31b   : > { %v5540_v44 = vpop.eup %5539  ;;  %v5293_v33 = vmul.f32 -1.442695, %v3806_v57  ;;  %v4193_v63 = vadd.f32 %v5538_v39, %v4192_v18  ;;  %v3714_v18 = vadd.f32 %v3713_v8, %v7534_v32 }
 0x31c   : > { %v3272_v55 = vpop.permute.xlu1 %3271  ;;  %v7700_v1 = vadd.f32 1.0, %v5540_v44  ;;  %v5542_v45 = vpop.eup %5541  ;;  %vm4214_vm4 = vcmp.eq.f32.partialorder %v4213_v58, 8.507059e+37 }
 0x31d   : > { %3347 = vst.msk [vmem:[#allocation2 + $0x54] sm:$0xf] %vm3325_vm14, %v3272_v55  ;;  %v3270_v59 = vpop.permute.xlu0 %3269  ;;  %5543 = vpow2.f32 %v5293_v33  ;;  %v4197_v29 = vsel %vm7693_vm0, %v5538_v39, %v4193_v63  ;;  %v4205_v26 = vmul.f32 %v5542_v45, %v7680_v46  ;;  %v3961_v44 = vmax.f32 %v3714_v18, 0.0 }
 0x31e   : > { %3380 = vst.msk [vmem:[#allocation2 + $0x54] sm:$0xf] %vm3358_vm15, %v5673_v62  ;;  %5545 = vrcp.f32 %v7700_v1  ;;  %v4202_v11 = vsel %vm4199_vm1, %v4201_v51, %v4197_v29  ;;  %v3886_v14 = vpop.f32.mrf.mxu2  ;;  %v4230_v48 = vand.u32 2147483648, %v7700_v1  ;;  %vm4224_vm3 = vweird.f32 %v7700_v1 }
 0x31f   : > { %3346 = vst.msk [vmem:[#allocation2 + $0x50] sm:$0xf] %vm3325_vm14, %v3270_v59  ;;  %v4599_v20 = vmul.f32 %v4202_v11, %v3959_v61  ;;  %v3887_v19 = vadd.f32 %v3886_v14, %v7558_v47  ;;  %v4206_v37 = vsub.f32 1.0, %v4205_v26  ;;  %v4228_v63 = vand.u32 2147483647, %v7700_v1 }
 0x320   : > { %3379 = vst.msk [vmem:[#allocation2 + $0x50] sm:$0xf] %vm3358_vm15, %v5673_v62  ;;  %v3807_v5 = vpop.f32.mrf.mxu1  ;;  %v3274_v40 = vpop.permute.xlu2 %3273  ;;  %v4231_v0 = vor.u32 1.1754944e-38, %v4230_v48 }
 0x321   : > { %v3808_v30 = vadd.f32 %v3807_v5, %v7509_v17  ;;  %v4631_v21 = vadd.f32 %v4599_v20, %v3887_v19  ;;  %v4207_v27 = vmul.f32 %v5542_v45, %v4206_v37  ;;  %vm4229_vm6 = vcmp.eq.f32.partialorder %v4228_v63, 8.507059e+37 }
 0x322   : > { %v3716_v19 = vpop.f32.mrf.mxu0 }
 0x323   : > { %v5544_v6 = vpop.eup %5543  ;;  %v5294_v3 = vmul.f32 -1.442695, %v3808_v30  ;;  %v5373_v35 = vpack.c.bf16 %v4631_v21, %v4630_v15  ;;  %v4208_v50 = vadd.f32 %v5542_v45, %v4207_v27 }
 0x324   : > { %v2376_v22 = vpop.permute.xlu1 %2375  ;;  %v5546_v10 = vpop.eup %5545  ;;  %v7716_v9 = vadd.f32 1.0, %v5544_v6 }
 0x325   : > { %v2181_v4 = vpop.permute.xlu0 %2180  ;;  %2450 = vst.msk [vmem:[#allocation2 + $0x58] sm:$0xf] %vm2427_vm12, %v2376_v22  ;;  %5547 = vpow2.f32 %v5294_v3  ;;  %v4220_v38 = vmul.f32 %v5546_v10, %v7700_v1 }
 0x326   : > { %2254 = vst.msk [vmem:[#allocation2 + $0x5c] sm:$0xf] %vm2230_vm11, %v2181_v4  ;;  %v3889_v39 = vpop.f32.mrf.mxu2  ;;  %5549 = vrcp.f32 %v7716_v9  ;;  %vm4209_vm11 = vweird.f32 %v7680_v46  ;;  %v4245_v26 = vand.u32 2147483648, %v7716_v9 }
 0x327   : > { %v5330_v43 = vld [vmem:[#allocation2 + $0x50] sm:$0xff]  ;;  %2451 = vst.msk [vmem:[#allocation2 + $0x5c] sm:$0xf] %vm2427_vm12, %v2378_v7  ;;  %v4221_v34 = vsub.f32 1.0, %v4220_v38  ;;  %vm4210_vm12 = vweird.f32 %v5542_v45  ;;  %v3890_v51 = vadd.f32 %v3889_v39, %v7558_v47  ;;  %v4243_v39 = vand.u32 2147483647, %v7716_v9 }
 0x328   : > { %3834 = vmatmul.bf16.gmra.mxu1 %v5330_v43  ;;  %3948 = vmatmul.bf16.gmra.mxu3 %v7430_v31  ;;  %5441 = vst [vmem:[%s7616_s27 + $0x10] sm:$0xff] %v5373_v35   ;;  %vm7728_vm2 = vmor %vm4209_vm11, %vm4210_vm12  ;;  %v3717_v35 = vadd.f32 %v3716_v19, %v7534_v32 }
 0x329   : > { %3923 = vmatmul.bf16.gmra.mxu2 %v5330_v43  ;;  %3745 = vmatmul.bf16.gmra.mxu0 %v5330_v43  ;;  %v4222_v56 = vmul.f32 %v5546_v10, %v4221_v34  ;;  %v4212_v57 = vsel %vm7728_vm2, %v5542_v45, %v4208_v50  ;;  %v4246_v34 = vor.u32 1.1754944e-38, %v4245_v26  ;;  %vm4244_vm8 = vcmp.eq.f32.partialorder %v4243_v39, 8.507059e+37 }
 0x32a   : > { %v4217_v60 = vsel %vm4214_vm4, %v4216_v53, %v4212_v57  ;;  %v3962_v50 = vmax.f32 %v3717_v35, 0.0 }
 0x32b   : > { %v7723_v16 = vpop.f32.mrf.mxu3  ;;  %v5548_v55 = vpop.eup %5547  ;;  %v4223_v46 = vadd.f32 %v5546_v10, %v4222_v56  ;;  %v4600_v61 = vmul.f32 %v4217_v60, %v3960_v54 }
 0x32c   : > { %v2939_v36 = vpop.permute.xlu1 %2938  ;;  %v7740_v59 = vadd.f32 1.0, %v5548_v55  ;;  %v5550_v33 = vpop.eup %5549 }
 0x32d   : > { %v2937_v31 = vpop.permute.xlu0 %2936  ;;  %3012 = vst.msk [vmem:[#allocation2 + $0x5c] sm:$0xf] %vm2988_vm13, %v2939_v36  ;;  %v4632_v45 = vadd.f32 %v4600_v61, %v3890_v51  ;;  %v4235_v5 = vmul.f32 %v5550_v33, %v7716_v9 }
 0x32e   : > { %3011 = vst.msk [vmem:[#allocation2 + $0x58] sm:$0xf] %vm2988_vm13, %v2937_v31  ;;  %vm4225_vm13 = vweird.f32 %v5546_v10  ;;  %5551 = vrcp.f32 %v7740_v59  ;;  %v3891_v29 = vpop.f32.mrf.mxu2  ;;  %vm4254_vm9 = vweird.f32 %v7740_v59  ;;  %v4258_v55 = vand.u32 2147483647, %v7740_v59 }
 0x32f   : > { %3348 = vst.msk [vmem:[#allocation2 + $0x58] sm:$0xf] %vm3325_vm14, %v3274_v40  ;;  %vm4226_vm5 = vmor %vm4224_vm3, %vm4225_vm13  ;;  %v3892_v7 = vadd.f32 %v3891_v29, %v7558_v47  ;;  %v4236_v30 = vsub.f32 1.0, %v4235_v5  ;;  %v3718_v40 = vpop.f32.mrf.mxu0 }
 0x330   : > { %3381 = vst.msk [vmem:[#allocation2 + $0x58] sm:$0xf] %vm3358_vm15, %v5673_v62  ;;  %v4227_v2 = vsel %vm4226_vm5, %v5546_v10, %v4223_v46  ;;  %v4260_v10 = vand.u32 2147483648, %v7740_v59  ;;  %v3719_v52 = vadd.f32 %v3718_v40, %v7534_v32  ;;  %vm4259_vm1 = vcmp.eq.f32.partialorder %v4258_v55, 8.507059e+37 }
 0x331   : > { %v4232_v20 = vsel %vm4229_vm6, %v4231_v0, %v4227_v2  ;;  %v4237_v21 = vmul.f32 %v5550_v33, %v4236_v30 }
 0x332   : > { %v4601_v15 = vmul.f32 %v4232_v20, %v3961_v44  ;;  %v3963_v48 = vmax.f32 %v3719_v52, 0.0  ;;  %v4261_v57 = vor.u32 1.1754944e-38, %v4260_v10 }
 0x333   : > { %v7748_v11 = vpop.f32.mrf.mxu3  ;;  %v4238_v37 = vadd.f32 %v5550_v33, %v4237_v21 }
 0x334   : > { %v5552_v22 = vpop.eup %5551  ;;  %v4633_v1 = vadd.f32 %v4601_v15, %v3892_v7 }
 0x335   : > { %v3276_v14 = vpop.permute.xlu0 %3275  ;;  %v4250_v42 = vmul.f32 %v5552_v22, %v7740_v59  ;;  %vm4255_vm10 = vweird.f32 %v5552_v22 }
 0x336   : > { %3349 = vst.msk [vmem:[#allocation2 + $0x5c] sm:$0xf] %vm3325_vm14, %v3276_v14  ;;  %v5378_v4 = vpack.c.bf16 %v4633_v1, %v4632_v45  ;;  %v3894_v6 = vpop.f32.mrf.mxu2  ;;  %vm4239_vm14 = vweird.f32 %v7716_v9  ;;  %vm4256_vm0 = vmor %vm4254_vm9, %vm4255_vm10 }
 0x337   : > { %3382 = vst.msk [vmem:[#allocation2 + $0x5c] sm:$0xf] %vm3358_vm15, %v5673_v62  ;;  %v4251_v3 = vsub.f32 1.0, %v4250_v42  ;;  %vm4240_vm15 = vweird.f32 %v5550_v33  ;;  %v3895_v8 = vadd.f32 %v3894_v6, %v7558_v47 }
 0x338   : > { %5442 = vst [vmem:[%s7616_s27 + $0x18] sm:$0xff] %v5378_v4   ;;  %vm7761_vm7 = vmor %vm4239_vm14, %vm4240_vm15 }
 0x339   : > { %v4252_v49 = vmul.f32 %v5552_v22, %v4251_v3  ;;  %v4242_v31 = vsel %vm7761_vm7, %v5550_v33, %v4238_v37 }
 0x33a   : > { %v4247_v9 = vsel %vm4244_vm8, %v4246_v34, %v4242_v31 }
 0x33b   : > { %v3845_v43 = vpop.f32.mrf.mxu3  ;;  %v4253_v58 = vadd.f32 %v5552_v22, %v4252_v49  ;;  %v4602_v56 = vmul.f32 %v4247_v9, %v3962_v50 }
 0x33c   : > { %v3846_v62 = vadd.f32 %v3845_v43, %v7509_v17  ;;  %v3810_v38 = vpop.f32.mrf.mxu1  ;;  %v3721_v15 = vpop.f32.mrf.mxu0 }
 0x33d   : > { %v3811_v28 = vadd.f32 %v3810_v38, %v7509_v17  ;;  %v4257_v46 = vsel %vm4256_vm0, %v5552_v22, %v4253_v58  ;;  %v4634_v63 = vadd.f32 %v4602_v56, %v3895_v8  ;;  %v3722_v31 = vadd.f32 %v3721_v15, %v7534_v32 }
 0x33e   : > { %v5331_v36 = vld [vmem:[#allocation2 + $0x58] sm:$0xff]  ;;  %v5309_v54 = vmul.f32 -1.442695, %v3846_v62  ;;  %v3896_v18 = vpop.f32.mrf.mxu2  ;;  %v4262_v44 = vsel %vm4259_vm1, %v4261_v57, %v4257_v46  ;;  %v7798_v8 = vadd.f32 %v7529_v12, %v7534_v32 }
 0x33f   : > { %3839 = vmatmul.bf16.gmra.mxu1 %v5331_v36  ;;  %v5295_v53 = vmul.f32 -1.442695, %v3811_v28  ;;  %3928 = vmatmul.bf16.gmra.mxu2 %v5331_v36  ;;  %v3897_v60 = vadd.f32 %v3896_v18, %v7558_v47  ;;  %v4603_v0 = vmul.f32 %v4262_v44, %v3963_v48 }
 0x340   : > { %3750 = vmatmul.bf16.gmra.mxu0 %v5331_v36 }
 0x341   : > { %5553 = vpow2.f32 %v5295_v53  ;;  %v4635_v2 = vadd.f32 %v4603_v0, %v3897_v60  ;;  %v3964_v60 = vmax.f32 %v3722_v31, 0.0 }
 0x342   : > { %5555 = vpow2.f32 %v5309_v54 }
 0x343   : > { %v3847_v51 = vpop.f32.mrf.mxu3  ;;  %v5383_v45 = vpack.c.bf16 %v4635_v2, %v4634_v63 }
 0x344   : > { %v3848_v33 = vadd.f32 %v3847_v51, %v7509_v17  ;;  %v3812_v61 = vpop.f32.mrf.mxu1  ;;  %v3723_v38 = vpop.f32.mrf.mxu0 }
 0x345   : > { %v3813_v59 = vadd.f32 %v3812_v61, %v7509_v17  ;;  %5443 = vst [vmem:[%s7616_s27 + $0x20] sm:$0xff] %v5383_v45   ;;  %v3724_v44 = vadd.f32 %v3723_v38, %v7534_v32  ;;  %v7821_v45 = vadd.f32 %v7550_v41, %v7534_v32 }
 0x346   : > { %v5310_v20 = vmul.f32 -1.442695, %v3848_v33  ;;  %v3899_v35 = vpop.f32.mrf.mxu2 }
 0x347   : > { %v5554_v29 = vpop.eup %5553  ;;  %v5296_v7 = vmul.f32 -1.442695, %v3813_v59 }
 0x348   : > { %v4092_v14 = vadd.f32 1.0, %v5554_v29  ;;  %v5556_v19 = vpop.eup %5555  ;;  %v3978_v29 = vmax.f32 %v7798_v8, 0.0 }
 0x349   : > { %v7778_v1 = vadd.f32 1.0, %v5556_v19 }
 0x34a   : > { %5557 = vrcp.f32 %v4092_v14  ;;  %vm4269_vm11 = vweird.f32 %v4092_v14  ;;  %v4275_v40 = vand.u32 2147483648, %v4092_v14  ;;  %v4273_v28 = vand.u32 2147483647, %v4092_v14 }
 0x34b   : > { %v3850_v5 = vpop.f32.mrf.mxu3  ;;  %5559 = vpow2.f32 %v5296_v7  ;;  %v4485_v12 = vand.u32 2147483648, %v7778_v1  ;;  %v4483_v19 = vand.u32 2147483647, %v7778_v1  ;;  %vm4479_vm6 = vweird.f32 %v7778_v1 }
 0x34c   : > { %5561 = vpow2.f32 %v5310_v20  ;;  %v3851_v22 = vadd.f32 %v3850_v5, %v7509_v17  ;;  %v4276_v48 = vor.u32 1.1754944e-38, %v4275_v40  ;;  %vm4274_vm3 = vcmp.eq.f32.partialorder %v4273_v28, 8.507059e+37 }
 0x34d   : > { %5563 = vrcp.f32 %v7778_v1  ;;  %v7824_v5 = vor.u32 1.1754944e-38, %v4485_v12  ;;  %vm7876_vm0 = vcmp.eq.f32.partialorder %v4483_v19, 8.507059e+37 }
 0x34e   : > { %v3815_v30 = vpop.f32.mrf.mxu1  ;;  %v5311_v6 = vmul.f32 -1.442695, %v3851_v22  ;;  %v3901_v61 = vpop.f32.mrf.mxu2 }
 0x34f   : > { %v3816_v42 = vadd.f32 %v3815_v30, %v7509_v17  ;;  %v3726_v2 = vpop.f32.mrf.mxu0 }
 0x350   : > { %v5558_v4 = vpop.eup %5557 }
 0x351   : > { %v5560_v21 = vpop.eup %5559  ;;  %v5297_v3 = vmul.f32 -1.442695, %v3816_v42  ;;  %v4265_v26 = vmul.f32 %v5558_v4, %v4092_v14  ;;  %vm4270_vm12 = vweird.f32 %v5558_v4 }
 0x352   : > { %v5562_v10 = vpop.eup %5561  ;;  %v7782_v43 = vadd.f32 1.0, %v5560_v21  ;;  %vm7790_vm2 = vmor %vm4269_vm11, %vm4270_vm12 }
 0x353   : > { %v3852_v37 = vpop.f32.mrf.mxu3  ;;  %5565 = vpow2.f32 %v5297_v3  ;;  %v4266_v62 = vsub.f32 1.0, %v4265_v26  ;;  %v7786_v39 = vadd.f32 1.0, %v5562_v10  ;;  %v7794_v53 = vpop.eup %5563  ;;  %v3965_v3 = vmax.f32 %v3724_v44, 0.0 }
 0x354   : > { %5567 = vrcp.f32 %v7782_v43  ;;  %v3853_v27 = vadd.f32 %v3852_v37, %v7509_v17  ;;  %vm4284_vm4 = vweird.f32 %v7782_v43  ;;  %v4290_v33 = vand.u32 2147483648, %v7782_v43 }
 0x355   : > { %5569 = vpow2.f32 %v5311_v6  ;;  %v4267_v34 = vmul.f32 %v5558_v4, %v4266_v62  ;;  %v4288_v59 = vand.u32 2147483647, %v7782_v43  ;;  %v4475_v7 = vmul.f32 %v7794_v53, %v7778_v1 }
 0x356   : > { %v5312_v49 = vmul.f32 -1.442695, %v3853_v27  ;;  %v3817_v36 = vpop.f32.mrf.mxu1  ;;  %5571 = vrcp.f32 %v7786_v39  ;;  %v4291_v41 = vor.u32 1.1754944e-38, %v4290_v33  ;;  %vm4480_vm15 = vweird.f32 %v7794_v53 }
 0x357   : > { %v3818_v50 = vadd.f32 %v3817_v36, %v7509_v17  ;;  %v4268_v52 = vadd.f32 %v5558_v4, %v4267_v34  ;;  %vm4289_vm14 = vcmp.eq.f32.partialorder %v4288_v59, 8.507059e+37  ;;  %v4476_v37 = vsub.f32 1.0, %v4475_v7  ;;  %vm7893_vm11 = vmor %vm4479_vm6, %vm4480_vm15 }
 0x358   : > { %5573 = vpow2.f32 %v5312_v49  ;;  %vm4494_vm9 = vweird.f32 %v7786_v39  ;;  %v3727_v33 = vadd.f32 %v3726_v2, %v7534_v32 }
 0x359   : > { %v5566_v9 = vpop.eup %5565  ;;  %v5298_v56 = vmul.f32 -1.442695, %v3818_v50  ;;  %v4272_v57 = vsel %vm7790_vm2, %v5558_v4, %v4268_v52  ;;  %v3900_v4 = vadd.f32 %v3899_v35, %v7558_v47 }
 0x35a   : > { %v5568_v55 = vpop.eup %5567  ;;  %v7801_v54 = vadd.f32 1.0, %v5566_v9  ;;  %v4277_v63 = vsel %vm4274_vm3, %v4276_v48, %v4272_v57  ;;  %v4477_v48 = vmul.f32 %v7794_v53, %v4476_v37 }
 0x35b   : > { %v5570_v18 = vpop.eup %5569  ;;  %v3855_v46 = vpop.f32.mrf.mxu3  ;;  %5575 = vpow2.f32 %v5298_v56  ;;  %v4280_v51 = vmul.f32 %v5568_v55, %v7782_v43  ;;  %vm4285_vm13 = vweird.f32 %v5568_v55  ;;  %v4604_v42 = vmul.f32 %v4277_v63, %v3964_v60 }
 0x35c   : > { %5577 = vrcp.f32 %v7801_v54  ;;  %v7815_v20 = vadd.f32 1.0, %v5570_v18  ;;  %v7817_v14 = vpop.eup %5571  ;;  %v3856_v30 = vadd.f32 %v3855_v46, %v7509_v17  ;;  %vm7831_vm5 = vmor %vm4284_vm4, %vm4285_vm13  ;;  %v3902_v43 = vadd.f32 %v3901_v61, %v7558_v47  ;;  %v3904_v56 = vpop.f32.mrf.mxu2 }
 0x35d   : > { %v4281_v0 = vsub.f32 1.0, %v4280_v51  ;;  %v4490_v62 = vmul.f32 %v7817_v14, %v7786_v39  ;;  %vm4299_vm7 = vweird.f32 %v7801_v54  ;;  %v4636_v49 = vadd.f32 %v4604_v42, %v3900_v4  ;;  %v3728_v60 = vpop.f32.mrf.mxu0 }
 0x35e   : > { %v5574_v22 = vpop.eup %5573  ;;  %5579 = vrcp.f32 %v7815_v20  ;;  %v5313_v40 = vmul.f32 -1.442695, %v3856_v30  ;;  %v4305_v9 = vand.u32 2147483648, %v7801_v54  ;;  %v4303_v46 = vand.u32 2147483647, %v7801_v54 }
 0x35f   : > { %v4282_v15 = vmul.f32 %v5568_v55, %v4281_v0  ;;  %v7851_v28 = vadd.f32 1.0, %v5574_v22  ;;  %v4500_v51 = vand.u32 2147483648, %v7786_v39  ;;  %v4491_v63 = vsub.f32 1.0, %v4490_v62 }
 0x360   : > { %v4306_v22 = vor.u32 1.1754944e-38, %v4305_v9  ;;  %v4478_v30 = vadd.f32 %v7794_v53, %v4477_v48  ;;  %vm4304_vm1 = vcmp.eq.f32.partialorder %v4303_v46, 8.507059e+37  ;;  %vm4495_vm3 = vweird.f32 %v7817_v14 }
 0x361   : > { %v5576_v6 = vpop.eup %5575  ;;  %v4283_v26 = vadd.f32 %v5568_v55, %v4282_v15  ;;  %v7966_v15 = vadd.f32 %v7676_v25, %v7534_v32 }
 0x362   : > { %v7837_v10 = vpop.eup %5577  ;;  %v7840_v35 = vadd.f32 1.0, %v5576_v6  ;;  %v3966_v6 = vmax.f32 %v3727_v33, 0.0 }
 0x363   : > { %v3857_v38 = vpop.f32.mrf.mxu3  ;;  %v4287_v27 = vsel %vm7831_vm5, %v5568_v55, %v4283_v26  ;;  %v4295_v34 = vmul.f32 %v7837_v10, %v7801_v54  ;;  %vm4300_vm8 = vweird.f32 %v7837_v10  ;;  %v4498_v55 = vand.u32 2147483647, %v7786_v39  ;;  %vm7928_vm5 = vmor %vm4494_vm9, %vm4495_vm3 }
 0x364   : > { %5581 = vrcp.f32 %v7840_v35  ;;  %v4292_v36 = vsel %vm4289_vm14, %v4291_v41, %v4287_v27  ;;  %v7862_v12 = vpop.eup %5579  ;;  %vm7869_vm10 = vmor %vm4299_vm7, %vm4300_vm8  ;;  %v3858_v0 = vadd.f32 %v3857_v38, %v7509_v17  ;;  %v3729_v54 = vadd.f32 %v3728_v60, %v7534_v32  ;;  %v3906_v48 = vpop.f32.mrf.mxu2 }
 0x365   : > { %v3820_v50 = vpop.f32.mrf.mxu1  ;;  %v4605_v31 = vmul.f32 %v4292_v36, %v3965_v3  ;;  %v4296_v52 = vsub.f32 1.0, %v4295_v34  ;;  %5583 = vpow2.f32 %v5313_v40  ;;  %v4505_v42 = vmul.f32 %v7862_v12, %v7815_v20 }
 0x366   : > { %v3821_v58 = vadd.f32 %v3820_v50, %v7509_v17  ;;  %5585 = vrcp.f32 %v7851_v28  ;;  %v4318_v3 = vand.u32 2147483647, %v7840_v35  ;;  %v4320_v26 = vand.u32 2147483648, %v7840_v35  ;;  %v3731_v61 = vpop.f32.mrf.mxu0 }
 0x367   : > { %v4637_v57 = vadd.f32 %v4605_v31, %v3902_v43  ;;  %v4297_v18 = vmul.f32 %v7837_v10, %v4296_v52  ;;  %v4492_v43 = vmul.f32 %v7817_v14, %v4491_v63  ;;  %v5314_v37 = vmul.f32 -1.442695, %v3858_v0 }
 0x368   : > { %v5299_v44 = vmul.f32 -1.442695, %v3821_v58  ;;  %vm4314_vm12 = vweird.f32 %v7840_v35  ;;  %v4482_v34 = vsel %vm7893_vm11, %v7794_v53, %v4478_v30  ;;  %v3967_v36 = vmax.f32 %v3729_v54, 0.0 }
 0x369   : > { %v5388_v59 = vpack.c.bf16 %v4637_v57, %v4636_v49  ;;  %v4298_v7 = vadd.f32 %v7837_v10, %v4297_v18  ;;  %v3905_v49 = vadd.f32 %v3904_v56, %v7558_v47  ;;  %v4506_v31 = vsub.f32 1.0, %v4505_v42 }
 0x36a   : > { %v5582_v2 = vpop.eup %5581  ;;  %5587 = vpow2.f32 %v5299_v44  ;;  %vm7913_vm13 = vcmp.eq.f32.partialorder %v4318_v3, 8.507059e+37  ;;  %v4321_v53 = vor.u32 1.1754944e-38, %v4320_v26  ;;  %v4493_v57 = vadd.f32 %v7817_v14, %v4492_v43 }
 0x36b   : > { %v3860_v4 = vpop.f32.mrf.mxu3  ;;  %5444 = vst [vmem:[%s7616_s27 + $0x28] sm:$0xff] %v5388_v59   ;;  %v4302_v21 = vsel %vm7869_vm10, %v7837_v10, %v4298_v7  ;;  %v4310_v19 = vmul.f32 %v5582_v2, %v7840_v35  ;;  %vm4315_vm2 = vweird.f32 %v5582_v2  ;;  %v5584_v38 = vpop.eup %5583  ;;  %5589 = vpow2.f32 %v5314_v37 }
 0x36c   : > { %v4307_v27 = vsel %vm4304_vm1, %v4306_v22, %v4302_v21  ;;  %v7906_v40 = vpop.eup %5585  ;;  %vm7909_vm4 = vmor %vm4314_vm12, %vm4315_vm2  ;;  %v3979_v60 = vmax.f32 %v7821_v45, 0.0  ;;  %v7921_v44 = vadd.f32 1.0, %v5584_v38  ;;  %v3861_v33 = vadd.f32 %v3860_v4, %v7509_v17 }
 0x36d   : > { %v3822_v10 = vpop.f32.mrf.mxu1  ;;  %v4311_v62 = vsub.f32 1.0, %v4310_v19  ;;  %v4606_v56 = vmul.f32 %v4307_v27, %v3966_v6  ;;  %v4520_v0 = vmul.f32 %v7906_v40, %v7851_v28  ;;  %v3907_v7 = vadd.f32 %v3906_v48, %v7558_v47 }
 0x36e   : > { %v3823_v1 = vadd.f32 %v3822_v10, %v7509_v17  ;;  %v4487_v54 = vsel %vm7876_vm0, %v7824_v5, %v4482_v34  ;;  %vm7945_vm6 = vcmp.eq.f32.partialorder %v4498_v55, 8.507059e+37  ;;  %v4501_v42 = vor.u32 1.1754944e-38, %v4500_v51 }
 0x36f   : > { %v4312_v50 = vmul.f32 %v5582_v2, %v4311_v62  ;;  %v4638_v4 = vadd.f32 %v4606_v56, %v3905_v49  ;;  %v4497_v21 = vsel %vm7928_vm5, %v7817_v14, %v4493_v57  ;;  %v4507_v19 = vmul.f32 %v7862_v12, %v4506_v31 }
 0x370   : > { %v5588_v52 = vpop.eup %5587  ;;  %v5300_v35 = vmul.f32 -1.442695, %v3823_v1  ;;  %v7957_v5 = vadd.f32 %v7591_v24, %v7534_v32  ;;  %v7961_v55 = vadd.f32 %v7643_v23, %v7534_v32  ;;  %v5315_v39 = vmul.f32 -1.442695, %v3861_v33  ;;  %v3909_v1 = vpop.f32.mrf.mxu2 }
 0x371   : > { %v7918_v18 = vadd.f32 1.0, %v5588_v52  ;;  %v4313_v46 = vadd.f32 %v5582_v2, %v4312_v50  ;;  %v5590_v51 = vpop.eup %5589  ;;  %v7970_v14 = vadd.f32 %v7708_v13, %v7534_v32  ;;  %v4521_v6 = vsub.f32 1.0, %v4520_v0 }
 0x372   : > { %5591 = vpow2.f32 %v5300_v35  ;;  %v7974_v23 = vmul.f32 %v4487_v54, %v3978_v29  ;;  %v4502_v3 = vsel %vm7945_vm6, %v4501_v42, %v4497_v21  ;;  %vm4509_vm14 = vweird.f32 %v7815_v20  ;;  %v3733_v35 = vpop.f32.mrf.mxu0 }
 0x373   : > { %5593 = vrcp.f32 %v7918_v18  ;;  %v3862_v45 = vpop.f32.mrf.mxu3  ;;  %v4317_v59 = vsel %vm7909_vm4, %v5582_v2, %v4313_v46  ;;  %vm4510_vm15 = vweird.f32 %v7862_v12  ;;  %v7985_v43 = vadd.f32 %v3731_v61, %v7534_v32 }
 0x374   : > { %v4322_v22 = vsel %vm7913_vm13, %v4321_v53, %v4317_v59  ;;  %5595 = vrcp.f32 %v7921_v44  ;;  %v7988_v8 = vadd.f32 %v7862_v12, %v4507_v19  ;;  %v7990_v29 = vadd.f32 1.0, %v5590_v51  ;;  %vm8001_vm7 = vmor %vm4509_vm14, %vm4510_vm15 }
 0x375   : > { %v4607_v2 = vmul.f32 %v4322_v22, %v3967_v36  ;;  %5597 = vpow2.f32 %v5315_v39  ;;  %v4515_v10 = vand.u32 2147483648, %v7815_v20  ;;  %v4619_v38 = vmul.f32 %v4502_v3, %v3979_v60 }
 0x376   : > { %v4513_v34 = vand.u32 2147483647, %v7815_v20  ;;  %v4522_v49 = vmul.f32 %v7906_v40, %v4521_v6  ;;  %vm4329_vm8 = vweird.f32 %v7918_v18  ;;  %v4333_v52 = vand.u32 2147483647, %v7918_v18 }
 0x377   : > { %v4639_v41 = vadd.f32 %v4607_v2, %v3907_v7  ;;  %v3863_v58 = vadd.f32 %v3862_v45, %v7509_v17  ;;  %v3968_v53 = vmax.f32 %v7985_v43, 0.0  ;;  %v4335_v20 = vand.u32 2147483648, %v7918_v18 }
 0x378   : > { %v5592_v24 = vpop.eup %5591  ;;  %v4512_v57 = vsel %vm8001_vm7, %v7862_v12, %v7988_v8  ;;  %v8022_v56 = vor.u32 1.1754944e-38, %v4515_v10  ;;  %v8034_v61 = vadd.f32 %v3733_v35, %v7534_v32  ;;  %vm8037_vm0 = vcmp.eq.f32.partialorder %v4333_v52, 8.507059e+37 }
 0x379   : > { %v7980_v25 = vpop.eup %5593  ;;  %v7982_v26 = vadd.f32 1.0, %v5592_v24  ;;  %v5393_v13 = vpack.c.bf16 %v4639_v41, %v4638_v4  ;;  %v8042_v59 = vadd.f32 %v7906_v40, %v4522_v49  ;;  %vm4524_vm1 = vweird.f32 %v7851_v28 }
 0x37a   : > { %v4325_v37 = vmul.f32 %v7980_v25, %v7918_v18  ;;  %v8007_v36 = vpop.eup %5595  ;;  %vm4330_vm9 = vweird.f32 %v7980_v25  ;;  %v8031_v18 = vadd.f32 %v3909_v1, %v7558_v47  ;;  %v5316_v22 = vmul.f32 -1.442695, %v3863_v58 }
 0x37b   : > { %5599 = vrcp.f32 %v7982_v26  ;;  %v3934_v62 = vpop.f32.mrf.mxu3  ;;  %5445 = vst [vmem:[%s7616_s27 + $0x30] sm:$0xff] %v5393_v13   ;;  %v4535_v46 = vmul.f32 %v8007_v36, %v7921_v44  ;;  %vm8026_vm10 = vmor %vm4329_vm8, %vm4330_vm9  ;;  %v5598_v63 = vpop.eup %5597  ;;  %v4336_v54 = vor.u32 1.1754944e-38, %v4335_v20  ;;  %vm8045_vm11 = vcmp.eq.f32.partialorder %v4513_v34, 8.507059e+37 }
 0x37c   : > { %v3825_v50 = vpop.f32.mrf.mxu1  ;;  %v4326_v31 = vsub.f32 1.0, %v4325_v37  ;;  %5601 = vrcp.f32 %v7990_v29  ;;  %vm4525_vm12 = vweird.f32 %v7906_v40  ;;  %v4528_v42 = vand.u32 2147483647, %v7851_v28 }
 0x37d   : > { %v3826_v9 = vadd.f32 %v3825_v50, %v7509_v17  ;;  %v3935_v4 = vadd.f32 %v3934_v62, %v7558_v47  ;;  %v8056_v19 = vadd.f32 1.0, %v5598_v63  ;;  %v3969_v51 = vmax.f32 %v8034_v61, 0.0  ;;  %v3911_v50 = vpop.f32.mrf.mxu2  ;;  %vm8074_vm4 = vmor %vm4524_vm1, %vm4525_vm12 }
 0x37e   : > { %v4327_v48 = vmul.f32 %v7980_v25, %v4326_v31  ;;  %vm4344_vm2 = vweird.f32 %v7982_v26  ;;  %v4350_v41 = vand.u32 2147483648, %v7982_v26  ;;  %v4530_v10 = vand.u32 2147483648, %v7851_v28 }
 0x37f   : > { %v5301_v60 = vmul.f32 -1.442695, %v3826_v9  ;;  %v4536_v62 = vsub.f32 1.0, %v4535_v46  ;;  %v4650_v1 = vadd.f32 %v7974_v23, %v3935_v4  ;;  %v3912_v46 = vadd.f32 %v3911_v50, %v7558_v47 }
 0x380   : > { %v4328_v0 = vadd.f32 %v7980_v25, %v4327_v48  ;;  %v4527_v33 = vsel %vm8074_vm4, %v7906_v40, %v8042_v59  ;;  %vm8099_vm6 = vcmp.eq.f32.partialorder %v4528_v42, 8.507059e+37  ;;  %v4531_v61 = vor.u32 1.1754944e-38, %v4530_v10  ;;  %v3736_v59 = vpop.f32.mrf.mxu0 }
 0x381   : > { %v5600_v7 = vpop.eup %5599  ;;  %5603 = vpow2.f32 %v5301_v60  ;;  %v4537_v60 = vmul.f32 %v8007_v36, %v4536_v62  ;;  %vm4539_vm14 = vweird.f32 %v7921_v44  ;;  %vm4540_vm15 = vweird.f32 %v8007_v36 }
 0x382   : > { %v4332_v2 = vsel %vm8026_vm10, %v7980_v25, %v4328_v0  ;;  %v4340_v21 = vmul.f32 %v5600_v7, %v7982_v26  ;;  %v8061_v6 = vpop.eup %5601  ;;  %vm4345_vm3 = vweird.f32 %v5600_v7  ;;  %v4348_v25 = vand.u32 2147483647, %v7982_v26  ;;  %vm8128_vm7 = vmor %vm4539_vm14, %vm4540_vm15 }
 0x383   : > { %v3936_v39 = vpop.f32.mrf.mxu3  ;;  %v4337_v43 = vsel %vm8037_vm0, %v4336_v54, %v4332_v2  ;;  %5605 = vpow2.f32 %v5316_v22  ;;  %v4550_v52 = vmul.f32 %v8061_v6, %v7990_v29  ;;  %vm8084_vm13 = vmor %vm4344_vm2, %vm4345_vm3  ;;  %v4517_v40 = vsel %vm8045_vm11, %v8022_v56, %v4512_v57 }
 0x384   : > { %v3937_v24 = vadd.f32 %v3936_v39, %v7558_v47  ;;  %v3827_v3 = vpop.f32.mrf.mxu1  ;;  %v4341_v13 = vsub.f32 1.0, %v4340_v21  ;;  %5607 = vrcp.f32 %v8056_v19  ;;  %v4608_v58 = vmul.f32 %v4337_v43, %v3968_v53 }
 0x385   : > { %v3828_v37 = vadd.f32 %v3827_v3, %v7509_v17  ;;  %vm4349_vm5 = vcmp.eq.f32.partialorder %v4348_v25, 8.507059e+37  ;;  %v4551_v54 = vsub.f32 1.0, %v4550_v52  ;;  %v3980_v4 = vmax.f32 %v7957_v5, 0.0  ;;  %v8148_v62 = vpop.f32.mrf.mxu2 }
 0x386   : > { %v4651_v34 = vadd.f32 %v4619_v38, %v3937_v24  ;;  %v4342_v49 = vmul.f32 %v5600_v7, %v4341_v13  ;;  %v4351_v38 = vor.u32 1.1754944e-38, %v4350_v41  ;;  %v3981_v2 = vmax.f32 %v7961_v55, 0.0 }
 0x387   : > { %v5302_v35 = vmul.f32 -1.442695, %v3828_v37  ;;  %v5604_v28 = vpop.eup %5603  ;;  %v4538_v21 = vadd.f32 %v8007_v36, %v4537_v60  ;;  %v3983_v27 = vmax.f32 %v7970_v14, 0.0  ;;  %v4532_v8 = vsel %vm8099_vm6, %v4531_v61, %v4527_v33 }
 0x388   : > { %v5423_v9 = vpack.c.bf16 %v4651_v34, %v4650_v1  ;;  %v4343_v20 = vadd.f32 %v5600_v7, %v4342_v49  ;;  %v8088_v48 = vadd.f32 1.0, %v5604_v28  ;;  %v4543_v5 = vand.u32 2147483647, %v7921_v44  ;;  %v3738_v60 = vpop.f32.mrf.mxu0 }
 0x389   : > { %5609 = vpow2.f32 %v5302_v35  ;;  %v5606_v45 = vpop.eup %5605  ;;  %v8135_v56 = vadd.f32 %v7723_v16, %v7534_v32  ;;  %v4620_v30 = vmul.f32 %v4517_v40, %v3980_v4  ;;  %v4545_v41 = vand.u32 2147483648, %v7921_v44 }
 0x38a   : > { %5451 = vst [vmem:[%s7616_s27 + $0x60] sm:$0xff] %v5423_v9   ;;  %v4347_v26 = vsel %vm8084_vm13, %v5600_v7, %v4343_v20  ;;  %5611 = vrcp.f32 %v8088_v48  ;;  %v4640_v7 = vadd.f32 %v4608_v58, %v8031_v18  ;;  %v8115_v42 = vpop.eup %5607  ;;  %v3982_v18 = vmax.f32 %v7966_v15, 0.0 }
 0x38b   : > { %v4352_v63 = vsel %vm4349_vm5, %v4351_v38, %v4347_v26  ;;  %v3939_v0 = vpop.f32.mrf.mxu3  ;;  %v8139_v24 = vadd.f32 1.0, %v5606_v45  ;;  %v4552_v25 = vmul.f32 %v8061_v6, %v4551_v54  ;;  %v4565_v37 = vmul.f32 %v8115_v42, %v8056_v19 }
 0x38c   : > { %v4609_v22 = vmul.f32 %v4352_v63, %v3969_v51  ;;  %v4621_v10 = vmul.f32 %v4532_v8, %v3981_v2  ;;  %v4542_v44 = vsel %vm8128_vm7, %v8007_v36, %v4538_v21  ;;  %v3940_v1 = vadd.f32 %v3939_v0, %v7558_v47 }
 0x38d   : > { %vm8158_vm8 = vcmp.eq.f32.partialorder %v4543_v5, 8.507059e+37  ;;  %v4546_v31 = vor.u32 1.1754944e-38, %v4545_v41  ;;  %vm4554_vm9 = vweird.f32 %v7990_v29  ;;  %vm4555_vm10 = vweird.f32 %v8061_v6 }
 0x38e   : > { %v3830_v39 = vpop.f32.mrf.mxu1  ;;  %v4641_v12 = vadd.f32 %v4609_v22, %v3912_v46  ;;  %v4553_v35 = vadd.f32 %v8061_v6, %v4552_v25  ;;  %vm4359_vm0 = vweird.f32 %v8088_v48  ;;  %v4558_v23 = vand.u32 2147483647, %v7990_v29  ;;  %vm8177_vm11 = vmor %vm4554_vm9, %vm4555_vm10 }
 0x38f   : > { %v5610_v55 = vpop.eup %5609  ;;  %v3831_v51 = vadd.f32 %v3830_v39, %v7509_v17  ;;  %v4560_v38 = vand.u32 2147483648, %v7990_v29  ;;  %v4652_v28 = vadd.f32 %v4620_v30, %v3940_v1  ;;  %v4365_v46 = vand.u32 2147483648, %v8088_v48 }
 0x390   : > { %v8141_v3 = vadd.f32 1.0, %v5610_v55  ;;  %v5398_v13 = vpack.c.bf16 %v4641_v12, %v4640_v7  ;;  %v8144_v43 = vpop.eup %5611  ;;  %v8183_v33 = vadd.f32 %v7748_v11, %v7534_v32  ;;  %v4363_v61 = vand.u32 2147483647, %v8088_v48  ;;  %v3916_v55 = vpop.f32.mrf.mxu2 }
 0x391   : > { %v5303_v16 = vmul.f32 -1.442695, %v3831_v51  ;;  %v4355_v34 = vmul.f32 %v8144_v43, %v8088_v48  ;;  %vm4360_vm1 = vweird.f32 %v8144_v43  ;;  %v4547_v63 = vsel %vm8158_vm8, %v4546_v31, %v4542_v44 }
 0x392   : > { %5613 = vrcp.f32 %v8141_v3  ;;  %5446 = vst [vmem:[%s7616_s27 + $0x38] sm:$0xff] %v5398_v13   ;;  %v3737_v29 = vadd.f32 %v3736_v59, %v7534_v32  ;;  %vm8195_vm12 = vmor %vm4359_vm0, %vm4360_vm1  ;;  %v4566_v22 = vsub.f32 1.0, %v4565_v37  ;;  %v4557_v2 = vsel %vm8177_vm11, %v8061_v6, %v4553_v35 }
 0x393   : > { %5615 = vpow2.f32 %v5303_v16  ;;  %v3941_v50 = vpop.f32.mrf.mxu3  ;;  %v4356_v52 = vsub.f32 1.0, %v4355_v34  ;;  %vm8203_vm2 = vcmp.eq.f32.partialorder %v4558_v23, 8.507059e+37  ;;  %v4366_v39 = vor.u32 1.1754944e-38, %v4365_v46 }
 0x394   : > { %5617 = vrcp.f32 %v8139_v24  ;;  %v3942_v36 = vadd.f32 %v3941_v50, %v7558_v47  ;;  %v3739_v12 = vadd.f32 %v3738_v60, %v7534_v32  ;;  %v4561_v8 = vor.u32 1.1754944e-38, %v4560_v38  ;;  %v3741_v50 = vpop.f32.mrf.mxu0 }
 0x395   : > { %v4357_v20 = vmul.f32 %v8144_v43, %v4356_v52  ;;  %vm4364_vm3 = vcmp.eq.f32.partialorder %v4363_v61, 8.507059e+37  ;;  %v3970_v30 = vmax.f32 %v3737_v29, 0.0  ;;  %v4380_v51 = vand.u32 2147483648, %v8141_v3 }
 0x396   : > { %v4653_v58 = vadd.f32 %v4621_v10, %v3942_v36  ;;  %v3832_v9 = vpop.f32.mrf.mxu1  ;;  %v4567_v41 = vmul.f32 %v8115_v42, %v4566_v22  ;;  %vm4374_vm4 = vweird.f32 %v8141_v3  ;;  %v4378_v25 = vand.u32 2147483647, %v8141_v3 }
 0x397   : > { %v3833_v53 = vadd.f32 %v3832_v9, %v7509_v17  ;;  %v4358_v7 = vadd.f32 %v8144_v43, %v4357_v20  ;;  %v3915_v16 = vadd.f32 %v8148_v62, %v7558_v47  ;;  %v4562_v10 = vsel %vm8203_vm2, %v4561_v8, %v4557_v2 }
 0x398   : > { %v5614_v0 = vpop.eup %5613  ;;  %v5428_v45 = vpack.c.bf16 %v4653_v58, %v4652_v28  ;;  %v4622_v44 = vmul.f32 %v4547_v63, %v3982_v18  ;;  %v3971_v1 = vmax.f32 %v3739_v12, 0.0  ;;  %vm4569_vm5 = vweird.f32 %v8056_v19 }
 0x399   : > { %v5616_v40 = vpop.eup %5615  ;;  %v5304_v54 = vmul.f32 -1.442695, %v3833_v53  ;;  %v4370_v4 = vmul.f32 %v5614_v0, %v8141_v3  ;;  %v4362_v57 = vsel %vm8195_vm12, %v8144_v43, %v4358_v7  ;;  %vm4375_vm13 = vweird.f32 %v5614_v0 }
 0x39a   : > { %v8207_v21 = vpop.eup %5617  ;;  %v8209_v48 = vadd.f32 1.0, %v5616_v40  ;;  %5452 = vst [vmem:[%s7616_s27 + $0x68] sm:$0xff] %v5428_v45   ;;  %v4367_v37 = vsel %vm4364_vm3, %v4366_v39, %v4362_v57  ;;  %vm4376_vm6 = vmor %vm4374_vm4, %vm4375_vm13  ;;  %v4381_v49 = vor.u32 1.1754944e-38, %v4380_v51  ;;  %v3917_v3 = vadd.f32 %v3916_v55, %v7558_v47 }
 0x39b   : > { %5619 = vpow2.f32 %v5304_v54  ;;  %v3944_v6 = vpop.f32.mrf.mxu3  ;;  %v4371_v5 = vsub.f32 1.0, %v4370_v4  ;;  %v4580_v43 = vmul.f32 %v8207_v21, %v8139_v24  ;;  %v8232_v31 = vadd.f32 %v8115_v42, %v4567_v41 }
 0x39c   : > { %5621 = vrcp.f32 %v8209_v48  ;;  %vm4570_vm14 = vweird.f32 %v8115_v42  ;;  %v4610_v36 = vmul.f32 %v4367_v37, %v3970_v30  ;;  %vm4379_vm15 = vcmp.eq.f32.partialorder %v4378_v25, 8.507059e+37 }
 0x39d   : > { %v4372_v13 = vmul.f32 %v5614_v0, %v4371_v5  ;;  %v4623_v15 = vmul.f32 %v4562_v10, %v3983_v27  ;;  %v3945_v23 = vadd.f32 %v3944_v6, %v7558_v47  ;;  %v4581_v28 = vsub.f32 1.0, %v4580_v43  ;;  %vm8263_vm0 = vmor %vm4569_vm5, %vm4570_vm14 }
 0x39e   : > { %v4573_v46 = vand.u32 2147483647, %v8056_v19  ;;  %v4575_v60 = vand.u32 2147483648, %v8056_v19  ;;  %vm4584_vm7 = vweird.f32 %v8139_v24  ;;  %vm4585_vm8 = vweird.f32 %v8207_v21  ;;  %v3743_v19 = vpop.f32.mrf.mxu0 }
 0x39f   : > { %v4373_v34 = vadd.f32 %v5614_v0, %v4372_v13  ;;  %v4642_v27 = vadd.f32 %v4610_v36, %v3915_v16  ;;  %v8251_v61 = vadd.f32 %v3741_v50, %v7534_v32  ;;  %v4654_v45 = vadd.f32 %v4622_v44, %v3945_v23  ;;  %vm8293_vm12 = vmor %vm4584_vm7, %vm4585_vm8 }
 0x3a0   : > { %v4582_v11 = vmul.f32 %v8207_v21, %v4581_v28  ;;  %vm4389_vm9 = vweird.f32 %v8209_v48  ;;  %v4395_v2 = vand.u32 2147483648, %v8209_v48  ;;  %v4590_v39 = vand.u32 2147483648, %v8139_v24 }
 0x3a1   : > { %v5620_v62 = vpop.eup %5619  ;;  %v4377_v52 = vsel %vm4376_vm6, %v5614_v0, %v4373_v34  ;;  %v3919_v0 = vpop.f32.mrf.mxu2  ;;  %v4393_v8 = vand.u32 2147483647, %v8209_v48  ;;  %v3984_v6 = vmax.f32 %v8135_v56, 0.0  ;;  %v4588_v30 = vand.u32 2147483647, %v8139_v24 }
 0x3a2   : > { %v8237_v18 = vpop.eup %5621  ;;  %v8239_v35 = vadd.f32 1.0, %v5620_v62  ;;  %v4382_v38 = vsel %vm4379_vm15, %v4381_v49, %v4377_v52  ;;  %v4583_v55 = vadd.f32 %v8207_v21, %v4582_v11  ;;  %v3985_v51 = vmax.f32 %v8183_v33, 0.0 }
 0x3a3   : > { %v4611_v58 = vmul.f32 %v4382_v38, %v3971_v1  ;;  %v3946_v9 = vpop.f32.mrf.mxu3  ;;  %v4385_v20 = vmul.f32 %v8237_v18, %v8209_v48  ;;  %vm4390_vm10 = vweird.f32 %v8237_v18  ;;  %v4572_v48 = vsel %vm8263_vm0, %v8115_v42, %v8232_v31 }
 0x3a4   : > { %5623 = vrcp.f32 %v8239_v35  ;;  %v3947_v14 = vadd.f32 %v3946_v9, %v7558_v47  ;;  %vm8273_vm1 = vmor %vm4389_vm9, %vm4390_vm10  ;;  %vm8284_vm11 = vcmp.eq.f32.partialorder %v4573_v46, 8.507059e+37  ;;  %v3972_v33 = vmax.f32 %v8251_v61, 0.0 }
 0x3a5   : > { %v4643_v26 = vadd.f32 %v4611_v58, %v3917_v3  ;;  %v3835_v53 = vpop.f32.mrf.mxu1  ;;  %v4386_v63 = vsub.f32 1.0, %v4385_v20  ;;  %v4396_v43 = vor.u32 1.1754944e-38, %v4395_v2  ;;  %v4576_v37 = vor.u32 1.1754944e-38, %v4575_v60 }
 0x3a6   : > { %v4655_v29 = vadd.f32 %v4623_v15, %v3947_v14  ;;  %v3836_v7 = vadd.f32 %v3835_v53, %v7509_v17  ;;  %v4591_v16 = vor.u32 1.1754944e-38, %v4590_v39  ;;  %vm4394_vm2 = vcmp.eq.f32.partialorder %v4393_v8, 8.507059e+37 }
 0x3a7   : > { %v5403_v22 = vpack.c.bf16 %v4643_v26, %v4642_v27  ;;  %v4387_v40 = vmul.f32 %v8237_v18, %v4386_v63  ;;  %v3744_v44 = vadd.f32 %v3743_v19, %v7534_v32  ;;  %v4410_v34 = vand.u32 2147483648, %v8239_v35 }
 0x3a8   : > { %v5433_v54 = vpack.c.bf16 %v4655_v29, %v4654_v45  ;;  %v5305_v4 = vmul.f32 -1.442695, %v3836_v7  ;;  %v4587_v49 = vsel %vm8293_vm12, %v8207_v21, %v4583_v55  ;;  %vm4589_vm3 = vcmp.eq.f32.partialorder %v4588_v30, 8.507059e+37  ;;  %v3746_v7 = vpop.f32.mrf.mxu0 }
 0x3a9   : > { %5447 = vst [vmem:[%s7616_s27 + $0x40] sm:$0xff] %v5403_v22   ;;  %v4388_v12 = vadd.f32 %v8237_v18, %v4387_v40  ;;  %vm4404_vm4 = vweird.f32 %v8239_v35  ;;  %v4408_v50 = vand.u32 2147483647, %v8239_v35  ;;  %v3921_v31 = vpop.f32.mrf.mxu2  ;;  %v4577_v52 = vsel %vm8284_vm11, %v4576_v37, %v4572_v48 }
 0x3aa   : > { %v5624_v57 = vpop.eup %5623  ;;  %5453 = vst [vmem:[%s7616_s27 + $0x70] sm:$0xff] %v5433_v54   ;;  %5625 = vpow2.f32 %v5305_v4  ;;  %v3920_v15 = vadd.f32 %v3919_v0, %v7558_v47  ;;  %v3973_v38 = vmax.f32 %v3744_v44, 0.0  ;;  %v4592_v21 = vsel %vm4589_vm3, %v4591_v16, %v4587_v49 }
 0x3ab   : > { %v3949_v41 = vpop.f32.mrf.mxu3  ;;  %v4400_v13 = vmul.f32 %v5624_v57, %v8239_v35  ;;  %v4392_v42 = vsel %vm8273_vm1, %v8237_v18, %v4388_v12  ;;  %vm4405_vm13 = vweird.f32 %v5624_v57  ;;  %v4411_v9 = vor.u32 1.1754944e-38, %v4410_v34 }
 0x3ac   : > { %v4397_v36 = vsel %vm4394_vm2, %v4396_v43, %v4392_v42  ;;  %v3950_v58 = vadd.f32 %v3949_v41, %v7558_v47  ;;  %vm4406_vm5 = vmor %vm4404_vm4, %vm4405_vm13  ;;  %v3922_v20 = vadd.f32 %v3921_v31, %v7558_v47  ;;  %vm4409_vm6 = vcmp.eq.f32.partialorder %v4408_v50, 8.507059e+37 }
 0x3ad   : > { %v3837_v10 = vpop.f32.mrf.mxu1  ;;  %v4401_v1 = vsub.f32 1.0, %v4400_v13  ;;  %v4612_v46 = vmul.f32 %v4397_v36, %v3972_v33  ;;  %v4624_v27 = vmul.f32 %v4577_v52, %v3984_v6  ;;  %v4625_v61 = vmul.f32 %v4592_v21, %v3985_v51 }
 0x3ae   : > { %v3838_v24 = vadd.f32 %v3837_v10, %v7509_v17  ;;  %v3747_v55 = vadd.f32 %v3746_v7, %v7534_v32 }
 0x3af   : > { %v4402_v3 = vmul.f32 %v5624_v57, %v4401_v1  ;;  %v4656_v0 = vadd.f32 %v4624_v27, %v3950_v58  ;;  %v4644_v35 = vadd.f32 %v4612_v46, %v3920_v15 }
 0x3b0   : > { %v5626_v62 = vpop.eup %5625  ;;  %v5306_v18 = vmul.f32 -1.442695, %v3838_v24  ;;  %v3748_v51 = vpop.f32.mrf.mxu0  ;;  %v3974_v37 = vmax.f32 %v3747_v55, 0.0 }
 0x3b1   : > { %v4102_v23 = vadd.f32 1.0, %v5626_v62  ;;  %v4403_v28 = vadd.f32 %v5624_v57, %v4402_v3  ;;  %v3924_v12 = vpop.f32.mrf.mxu2  ;;  %v3749_v33 = vadd.f32 %v3748_v51, %v7534_v32 }
 0x3b2   : > { %5627 = vpow2.f32 %v5306_v18  ;;  %v3925_v36 = vadd.f32 %v3924_v12, %v7558_v47 }
 0x3b3   : > { %5629 = vrcp.f32 %v4102_v23  ;;  %v4407_v60 = vsel %vm4406_vm5, %v5624_v57, %v4403_v28  ;;  %v3951_v14 = vpop.f32.mrf.mxu3  ;;  %vm4419_vm14 = vweird.f32 %v4102_v23  ;;  %v4425_v30 = vand.u32 2147483648, %v4102_v23 }
 0x3b4   : > { %v4412_v26 = vsel %vm4409_vm6, %v4411_v9, %v4407_v60  ;;  %v3952_v53 = vadd.f32 %v3951_v14, %v7558_v47  ;;  %v4423_v41 = vand.u32 2147483647, %v4102_v23  ;;  %v3975_v31 = vmax.f32 %v3749_v33, 0.0 }
 0x3b5   : > { %v4613_v63 = vmul.f32 %v4412_v26, %v3973_v38  ;;  %v4426_v16 = vor.u32 1.1754944e-38, %v4425_v30 }
 0x3b6   : > { %v4657_v45 = vadd.f32 %v4625_v61, %v3952_v53  ;;  %vm4424_vm8 = vcmp.eq.f32.partialorder %v4423_v41, 8.507059e+37 }
 0x3b7   : > { %v4645_v29 = vadd.f32 %v4613_v63, %v3922_v20 }
 0x3b8   : > { %v5628_v11 = vpop.eup %5627  ;;  %v5438_v22 = vpack.c.bf16 %v4657_v45, %v4656_v0 }
 0x3b9   : > { %v5630_v40 = vpop.eup %5629  ;;  %v4103_v54 = vadd.f32 1.0, %v5628_v11  ;;  %v5408_v4 = vpack.c.bf16 %v4645_v29, %v4644_v35  ;;  %v3926_v24 = vpop.f32.mrf.mxu2 }
 0x3ba   : > { %5454 = vst [vmem:[%s7616_s27 + $0x78] sm:$0xff] %v5438_v22   ;;  %v4415_v2 = vmul.f32 %v5630_v40, %v4102_v23  ;;  %vm4420_vm15 = vweird.f32 %v5630_v40 }
 0x3bb   : > { %5631 = vrcp.f32 %v4103_v54  ;;  %5448 = vst [vmem:[%s7616_s27 + $0x48] sm:$0xff] %v5408_v4   ;;  %vm8321_vm7 = vmor %vm4419_vm14, %vm4420_vm15  ;;  %v4440_v10 = vand.u32 2147483648, %v4103_v54  ;;  %v4438_v1 = vand.u32 2147483647, %v4103_v54  ;;  %vm4434_vm10 = vweird.f32 %v4103_v54 }
 0x3bc   : > { %v3840_v59 = vpop.f32.mrf.mxu1  ;;  %v4416_v39 = vsub.f32 1.0, %v4415_v2 }
 0x3bd   : > { %v3841_v8 = vadd.f32 %v3840_v59, %v7509_v17  ;;  %v4441_v52 = vor.u32 1.1754944e-38, %v4440_v10  ;;  %vm4439_vm1 = vcmp.eq.f32.partialorder %v4438_v1, 8.507059e+37  ;;  %v3751_v9 = vpop.f32.mrf.mxu0 }
 0x3be   : > { %v4417_v57 = vmul.f32 %v5630_v40, %v4416_v39  ;;  %v3752_v0 = vadd.f32 %v3751_v9, %v7534_v32 }
 0x3bf   : > { %v5307_v6 = vmul.f32 -1.442695, %v3841_v8 }
 0x3c0   : > { %v4418_v5 = vadd.f32 %v5630_v40, %v4417_v57 }
 0x3c1   : > { %v5632_v19 = vpop.eup %5631  ;;  %5633 = vpow2.f32 %v5307_v6 }
 0x3c2   : > { %v4430_v48 = vmul.f32 %v5632_v19, %v4103_v54  ;;  %v4422_v13 = vsel %vm8321_vm7, %v5630_v40, %v4418_v5  ;;  %vm4435_vm9 = vweird.f32 %v5632_v19  ;;  %v3929_v53 = vpop.f32.mrf.mxu2  ;;  %v3976_v40 = vmax.f32 %v3752_v0, 0.0 }
 0x3c3   : > { %v4427_v49 = vsel %vm4424_vm8, %v4426_v16, %v4422_v13  ;;  %vm4436_vm0 = vmor %vm4434_vm10, %vm4435_vm9  ;;  %v3930_v57 = vadd.f32 %v3929_v53, %v7558_v47 }
 0x3c4   : > { %v3842_v25 = vpop.f32.mrf.mxu1  ;;  %v4431_v43 = vsub.f32 1.0, %v4430_v48  ;;  %v4614_v15 = vmul.f32 %v4427_v49, %v3974_v37 }
 0x3c5   : > { %v3843_v42 = vadd.f32 %v3842_v25, %v7509_v17  ;;  %v3927_v17 = vadd.f32 %v3926_v24, %v7558_v47  ;;  %v3753_v29 = vpop.f32.mrf.mxu0 }
 0x3c6   : > { %v4432_v44 = vmul.f32 %v5632_v19, %v4431_v43  ;;  %v4646_v28 = vadd.f32 %v4614_v15, %v3925_v36  ;;  %v3754_v4 = vadd.f32 %v3753_v29, %v7534_v32 }
 0x3c7   : > { %v5634_v34 = vpop.eup %5633  ;;  %v5308_v3 = vmul.f32 -1.442695, %v3843_v42 }
 0x3c8   : > { %v4104_v50 = vadd.f32 1.0, %v5634_v34  ;;  %v4433_v62 = vadd.f32 %v5632_v19, %v4432_v44  ;;  %v3977_v55 = vmax.f32 %v3754_v4, 0.0 }
 0x3c9   : > { %5635 = vpow2.f32 %v5308_v3 }
 0x3ca   : > { %5637 = vrcp.f32 %v4104_v50  ;;  %v4437_v18 = vsel %vm4436_vm0, %v5632_v19, %v4433_v62  ;;  %v4455_v45 = vand.u32 2147483648, %v4104_v50  ;;  %vm4449_vm12 = vweird.f32 %v4104_v50  ;;  %v3931_v5 = vpop.f32.mrf.mxu2 }
 0x3cb   : > { %v4442_v23 = vsel %vm4439_vm1, %v4441_v52, %v4437_v18  ;;  %v4453_v35 = vand.u32 2147483647, %v4104_v50  ;;  %v3932_v41 = vadd.f32 %v3931_v5, %v7558_v47 }
 0x3cc   : > { %v4615_v38 = vmul.f32 %v4442_v23, %v3975_v31  ;;  %v4456_v54 = vor.u32 1.1754944e-38, %v4455_v45 }
 0x3cd   : > { %vm4454_vm3 = vcmp.eq.f32.partialorder %v4453_v35, 8.507059e+37 }
 0x3ce   : > { %v4647_v21 = vadd.f32 %v4615_v38, %v3927_v17 }
 0x3cf   : > { %v5636_v58 = vpop.eup %5635 }
 0x3d0   : > { %v5638_v20 = vpop.eup %5637  ;;  %v4105_v46 = vadd.f32 1.0, %v5636_v58  ;;  %v5413_v60 = vpack.c.bf16 %v4647_v21, %v4646_v28 }
 0x3d1   : > { %v4445_v14 = vmul.f32 %v5638_v20, %v4104_v50  ;;  %vm4450_vm11 = vweird.f32 %v5638_v20 }
 0x3d2   : > { %5639 = vrcp.f32 %v4105_v46  ;;  %5449 = vst [vmem:[%s7616_s27 + $0x50] sm:$0xff] %v5413_v60   ;;  %vm4451_vm2 = vmor %vm4449_vm12, %vm4450_vm11  ;;  %v4470_v2 = vand.u32 2147483648, %v4105_v46  ;;  %v4468_v39 = vand.u32 2147483647, %v4105_v46  ;;  %vm4464_vm13 = vweird.f32 %v4105_v46 }
 0x3d3   : > { %v4446_v27 = vsub.f32 1.0, %v4445_v14 }
 0x3d4   : > { %v4471_v6 = vor.u32 1.1754944e-38, %v4470_v2  ;;  %vm4469_vm6 = vcmp.eq.f32.partialorder %v4468_v39, 8.507059e+37 }
 0x3d5   : > { %v4447_v26 = vmul.f32 %v5638_v20, %v4446_v27 }
 0x3d7   : > { %v4448_v61 = vadd.f32 %v5638_v20, %v4447_v26 }
 0x3d8   : > { %v5640_v63 = vpop.eup %5639 }
 0x3d9   : > { %v4460_v7 = vmul.f32 %v5640_v63, %v4105_v46  ;;  %v4452_v11 = vsel %vm4451_vm2, %v5638_v20, %v4448_v61  ;;  %vm4465_vm4 = vweird.f32 %v5640_v63 }
 0x3da   : > { %v4457_v12 = vsel %vm4454_vm3, %v4456_v54, %v4452_v11  ;;  %vm4466_vm5 = vmor %vm4464_vm13, %vm4465_vm4 }
 0x3db   : > { %v4461_v22 = vsub.f32 1.0, %v4460_v7  ;;  %v4616_v19 = vmul.f32 %v4457_v12, %v3976_v40 }
 0x3dd   : > { %v4462_v59 = vmul.f32 %v5640_v63, %v4461_v22  ;;  %v4648_v48 = vadd.f32 %v4616_v19, %v3930_v57 }
 0x3df   : > { %v4463_v8 = vadd.f32 %v5640_v63, %v4462_v59 }
 0x3e1   : > { %v4467_v30 = vsel %vm4466_vm5, %v5640_v63, %v4463_v8 }
 0x3e2   : > { %v4472_v51 = vsel %vm4469_vm6, %v4471_v6, %v4467_v30 }
 0x3e3   : > { %v4617_v32 = vmul.f32 %v4472_v51, %v3977_v55 }
 0x3e5   : > { %v4649_v56 = vadd.f32 %v4617_v32, %v3932_v41 }
 0x3e7   : > { %v5418_v13 = vpack.c.bf16 %v4649_v56, %v4648_v48 }
 0x3e9   : > { %5450 = vst [vmem:[%s7616_s27 + $0x58] sm:$0xff] %v5418_v13  }
 0x3ea PF: > { %s13_s14 = sadd.s32 1, %s5663_s14   ;;  %s8424_s12 = smov %s5659_s13 }
 0x3eb   : > { %p10_p5 = scmp.ge.s32.totalorder %s13_s14, 4   ;;  %s8425_s13 = smov %s8427_s15 }
 0x3ed   :  { %12 = sbr.rel (!%p10_p5) target bundleno = 2 (0x2), region = 65 }

</bundles_post_ra>
